<compile_context>
chip_gen: v7x
topology: tpu7x:2x2x1
jax: 0.10.0
libtpu: 0.0.40
codegen_flags: <defaults>
</compile_context>

<pallas_src>
import jax
import jax.numpy as jnp
from jax.experimental import pallas as pl
from jax.experimental.pallas import tpu as pltpu

NUMM = 784            # 1 * 28 * 28
CLASSES = 10
MAX_TILE = 1024       # upper bound on the batch tile (MXU-friendly, VMEM-safe)


def mlp_kernel(x_ref, w1_ref, b1_ref, w2_ref, b2_ref, w3_ref, b3_ref,
               w4_ref, b4_ref, o_ref):
    # Layer 1: 784 -> 512, ReLU.  f32 x cast to bf16 on-chip, f32 accumulation.
    x = x_ref[...].astype(jnp.bfloat16)
    h = jnp.dot(x, w1_ref[...], preferred_element_type=jnp.float32)
    h = jnp.maximum(h + b1_ref[...], 0.0)
    # Layer 2: 512 -> 128, ReLU (bf16 operands, f32 accumulation).
    h = jnp.dot(h.astype(jnp.bfloat16), w2_ref[...],
                preferred_element_type=jnp.float32)
    h = jnp.maximum(h + b2_ref[...], 0.0)
    # Layer 3: 128 -> 16, ReLU.  Tiny -> keep in f32, no bf16 round-trip.
    h = jnp.dot(h, w3_ref[...], preferred_element_type=jnp.float32)
    h = jnp.maximum(h + b3_ref[...], 0.0)
    # Output head: 16 -> classes, no activation.  Narrow (10-wide) store.
    out = jnp.dot(h, w4_ref[...], preferred_element_type=jnp.float32)
    o_ref[...] = (out + b4_ref[...]).astype(o_ref.dtype)


def _choose_batch_tile(batch):
    """Large tiles (grid-step overhead ~0.35us) but >= 2 steps when possible
    so v7x's two TensorCores both get work on the "parallel" axis."""
    if batch <= 256:
        return 256
    per_core = -(-batch // 2)                 # cdiv(batch, 2)
    tile = -(-per_core // 256) * 256          # round up to a multiple of 256
    return min(MAX_TILE, tile)


def pack_params(params):
    """One-time param packing: bf16 for the two big matmuls, f32 elsewhere.
    Weights are (in_features, out_features); biases are (1, out_features)."""
    (w1, b1), (w2, b2), (w3, b3), (w4, b4) = params
    return (w1.astype(jnp.bfloat16), b1.astype(jnp.float32),
            w2.astype(jnp.bfloat16), b2.astype(jnp.float32),
            w3.astype(jnp.float32), b3.astype(jnp.float32),
            w4.astype(jnp.float32), b4.astype(jnp.float32))


@jax.jit
def mlp_forward(x, packed):
    w1, b1, w2, b2, w3, b3, w4, b4 = packed
    # Flatten like x.view(-1, 784) — a free reshape on contiguous NCHW input.
    x2d = x.reshape(-1, NUMM)
    batch = x2d.shape[0]

    tile = _choose_batch_tile(batch)
    n_tiles = pl.cdiv(batch, tile)

    # Full-array blocks with constant index_maps -> weights/biases stay
    # resident in VMEM across all grid steps.
    full = lambda shape: pl.BlockSpec(shape, lambda i: (0, 0))

    out = pl.pallas_call(
        mlp_kernel,
        out_shape=jax.ShapeDtypeStruct((batch, CLASSES), jnp.float32),
        grid_spec=pltpu.PrefetchScalarGridSpec(
            num_scalar_prefetch=0,
            grid=(n_tiles,),
            in_specs=[
                pl.BlockSpec((tile, NUMM), lambda i: (i, 0)),
                full(w1.shape), full(b1.shape),
                full(w2.shape), full(b2.shape),
                full(w3.shape), full(b3.shape),
                full(w4.shape), full(b4.shape),
            ],
            out_specs=pl.BlockSpec((tile, CLASSES), lambda i: (i, 0)),
        ),
        compiler_params=pltpu.CompilerParams(
            dimension_semantics=("parallel",),
            vmem_limit_bytes=32 * 1024 * 1024),
    )(x2d.astype(jnp.float32), w1, b1, w2, b2, w3, b3, w4, b4)

    return out


def init_params(key):
    """Deterministic PyTorch-style init: U(-1/sqrt(fan_in), 1/sqrt(fan_in)).
    Weights stored as (in_features, out_features); biases as (1, out_features)."""
    dims = [(NUMM, 512), (512, 128), (128, 16), (16, CLASSES)]
    params = []
    for (fan_in, fan_out) in dims:
        key, kw, kb = jax.random.split(key, 3)
        bound = 1.0 / jnp.sqrt(jnp.float32(fan_in))
        w = jax.random.uniform(kw, (fan_in, fan_out), jnp.float32, -bound, bound)
        b = jax.random.uniform(kb, (1, fan_out), jnp.float32, -bound, bound)
        params.append((w, b))
    return params


def reference_forward(x, params):
    """Pure-JAX f32 reference for correctness checking."""
    h = x.reshape(-1, NUMM).astype(jnp.float32)
    (w1, b1), (w2, b2), (w3, b3), (w4, b4) = params
    h = jnp.maximum(h @ w1 + b1, 0.0)
    h = jnp.maximum(h @ w2 + b2, 0.0)
    h = jnp.maximum(h @ w3 + b3, 0.0)
    return h @ w4 + b4


if __name__ == "__main__":
    key = jax.random.PRNGKey(0)
    key, kx1, kx2 = jax.random.split(key, 3)

    params = init_params(key)
    packed = pack_params(params)

    # Case 1: tiny batch (single grid tile), NCHW consistent with view(-1, 784).
    x_small = jax.random.normal(kx1, (2, 1, 28, 28), dtype=jnp.float32)
    out_small = jax.block_until_ready(mlp_forward(x_small, packed))
    ref_small = reference_forward(x_small, params)
    assert out_small.shape == (2, CLASSES), out_small.shape
    assert jnp.allclose(out_small, ref_small, atol=2e-2, rtol=2e-2), \
        "mismatch vs reference (batch=2)"

    # Case 2: batch not a multiple of the tile -> multi-tile + masked boundary.
    x_big = jax.random.normal(kx2, (300, 1, 28, 28), dtype=jnp.float32)
    out_big = jax.block_until_ready(mlp_forward(x_big, packed))
    ref_big = reference_forward(x_big, params)
    assert out_big.shape == (300, CLASSES), out_big.shape
    assert jnp.allclose(out_big, ref_big, atol=2e-2, rtol=2e-2), \
        "mismatch vs reference (batch=300)"

    print("KERNEL_OK")
</pallas_src>

<mosaic_0001>
module attributes {stable_mosaic.version = 11 : i64} {
  func.func @mlp_kernel(%arg0: i32, %arg1: memref<256x784xf32, #tpu.memory_space<vmem>>, %arg2: memref<784x512xbf16, #tpu.memory_space<vmem>>, %arg3: memref<1x512xf32, #tpu.memory_space<vmem>>, %arg4: memref<512x128xbf16, #tpu.memory_space<vmem>>, %arg5: memref<1x128xf32, #tpu.memory_space<vmem>>, %arg6: memref<128x16xf32, #tpu.memory_space<vmem>>, %arg7: memref<1x16xf32, #tpu.memory_space<vmem>>, %arg8: memref<16x10xf32, #tpu.memory_space<vmem>>, %arg9: memref<1x10xf32, #tpu.memory_space<vmem>>, %arg10: memref<256x10xf32, #tpu.memory_space<vmem>>) attributes {dimension_semantics = [#tpu.dimension_semantics<parallel>], iteration_bounds = array<i64: 1>, scalar_prefetch = 0 : i64, scratch_operands = 0 : i64, tpu.core_type = #tpu.core_type<tc>, window_params = [{transform_indices = @transform_0, window_bounds = array<i64: 256, 784>}, {pipeline_mode = #tpu.pipeline_mode<synchronous>, transform_indices = @transform_1, window_bounds = array<i64: 784, 512>}, {pipeline_mode = #tpu.pipeline_mode<synchronous>, transform_indices = @transform_2, window_bounds = array<i64: 1, 512>}, {pipeline_mode = #tpu.pipeline_mode<synchronous>, transform_indices = @transform_3, window_bounds = array<i64: 512, 128>}, {pipeline_mode = #tpu.pipeline_mode<synchronous>, transform_indices = @transform_4, window_bounds = array<i64: 1, 128>}, {pipeline_mode = #tpu.pipeline_mode<synchronous>, transform_indices = @transform_5, window_bounds = array<i64: 128, 16>}, {pipeline_mode = #tpu.pipeline_mode<synchronous>, transform_indices = @transform_6, window_bounds = array<i64: 1, 16>}, {pipeline_mode = #tpu.pipeline_mode<synchronous>, transform_indices = @transform_7, window_bounds = array<i64: 16, 10>}, {pipeline_mode = #tpu.pipeline_mode<synchronous>, transform_indices = @transform_8, window_bounds = array<i64: 1, 10>}, {transform_indices = @transform_9, window_bounds = array<i64: 256, 10>}]} {
    %c0 = arith.constant 0 : index
    %c0_0 = arith.constant 0 : index
    %0 = vector.load %arg1[%c0, %c0_0] : memref<256x784xf32, #tpu.memory_space<vmem>>, vector<256x784xf32>
    %1 = arith.truncf %0 : vector<256x784xf32> to vector<256x784xbf16>
    %c0_1 = arith.constant 0 : index
    %c0_2 = arith.constant 0 : index
    %2 = vector.load %arg2[%c0_1, %c0_2] : memref<784x512xbf16, #tpu.memory_space<vmem>>, vector<784x512xbf16>
    %cst = arith.constant dense<0.000000e+00> : vector<256x512xf32>
    %3 = tpu.matmul %1, %2, %cst {dimension_numbers = #tpu.dot_dimension_numbers<[1], [0], [0], [1], [0, 0, 1, 1], [], []>} : vector<256x784xbf16>, vector<784x512xbf16>, vector<256x512xf32> -> vector<256x512xf32>
    %c0_3 = arith.constant 0 : index
    %c0_4 = arith.constant 0 : index
    %4 = vector.load %arg3[%c0_3, %c0_4] : memref<1x512xf32, #tpu.memory_space<vmem>>, vector<1x512xf32>
    %5 = vector.broadcast %4 : vector<1x512xf32> to vector<256x512xf32>
    %6 = arith.addf %3, %5 : vector<256x512xf32>
    %cst_5 = arith.constant 0.000000e+00 : f32
    %7 = vector.broadcast %cst_5 : f32 to vector<256x512xf32>
    %8 = arith.maximumf %6, %7 : vector<256x512xf32>
    %9 = arith.truncf %8 : vector<256x512xf32> to vector<256x512xbf16>
    %c0_6 = arith.constant 0 : index
    %c0_7 = arith.constant 0 : index
    %10 = vector.load %arg4[%c0_6, %c0_7] : memref<512x128xbf16, #tpu.memory_space<vmem>>, vector<512x128xbf16>
    %cst_8 = arith.constant dense<0.000000e+00> : vector<256x128xf32>
    %11 = tpu.matmul %9, %10, %cst_8 {dimension_numbers = #tpu.dot_dimension_numbers<[1], [0], [0], [1], [0, 0, 1, 1], [], []>} : vector<256x512xbf16>, vector<512x128xbf16>, vector<256x128xf32> -> vector<256x128xf32>
    %c0_9 = arith.constant 0 : index
    %c0_10 = arith.constant 0 : index
    %12 = vector.load %arg5[%c0_9, %c0_10] : memref<1x128xf32, #tpu.memory_space<vmem>>, vector<1x128xf32>
    %13 = vector.broadcast %12 : vector<1x128xf32> to vector<256x128xf32>
    %14 = arith.addf %11, %13 : vector<256x128xf32>
    %cst_11 = arith.constant 0.000000e+00 : f32
    %15 = vector.broadcast %cst_11 : f32 to vector<256x128xf32>
    %16 = arith.maximumf %14, %15 : vector<256x128xf32>
    %c0_12 = arith.constant 0 : index
    %c0_13 = arith.constant 0 : index
    %17 = vector.load %arg6[%c0_12, %c0_13] : memref<128x16xf32, #tpu.memory_space<vmem>>, vector<128x16xf32>
    %cst_14 = arith.constant dense<0.000000e+00> : vector<256x16xf32>
    %18 = tpu.matmul %16, %17, %cst_14 {dimension_numbers = #tpu.dot_dimension_numbers<[1], [0], [0], [1], [0, 0, 1, 1], [], []>} : vector<256x128xf32>, vector<128x16xf32>, vector<256x16xf32> -> vector<256x16xf32>
    %c0_15 = arith.constant 0 : index
    %c0_16 = arith.constant 0 : index
    %19 = vector.load %arg7[%c0_15, %c0_16] : memref<1x16xf32, #tpu.memory_space<vmem>>, vector<1x16xf32>
    %20 = vector.broadcast %19 : vector<1x16xf32> to vector<256x16xf32>
    %21 = arith.addf %18, %20 : vector<256x16xf32>
    %cst_17 = arith.constant 0.000000e+00 : f32
    %22 = vector.broadcast %cst_17 : f32 to vector<256x16xf32>
    %23 = arith.maximumf %21, %22 : vector<256x16xf32>
    %c0_18 = arith.constant 0 : index
    %c0_19 = arith.constant 0 : index
    %24 = vector.load %arg8[%c0_18, %c0_19] : memref<16x10xf32, #tpu.memory_space<vmem>>, vector<16x10xf32>
    %cst_20 = arith.constant dense<0.000000e+00> : vector<256x10xf32>
    %25 = tpu.matmul %23, %24, %cst_20 {dimension_numbers = #tpu.dot_dimension_numbers<[1], [0], [0], [1], [0, 0, 1, 1], [], []>} : vector<256x16xf32>, vector<16x10xf32>, vector<256x10xf32> -> vector<256x10xf32>
    %c0_21 = arith.constant 0 : index
    %c0_22 = arith.constant 0 : index
    %26 = vector.load %arg9[%c0_21, %c0_22] : memref<1x10xf32, #tpu.memory_space<vmem>>, vector<1x10xf32>
    %27 = vector.broadcast %26 : vector<1x10xf32> to vector<256x10xf32>
    %28 = arith.addf %25, %27 : vector<256x10xf32>
    %c0_23 = arith.constant 0 : index
    %c0_24 = arith.constant 0 : index
    %29 = vector.load %arg10[%c0_23, %c0_24] : memref<256x10xf32, #tpu.memory_space<vmem>>, vector<256x10xf32>
    tpu.vector_store %arg10[%c0_23, %c0_24], %28 {strides = array<i32>} : memref<256x10xf32, #tpu.memory_space<vmem>>, vector<256x10xf32>,
    return
  }
  func.func @transform_0(%arg0: i32) -> (i32, i32) {
    %c0_i32 = arith.constant 0 : i32
    %c0_i32_0 = arith.constant 0 : i32
    return %arg0, %c0_i32 : i32, i32
  }
  func.func @transform_1(%arg0: i32) -> (i32, i32) {
    %c0_i32 = arith.constant 0 : i32
    %c0_i32_0 = arith.constant 0 : i32
    %c0_i32_1 = arith.constant 0 : i32
    return %c0_i32, %c0_i32_0 : i32, i32
  }
  func.func @transform_2(%arg0: i32) -> (i32, i32) {
    %c0_i32 = arith.constant 0 : i32
    %c0_i32_0 = arith.constant 0 : i32
    %c0_i32_1 = arith.constant 0 : i32
    return %c0_i32, %c0_i32_0 : i32, i32
  }
  func.func @transform_3(%arg0: i32) -> (i32, i32) {
    %c0_i32 = arith.constant 0 : i32
    %c0_i32_0 = arith.constant 0 : i32
    %c0_i32_1 = arith.constant 0 : i32
    return %c0_i32, %c0_i32_0 : i32, i32
  }
  func.func @transform_4(%arg0: i32) -> (i32, i32) {
    %c0_i32 = arith.constant 0 : i32
    %c0_i32_0 = arith.constant 0 : i32
    %c0_i32_1 = arith.constant 0 : i32
    return %c0_i32, %c0_i32_0 : i32, i32
  }
  func.func @transform_5(%arg0: i32) -> (i32, i32) {
    %c0_i32 = arith.constant 0 : i32
    %c0_i32_0 = arith.constant 0 : i32
    %c0_i32_1 = arith.constant 0 : i32
    return %c0_i32, %c0_i32_0 : i32, i32
  }
  func.func @transform_6(%arg0: i32) -> (i32, i32) {
    %c0_i32 = arith.constant 0 : i32
    %c0_i32_0 = arith.constant 0 : i32
    %c0_i32_1 = arith.constant 0 : i32
    return %c0_i32, %c0_i32_0 : i32, i32
  }
  func.func @transform_7(%arg0: i32) -> (i32, i32) {
    %c0_i32 = arith.constant 0 : i32
    %c0_i32_0 = arith.constant 0 : i32
    %c0_i32_1 = arith.constant 0 : i32
    return %c0_i32, %c0_i32_0 : i32, i32
  }
  func.func @transform_8(%arg0: i32) -> (i32, i32) {
    %c0_i32 = arith.constant 0 : i32
    %c0_i32_0 = arith.constant 0 : i32
    %c0_i32_1 = arith.constant 0 : i32
    return %c0_i32, %c0_i32_0 : i32, i32
  }
  func.func @transform_9(%arg0: i32) -> (i32, i32) {
    %c0_i32 = arith.constant 0 : i32
    %c0_i32_0 = arith.constant 0 : i32
    return %arg0, %c0_i32 : i32, i32
  }
}

</mosaic_0001>

<bundles_post_ra>
// kernel: mlp_forward.1
= control target key start
LH: loop header
LB: loop body
LE: loop exit
PB: predicated region body
PF: predicated region fallthrough
CT: control target
= control target key end

     0   :  { %14 = vsyncpa [#allocation3], 0  ;;  %s11222_s0 = inlined_call_operand.vmem [shape: f32[2,784], index: 0, kind: input, shape index: {}]   ;;  %s11223_s1 = inlined_call_operand.hbm [shape: bf16[784,512], index: 1, kind: input, shape index: {}]   ;;  %s11224_s2 = inlined_call_operand.vmem [shape: f32[1,512], index: 2, kind: input, shape index: {}]   ;;  %s11225_s3 = inlined_call_operand.vmem [shape: bf16[512,128], index: 3, kind: input, shape index: {}]   ;;  %s11226_s4 = inlined_call_operand.vmem [shape: f32[1,128], index: 4, kind: input, shape index: {}]   ;;  %s11227_s5 = inlined_call_operand.vmem [shape: f32[128,16], index: 5, kind: input, shape index: {}]   ;;  %s11228_s6 = inlined_call_operand.vmem [shape: f32[1,16], index: 6, kind: input, shape index: {}]   ;;  %s11229_s7 = inlined_call_operand.vmem [shape: f32[16,10], index: 7, kind: input, shape index: {}]   ;;  %s11230_s8 = inlined_call_operand.vmem [shape: f32[1,10], index: 8, kind: input, shape index: {}]   ;;  %s11231_s9 = inlined_call_operand.hbm [shape: f32[2,10], index: 9, kind: output, shape index: {}]  }
   0x1   :  { %15 = vsyncpa [#allocation4], 0  ;;  %s9475_s30 = smov [#allocation2]   ;;  %s9427_s13 = scalar_lea.hbm %s11223_s1, 25088 }
   0x2   :  { %s23_s10 = sshll.u32 %s9475_s30, 4  ;;  %p9428_p0 = scmp.ne.s32.totalorder %s11223_s1, %s9427_s13  ;;  %s24_s10 = int_to_ptr.vmem [resolvable:$true] %s23_s10 }
   0x3   :  { %p9431_p1 = scmp.lt.u32.totalorder %s9427_s13, %s11223_s1 }
   0x5   :  { %p9433_p2 = pnand %p9431_p1, %p9428_p0 }
   0x7   :  { %9436 = shalt.err (!%p9433_p2)
}
   0x8   :  { %s9437_s18 = scalar_lea.vmem %s24_s10, 25088  ;;  %p9442_p4 = scmp.lt.s32.totalorder %s24_s10, %s24_s10 }
   0x9   :  { %p9438_p3 = scmp.ne.s32.totalorder %s24_s10, %s9437_s18  ;;  %p9443_p5 = scmp.lt.s32.totalorder %s9437_s18, %s9437_s18 }
   0xb   :  { %p9444_p6 = por %p9443_p5, %p9442_p4 }
   0xd   :  { %p9445_p7 = pnand %p9444_p6, %p9438_p3 }
   0xf   :  { %9448 = shalt.err (!%p9445_p7)
}
  0x10   :  { %s9476_s19 = smov 256   ;;  %s9477_s20 = smov 16  }
  0x11   :  { %29 = dma.hbm_to_vmem [thread:$0]  %s11223_s1, 25088, %s24_s10, [#allocation3], %s9476_s19, %s9476_s19, %s9477_s20  }
  0x12   :  { %9471 = dma.done.wait [#allocation3], 25088  }
  0x13   :  { %9472 = vsyncadd [#allocation3], 4294942208  ;;  %v8717_v0 = vld [vmem:[#allocation2 + $0x4] ss:$16 sps:$4 sm:$0xff]   ;;  %v8719_v1 = vld [vmem:[#allocation2 + $0xc] ss:$16 sps:$4 sm:$0xff]   ;;  %v567_v41 = vlaneseq }
  0x14   :  { %4415 = vmatprep.subr.bf16.mxu0 %v8717_v0  ;;  %v8721_v2 = vld [vmem:[#allocation2] ss:$16 sps:$4 sm:$0xff]   ;;  %v8722_v3 = vld [vmem:[#allocation2 + $0x8] ss:$16 sps:$4 sm:$0xff]   ;;  %5187 = vmatprep.subr.bf16.mxu1 %v8719_v1  ;;  %v8723_v4 = vld [vmem:[#allocation2 + $0x24] ss:$16 sps:$4 sm:$0xff]  }
  0x15   :  { %4416 = vmatpush1.bf16.msra.mxu0 %v8721_v2  ;;  %5188 = vmatpush1.bf16.msra.mxu1 %v8722_v3  ;;  %v8725_v5 = vld [vmem:[#allocation2 + $0x2c] ss:$16 sps:$4 sm:$0xff]   ;;  %v8727_v6 = vld [vmem:[#allocation2 + $0x20] ss:$16 sps:$4 sm:$0xff]   ;;  %v8728_v7 = vld [vmem:[#allocation2 + $0x28] ss:$16 sps:$4 sm:$0xff]  }
  0x16   :  { %4417 = vmatprep.subr.bf16.mxu0 %v8723_v4  ;;  %5189 = vmatprep.subr.bf16.mxu1 %v8725_v5  ;;  %v8729_v8 = vld [vmem:[#allocation2 + $0x44] ss:$16 sps:$4 sm:$0xff]   ;;  %v8731_v9 = vld [vmem:[#allocation2 + $0x4c] ss:$16 sps:$4 sm:$0xff]   ;;  %v8733_v10 = vld [vmem:[#allocation2 + $0x40] ss:$16 sps:$4 sm:$0xff]  }
  0x17   :  { %v8734_v11 = vld [vmem:[#allocation2 + $0x48] ss:$16 sps:$4 sm:$0xff]   ;;  %v8735_v12 = vld [vmem:[#allocation2 + $0x64] ss:$16 sps:$4 sm:$0xff]   ;;  %v8737_v13 = vld [vmem:[#allocation2 + $0x6c] ss:$16 sps:$4 sm:$0xff]  }
  0x18   :  { %v8739_v14 = vld [vmem:[#allocation2 + $0x60] ss:$16 sps:$4 sm:$0xff]   ;;  %v8740_v15 = vld [vmem:[#allocation2 + $0x68] ss:$16 sps:$4 sm:$0xff]   ;;  %v8741_v16 = vld [vmem:[#allocation2 + $0x84] ss:$16 sps:$4 sm:$0xff]  }
  0x19   :  { %4418 = vmatpush1.bf16.msra.mxu0 %v8727_v6  ;;  %5190 = vmatpush1.bf16.msra.mxu1 %v8728_v7  ;;  %v8743_v17 = vld [vmem:[#allocation2 + $0x8c] ss:$16 sps:$4 sm:$0xff]   ;;  %v8745_v18 = vld [vmem:[#allocation2 + $0x80] ss:$16 sps:$4 sm:$0xff]   ;;  %v8746_v19 = vld [vmem:[#allocation2 + $0x88] ss:$16 sps:$4 sm:$0xff]  }
  0x1a   :  { %4419 = vmatprep.subr.bf16.mxu0 %v8729_v8  ;;  %5191 = vmatprep.subr.bf16.mxu1 %v8731_v9  ;;  %v8747_v20 = vld [vmem:[#allocation2 + $0xa4] ss:$16 sps:$4 sm:$0xff]   ;;  %v8749_v21 = vld [vmem:[#allocation2 + $0xac] ss:$16 sps:$4 sm:$0xff]   ;;  %v8751_v22 = vld [vmem:[#allocation2 + $0xa0] ss:$16 sps:$4 sm:$0xff]  }
  0x1b   :  { %v8752_v23 = vld [vmem:[#allocation2 + $0xa8] ss:$16 sps:$4 sm:$0xff]   ;;  %v8753_v24 = vld [vmem:[#allocation2 + $0xc4] ss:$16 sps:$4 sm:$0xff]   ;;  %v8755_v25 = vld [vmem:[#allocation2 + $0xcc] ss:$16 sps:$4 sm:$0xff]  }
  0x1c   :  { %v8757_v26 = vld [vmem:[#allocation2 + $0xc0] ss:$16 sps:$4 sm:$0xff]   ;;  %v8758_v27 = vld [vmem:[#allocation2 + $0xc8] ss:$16 sps:$4 sm:$0xff]   ;;  %v8759_v28 = vld [vmem:[#allocation2 + $0xe4] ss:$16 sps:$4 sm:$0xff]  }
  0x1d   :  { %4420 = vmatpush1.bf16.msra.mxu0 %v8733_v10  ;;  %5192 = vmatpush1.bf16.msra.mxu1 %v8734_v11  ;;  %v8761_v29 = vld [vmem:[#allocation2 + $0xec] ss:$16 sps:$4 sm:$0xff]   ;;  %v8763_v30 = vld [vmem:[#allocation2 + $0xe0] ss:$16 sps:$4 sm:$0xff]   ;;  %v8764_v31 = vld [vmem:[#allocation2 + $0xe8] ss:$16 sps:$4 sm:$0xff]  }
  0x1e   :  { %4421 = vmatprep.subr.bf16.mxu0 %v8735_v12  ;;  %5193 = vmatprep.subr.bf16.mxu1 %v8737_v13  ;;  %v8765_v32 = vld [vmem:[#allocation2 + $0x104] ss:$16 sps:$4 sm:$0xff]   ;;  %v8767_v33 = vld [vmem:[#allocation2 + $0x10c] ss:$16 sps:$4 sm:$0xff]   ;;  %v8769_v34 = vld [vmem:[#allocation2 + $0x100] ss:$16 sps:$4 sm:$0xff]  }
  0x1f   :  { %v8770_v35 = vld [vmem:[#allocation2 + $0x108] ss:$16 sps:$4 sm:$0xff]   ;;  %v8771_v36 = vld [vmem:[#allocation2 + $0x124] ss:$16 sps:$4 sm:$0xff]   ;;  %v8773_v37 = vld [vmem:[#allocation2 + $0x12c] ss:$16 sps:$4 sm:$0xff]  }
  0x20   :  { %v8775_v38 = vld [vmem:[#allocation2 + $0x120] ss:$16 sps:$4 sm:$0xff]   ;;  %v9478_v39 = vmov 1983009808   ;;  %v8776_v42 = vld [vmem:[#allocation2 + $0x128] ss:$16 sps:$4 sm:$0xff]  }
  0x21   :  { %4422 = vmatpush1.bf16.msra.mxu0 %v8739_v14  ;;  %5194 = vmatpush1.bf16.msra.mxu1 %v8740_v15  ;;  %v565_v40 = vunpack.c.l.s4 %v9478_v39  ;;  %v8777_v43 = vld [vmem:[#allocation2 + $0x144] ss:$16 sps:$4 sm:$0xff]   ;;  %v8779_v44 = vld [vmem:[#allocation2 + $0x14c] ss:$16 sps:$4 sm:$0xff]   ;;  %v8781_v45 = vld [vmem:[#allocation2 + $0x140] ss:$16 sps:$4 sm:$0xff]  }
  0x22   :  { %4423 = vmatprep.subr.bf16.mxu0 %v8741_v16  ;;  %5195 = vmatprep.subr.bf16.mxu1 %v8743_v17  ;;  %v8782_v46 = vld [vmem:[#allocation2 + $0x148] ss:$16 sps:$4 sm:$0xff]   ;;  %v9545_v48 = vshrl.u32 %v567_v41, 7  ;;  %v8783_v49 = vld [vmem:[#allocation2 + $0x164] ss:$16 sps:$4 sm:$0xff]   ;;  %vm4366_vm0 = vcmask 130048  }
  0x23   :  { %v566_v47 = vunpack.c.0.s8 %v565_v40  ;;  %v8785_v50 = vld [vmem:[#allocation2 + $0x16c] ss:$16 sps:$4 sm:$0xff]   ;;  %v8787_v51 = vld [vmem:[#allocation2 + $0x160] ss:$16 sps:$4 sm:$0xff]   ;;  %v8788_v52 = vld [vmem:[#allocation2 + $0x168] ss:$16 sps:$4 sm:$0xff]  }
  0x24   :  { %v8789_v53 = vld [vmem:[#allocation2 + $0x184] ss:$16 sps:$4 sm:$0xff]   ;;  %v8791_v55 = vld [vmem:[#allocation2 + $0x18c] ss:$16 sps:$4 sm:$0xff]   ;;  %v8793_v59 = vld [vmem:[#allocation2 + $0x180] ss:$16 sps:$4 sm:$0xff]  }
  0x25   :  { %4424 = vmatpush1.bf16.msra.mxu0 %v8745_v18  ;;  %5196 = vmatpush1.bf16.msra.mxu1 %v8746_v19  ;;  %v9548_v54 = vsub.s32 %v566_v47, %v9545_v48  ;;  %v8813_v56 = vld [vmem:[%s11222_s0] ss:$14 sps:$4 sm:$0xff]   ;;  %v8816_v57 = vld [vmem:[%s11222_s0 + $0x1c] ss:$14 sps:$4 sm:$0xff]   ;;  %v8819_v58 = vld [vmem:[%s11222_s0 + $0x38] ss:$14 sps:$4 sm:$0xff]  }
  0x26   :  { %4425 = vmatprep.subr.bf16.mxu0 %v8747_v20  ;;  %5197 = vmatprep.subr.bf16.mxu1 %v8749_v21  ;;  %v8794_v60 = vld [vmem:[#allocation2 + $0x188] ss:$16 sps:$4 sm:$0xff]   ;;  %v8822_v62 = vld [vmem:[%s11222_s0 + $0x54] ss:$14 sps:$4 sm:$0xff]   ;;  %v8797_v2 = vld [vmem:[#allocation2 + $0x1ac] ss:$16 sps:$4 sm:$0xff]  }
  0x27   :  { %v570_v61 = vrot.slane %v8813_v56, %v9548_v54  ;;  %v8795_v63 = vld [vmem:[#allocation2 + $0x1a4] ss:$16 sps:$4 sm:$0xff]   ;;  %v584_v0 = vrot.slane %v8816_v57, %v9548_v54  ;;  %v641_v1 = vrot.slane %v8819_v58, %v9548_v54  ;;  %v655_v3 = vrot.slane %v8822_v62, %v9548_v54  ;;  %v8799_v4 = vld [vmem:[#allocation2 + $0x1a0] ss:$16 sps:$4 sm:$0xff]   ;;  %v8800_v5 = vld [vmem:[#allocation2 + $0x1a8] ss:$16 sps:$4 sm:$0xff]  }
  0x28   :  { %v8801_v7 = vld [vmem:[#allocation2 + $0x1c4] ss:$16 sps:$4 sm:$0xff]   ;;  %v8803_v8 = vld [vmem:[#allocation2 + $0x1cc] ss:$16 sps:$4 sm:$0xff]   ;;  %v8805_v15 = vld [vmem:[#allocation2 + $0x1c0] ss:$16 sps:$4 sm:$0xff]  }
  0x29   :  { %4426 = vmatpush1.bf16.msra.mxu0 %v8751_v22  ;;  %5198 = vmatpush1.bf16.msra.mxu1 %v8752_v23  ;;  %v593_v6 = vcombine.high %v570_v61, %v584_v0  ;;  %v664_v9 = vcombine.high %v641_v1, %v655_v3  ;;  %v8831_v11 = vld [vmem:[%s11222_s0 + $0x70] ss:$14 sps:$4 sm:$0xff]   ;;  %v8833_v12 = vld [vmem:[%s11222_s0 + $0x8c] ss:$14 sps:$4 sm:$0xff]   ;;  %v8835_v13 = vld [vmem:[%s11222_s0 + $0xa8] ss:$14 sps:$4 sm:$0xff]  }
  0x2a   :  { %4427 = vmatprep.subr.bf16.mxu0 %v8753_v24  ;;  %5199 = vmatprep.subr.bf16.mxu1 %v8755_v25  ;;  %v8837_v14 = vld [vmem:[%s11222_s0 + $0xc4] ss:$14 sps:$4 sm:$0xff]   ;;  %v8806_v16 = vld [vmem:[#allocation2 + $0x1c8] ss:$16 sps:$4 sm:$0xff]   ;;  %v712_v18 = vrot.slane %v8831_v11, %v9548_v54  ;;  %v8809_v19 = vld [vmem:[#allocation2 + $0x1ec] ss:$16 sps:$4 sm:$0xff]   ;;  %v726_v20 = vrot.slane %v8833_v12, %v9548_v54  ;;  %v783_v21 = vrot.slane %v8835_v13, %v9548_v54 }
  0x2b   :  { %v3057_v10 = vpack.c.bf16 %v664_v9, %v593_v6  ;;  %v8807_v17 = vld [vmem:[#allocation2 + $0x1e4] ss:$16 sps:$4 sm:$0xff]   ;;  %v797_v22 = vrot.slane %v8837_v14, %v9548_v54  ;;  %v8811_v23 = vld [vmem:[#allocation2 + $0x1e0] ss:$16 sps:$4 sm:$0xff]   ;;  %v8812_v24 = vld [vmem:[#allocation2 + $0x1e8] ss:$16 sps:$4 sm:$0xff]   ;;  %v592_v25 = vcombine.low %v570_v61, %v584_v0 }
  0x2c   :  { %v8844_v47 = vld [vmem:[#allocation2 + $0x22c] ss:$16 sps:$4 sm:$0xff]   ;;  %v8863_v56 = vld [vmem:[%s11222_s0 + $0x188] ss:$14 sps:$4 sm:$0xff]   ;;  %v8865_v57 = vld [vmem:[%s11222_s0 + $0x1a4] ss:$14 sps:$4 sm:$0xff]  }
  0x2d   :  { %4428 = vmatpush1.bf16.msra.mxu0 %v8757_v26  ;;  %5200 = vmatpush1.bf16.msra.mxu1 %v8758_v27  ;;  %v663_v26 = vcombine.low %v641_v1, %v655_v3  ;;  %v8827_v27 = vld [vmem:[#allocation2 + $0x204] ss:$16 sps:$4 sm:$0xff]   ;;  %v8858_v58 = vld [vmem:[#allocation2 + $0x24c] ss:$16 sps:$4 sm:$0xff]   ;;  %v8853_v61 = vld [vmem:[#allocation2 + $0x240] ss:$16 sps:$4 sm:$0xff]   ;;  %v1067_v1 = vrot.slane %v8863_v56, %v9548_v54 }
  0x2e   :  { %4429 = vmatprep.subr.bf16.mxu0 %v8759_v28  ;;  %5201 = vmatprep.subr.bf16.mxu1 %v8761_v29  ;;  %v8830_v28 = vld [vmem:[#allocation2 + $0x20c] ss:$16 sps:$4 sm:$0xff]   ;;  %v8856_v62 = vld [vmem:[#allocation2 + $0x248] ss:$16 sps:$4 sm:$0xff]   ;;  %v8869_v3 = vld [vmem:[#allocation2 + $0x264] ss:$16 sps:$4 sm:$0xff]  }
  0x2f   :  { %4447 = vmatprep.mubr.bf16.mxu0 %v3057_v10  ;;  %5219 = vmatprep.mubr.bf16.mxu1 %v3057_v10  ;;  %v8845_v29 = vld [vmem:[%s11222_s0 + $0xe0] ss:$14 sps:$4 sm:$0xff]   ;;  %v8870_v10 = vld [vmem:[#allocation2 + $0x268] ss:$16 sps:$4 sm:$0xff]   ;;  %vm7378_vm1 = vcmask 80896  }
  0x30   :  { %v8867_v9 = vld [vmem:[#allocation2 + $0x260] ss:$16 sps:$4 sm:$0xff]   ;;  %v8877_v11 = vld [vmem:[%s11222_s0 + $0x1f8] ss:$14 sps:$4 sm:$0xff]  }
  0x31   :  { %4430 = vmatpush1.bf16.msra.mxu0 %v8763_v30  ;;  %5202 = vmatpush1.bf16.msra.mxu1 %v8764_v31  ;;  %v8847_v30 = vld [vmem:[%s11222_s0 + $0xfc] ss:$14 sps:$4 sm:$0xff]   ;;  %v8849_v31 = vld [vmem:[%s11222_s0 + $0x118] ss:$14 sps:$4 sm:$0xff]   ;;  %v8879_v12 = vld [vmem:[%s11222_s0 + $0x214] ss:$14 sps:$4 sm:$0xff]  }
  0x32   :  { %4431 = vmatprep.subr.bf16.mxu0 %v8765_v32  ;;  %5203 = vmatprep.subr.bf16.mxu1 %v8767_v33  ;;  %v735_v32 = vcombine.high %v712_v18, %v726_v20  ;;  %v806_v33 = vcombine.high %v783_v21, %v797_v22  ;;  %v9598_v39 = vrot.slane %v8847_v30, %v9548_v54  ;;  %v8897_v30 = vld [vmem:[#allocation2 + $0x2a4] ss:$16 sps:$4 sm:$0xff]  }
  0x33   :  { %v925_v40 = vrot.slane %v8849_v31, %v9548_v54 }
  0x35   :  { %4432 = vmatpush1.bf16.msra.mxu0 %v8769_v34  ;;  %5204 = vmatpush1.bf16.msra.mxu1 %v8770_v35  ;;  %v8851_v34 = vld [vmem:[%s11222_s0 + $0x134] ss:$14 sps:$4 sm:$0xff]   ;;  %v3056_v35 = vpack.c.bf16 %v663_v26, %v592_v25  ;;  %v8887_v26 = vld [vmem:[%s11222_s0 + $0x230] ss:$14 sps:$4 sm:$0xff]  }
  0x36   :  { %4433 = vmatprep.subr.bf16.mxu0 %v8771_v36  ;;  %5205 = vmatprep.subr.bf16.mxu1 %v8773_v37  ;;  %v8825_v36 = vld [vmem:[#allocation2 + $0x200] ss:$16 sps:$4 sm:$0xff]   ;;  %v8828_v37 = vld [vmem:[#allocation2 + $0x208] ss:$16 sps:$4 sm:$0xff]   ;;  %v939_v41 = vrot.slane %v8851_v34, %v9548_v54 }
  0x37   :  { %v8895_v34 = vld [vmem:[#allocation2 + $0x2a0] ss:$16 sps:$4 sm:$0xff]  }
  0x38   :  { %v947_v6 = vcombine.low %v925_v40, %v939_v41 }
  0x39   :  { %4434 = vmatpush1.bf16.msra.mxu0 %v8775_v38  ;;  %5206 = vmatpush1.bf16.msra.mxu1 %v8776_v42  ;;  %v9595_v38 = vrot.slane %v8845_v29, %v9548_v54  ;;  %v8841_v42 = vld [vmem:[#allocation2 + $0x224] ss:$16 sps:$4 sm:$0xff]  }
  0x3a   :  { %4435 = vmatprep.subr.bf16.mxu0 %v8777_v43  ;;  %5207 = vmatprep.subr.bf16.mxu1 %v8779_v44  ;;  %v3064_v43 = vpack.c.bf16 %v806_v33, %v735_v32  ;;  %v734_v44 = vcombine.low %v712_v18, %v726_v20  ;;  %v1209_v20 = vrot.slane %v8877_v11, %v9548_v54  ;;  %v8893_v29 = vld [vmem:[%s11222_s0 + $0x284] ss:$14 sps:$4 sm:$0xff]  }
  0x3b   :  { %v8937_v11 = vld [vmem:[#allocation2 + $0x300] ss:$16 sps:$4 sm:$0xff]  }
  0x3d   :  { %4436 = vmatpush1.bf16.msra.mxu0 %v8781_v45  ;;  %5208 = vmatpush1.bf16.msra.mxu1 %v8782_v46  ;;  %v8839_v45 = vld [vmem:[#allocation2 + $0x220] ss:$16 sps:$4 sm:$0xff]   ;;  %v8842_v46 = vld [vmem:[#allocation2 + $0x228] ss:$16 sps:$4 sm:$0xff]  }
  0x3e   :  { %4437 = vmatprep.subr.bf16.mxu0 %v8783_v49  ;;  %5209 = vmatprep.subr.bf16.mxu1 %v8785_v50  ;;  %v805_v49 = vcombine.low %v783_v21, %v797_v22  ;;  %v877_v50 = vcombine.high %v9595_v38, %v9598_v39  ;;  %v1223_v21 = vrot.slane %v8879_v12, %v9548_v54  ;;  %v8939_v12 = vld [vmem:[#allocation2 + $0x304] ss:$16 sps:$4 sm:$0xff]  }
  0x40   :  { %v1232_v33 = vcombine.high %v1209_v20, %v1223_v21 }
  0x41   :  { %4438 = vmatpush1.bf16.msra.mxu0 %v8787_v51  ;;  %5210 = vmatpush1.bf16.msra.mxu1 %v8788_v52  ;;  %v948_v51 = vcombine.high %v925_v40, %v939_v41  ;;  %v8855_v52 = vld [vmem:[#allocation2 + $0x244] ss:$16 sps:$4 sm:$0xff]  }
  0x42   :  { %4439 = vmatprep.subr.bf16.mxu0 %v8789_v53  ;;  %5211 = vmatprep.subr.bf16.mxu1 %v8791_v55  ;;  %v8859_v53 = vld [vmem:[%s11222_s0 + $0x150] ss:$14 sps:$4 sm:$0xff]   ;;  %v8861_v55 = vld [vmem:[%s11222_s0 + $0x16c] ss:$14 sps:$4 sm:$0xff]  }
  0x43   :  { %v1010_v0 = vrot.slane %v8861_v55, %v9548_v54 }
  0x45   :  { %4440 = vmatpush1.bf16.msra.mxu0 %v8793_v59  ;;  %5212 = vmatpush1.bf16.msra.mxu1 %v8794_v60  ;;  %v3063_v59 = vpack.c.bf16 %v805_v49, %v734_v44  ;;  %v3071_v60 = vpack.c.bf16 %v948_v51, %v877_v50  ;;  %v8901_v44 = vld [vmem:[%s11222_s0 + $0x2a0] ss:$14 sps:$4 sm:$0xff]   ;;  %v8911_v49 = vld [vmem:[#allocation2 + $0x2c4] ss:$16 sps:$4 sm:$0xff]   ;;  %v1231_v51 = vcombine.low %v1209_v20, %v1223_v21 }
  0x46   :  { %4441 = vmatprep.subr.bf16.mxu0 %v8795_v63  ;;  %5213 = vmatprep.subr.bf16.mxu1 %v8797_v2  ;;  %v9617_v63 = vrot.slane %v8859_v53, %v9548_v54  ;;  %v1081_v2 = vrot.slane %v8865_v57, %v9548_v54  ;;  %v8914_v53 = vld [vmem:[#allocation2 + $0x2cc] ss:$16 sps:$4 sm:$0xff]  }
  0x48   :  { %v1019_v13 = vcombine.high %v9617_v63, %v1010_v0  ;;  %v1090_v14 = vcombine.high %v1067_v1, %v1081_v2  ;;  %v1018_v25 = vcombine.low %v9617_v63, %v1010_v0  ;;  %v1089_v31 = vcombine.low %v1067_v1, %v1081_v2  ;;  %v8925_v63 = vld [vmem:[#allocation2 + $0x2e4] ss:$16 sps:$4 sm:$0xff]   ;;  %v8926_v1 = vld [vmem:[#allocation2 + $0x2e8] ss:$16 sps:$4 sm:$0xff]   ;;  %v8928_v2 = vld [vmem:[#allocation2 + $0x2ec] ss:$16 sps:$4 sm:$0xff]  }
  0x49   :  { %4442 = vmatpush1.bf16.msra.mxu0 %v8799_v4  ;;  %5214 = vmatpush1.bf16.msra.mxu1 %v8800_v5  ;;  %v8872_v4 = vld [vmem:[#allocation2 + $0x26c] ss:$16 sps:$4 sm:$0xff]   ;;  %v876_v5 = vcombine.low %v9595_v38, %v9598_v39  ;;  %v1280_v39 = vrot.slane %v8887_v26, %v9548_v54  ;;  %v8935_v26 = vld [vmem:[%s11222_s0 + $0x3d4] ss:$14 sps:$4 sm:$0xff]  }
  0x4a   :  { %4443 = vmatprep.subr.bf16.mxu0 %v8801_v7  ;;  %5215 = vmatprep.subr.bf16.mxu1 %v8803_v8  ;;  %v8873_v7 = vld [vmem:[%s11222_s0 + $0x1c0] ss:$14 sps:$4 sm:$0xff]   ;;  %v8875_v8 = vld [vmem:[%s11222_s0 + $0x1dc] ss:$14 sps:$4 sm:$0xff]   ;;  %v3078_v22 = vpack.c.bf16 %v1090_v14, %v1019_v13 }
  0x4b   :  { %v1138_v18 = vrot.slane %v8873_v7, %v9548_v54 }
  0x4d   :  { %4444 = vmatpush1.bf16.msra.mxu0 %v8805_v15  ;;  %5216 = vmatpush1.bf16.msra.mxu1 %v8806_v16  ;;  %v8883_v15 = vld [vmem:[#allocation2 + $0x284] ss:$16 sps:$4 sm:$0xff]   ;;  %v8886_v16 = vld [vmem:[#allocation2 + $0x28c] ss:$16 sps:$4 sm:$0xff]  }
  0x4e   :  { %4445 = vmatprep.subr.bf16.mxu0 %v8807_v17  ;;  %5217 = vmatprep.subr.bf16.mxu1 %v8809_v19  ;;  %v3070_v17 = vpack.c.bf16 %v947_v6, %v876_v5  ;;  %v1152_v19 = vrot.slane %v8875_v8, %v9548_v54  ;;  %v8917_v8 = vld [vmem:[%s11222_s0 + $0x32c] ss:$14 sps:$4 sm:$0xff]  }
  0x50   :  { %v1161_v32 = vcombine.high %v1138_v18, %v1152_v19  ;;  %v1160_v50 = vcombine.low %v1138_v18, %v1152_v19  ;;  %v1578_v18 = vrot.slane %v8917_v8, %v9548_v54 }
  0x51   :  { %4446 = vmatpush1.bf16.msra.mxu0 %v8811_v23  ;;  %5218 = vmatpush1.bf16.msra.mxu1 %v8812_v24  ;;  %v8881_v23 = vld [vmem:[#allocation2 + $0x280] ss:$16 sps:$4 sm:$0xff]   ;;  %v8884_v24 = vld [vmem:[#allocation2 + $0x288] ss:$16 sps:$4 sm:$0xff]  }
  0x52   :  { %4608 = vmatprep.subr.bf16.mxu0 %v8827_v27  ;;  %5380 = vmatprep.subr.bf16.mxu1 %v8830_v28  ;;  %v8889_v27 = vld [vmem:[%s11222_s0 + $0x24c] ss:$14 sps:$4 sm:$0xff]   ;;  %v8891_v28 = vld [vmem:[%s11222_s0 + $0x268] ss:$14 sps:$4 sm:$0xff]   ;;  %v3085_v38 = vpack.c.bf16 %v1232_v33, %v1161_v32  ;;  %v3084_v57 = vpack.c.bf16 %v1231_v51, %v1160_v50 }
  0x53   :  { %v1294_v40 = vrot.slane %v8889_v27, %v9548_v54  ;;  %v1351_v41 = vrot.slane %v8891_v28, %v9548_v54  ;;  %v8954_v32 = vld [vmem:[#allocation2 + $0x328] ss:$16 sps:$4 sm:$0xff]   ;;  %v8956_v33 = vld [vmem:[#allocation2 + $0x32c] ss:$16 sps:$4 sm:$0xff]  }
  0x54   :  { %4448 = vmatmul.mubr.bf16.vlgmr.msra.gmra.mrb[0].mxu0 %v3056_v35  ;;  %5220 = vmatmul.mubr.bf16.vlgmr.msra.gmra.mrb[0].mxu1 %v3056_v35  ;;  %v8898_v35 = vld [vmem:[#allocation2 + $0x2a8] ss:$16 sps:$4 sm:$0xff]   ;;  %v8970_v51 = vld [vmem:[#allocation2 + $0x34c] ss:$16 sps:$4 sm:$0xff]  }
  0x55   :  { %4609 = vmatpush1.bf16.msra.mxu0 %v8825_v36  ;;  %5381 = vmatpush1.bf16.msra.mxu1 %v8828_v37  ;;  %v8900_v36 = vld [vmem:[#allocation2 + $0x2ac] ss:$16 sps:$4 sm:$0xff]   ;;  %v3077_v37 = vpack.c.bf16 %v1089_v31, %v1018_v25  ;;  %v1303_v55 = vcombine.high %v1280_v39, %v1294_v40  ;;  %v8933_v25 = vld [vmem:[%s11222_s0 + $0x3b8] ss:$14 sps:$4 sm:$0xff]  }
  0x56   :  { %4457 = vmatprep.mubr.bf16.mxu0 %v3064_v43  ;;  %5229 = vmatprep.mubr.bf16.mxu1 %v3064_v43  ;;  %v8909_v43 = vld [vmem:[#allocation2 + $0x2c0] ss:$16 sps:$4 sm:$0xff]   ;;  %v8968_v50 = vld [vmem:[#allocation2 + $0x348] ss:$16 sps:$4 sm:$0xff]  }
  0x57   :  { %4610 = vmatprep.subr.bf16.mxu0 %v8841_v42  ;;  %5382 = vmatprep.subr.bf16.mxu1 %v8844_v47  ;;  %v1365_v42 = vrot.slane %v8893_v29, %v9548_v54  ;;  %v8907_v47 = vld [vmem:[%s11222_s0 + $0x2f4] ss:$14 sps:$4 sm:$0xff]  }
  0x58   :  { %v8951_v29 = vld [vmem:[#allocation2 + $0x320] ss:$16 sps:$4 sm:$0xff]  }
  0x59   :  { %4611 = vmatpush1.bf16.msra.mxu0 %v8839_v45  ;;  %5383 = vmatpush1.bf16.msra.mxu1 %v8842_v46  ;;  %v8903_v45 = vld [vmem:[%s11222_s0 + $0x2bc] ss:$14 sps:$4 sm:$0xff]   ;;  %v8905_v46 = vld [vmem:[%s11222_s0 + $0x2d8] ss:$14 sps:$4 sm:$0xff]   ;;  %v1374_v56 = vcombine.high %v1351_v41, %v1365_v42  ;;  %v1373_v5 = vcombine.low %v1351_v41, %v1365_v42 }
  0x5a   :  { %4612 = vmatprep.subr.bf16.mxu0 %v8855_v52  ;;  %5384 = vmatprep.subr.bf16.mxu1 %v8858_v58  ;;  %v8912_v52 = vld [vmem:[#allocation2 + $0x2c8] ss:$16 sps:$4 sm:$0xff]   ;;  %v1422_v58 = vrot.slane %v8901_v44, %v9548_v54 }
  0x5b   :  { %v3092_v0 = vpack.c.bf16 %v1374_v56, %v1303_v55  ;;  %v8945_v41 = vld [vmem:[%s11222_s0 + $0x40c] ss:$14 sps:$4 sm:$0xff]   ;;  %v8947_v42 = vld [vmem:[%s11222_s0 + $0x428] ss:$14 sps:$4 sm:$0xff]  }
  0x5c   :  { %4458 = vmatmul.mubr.bf16.gmra.mrb[4].mxu0 %v3063_v59  ;;  %5230 = vmatmul.mubr.bf16.gmra.mrb[4].mxu1 %v3063_v59  ;;  %v1436_v59 = vrot.slane %v8903_v45, %v9548_v54  ;;  %v1862_v56 = vrot.slane %v8945_v41, %v9548_v54 }
  0x5d   :  { %4467 = vmatprep.mubr.bf16.mxu0 %v3071_v60  ;;  %5239 = vmatprep.mubr.bf16.mxu1 %v3071_v60  ;;  %v1493_v60 = vrot.slane %v8905_v46, %v9548_v54 }
  0x5e   :  { %4613 = vmatpush1.bf16.msra.mxu0 %v8853_v61  ;;  %5385 = vmatpush1.bf16.msra.mxu1 %v8856_v62  ;;  %v1507_v61 = vrot.slane %v8907_v47, %v9548_v54  ;;  %v8923_v62 = vld [vmem:[#allocation2 + $0x2e0] ss:$16 sps:$4 sm:$0xff]   ;;  %v1445_v6 = vcombine.high %v1422_v58, %v1436_v59  ;;  %v1444_v21 = vcombine.low %v1422_v58, %v1436_v59 }
  0x5f   :  { %4614 = vmatprep.subr.bf16.mxu0 %v8869_v3  ;;  %5386 = vmatprep.subr.bf16.mxu1 %v8872_v4  ;;  %v1302_v3 = vcombine.low %v1280_v39, %v1294_v40  ;;  %v8915_v4 = vld [vmem:[%s11222_s0 + $0x310] ss:$14 sps:$4 sm:$0xff]  }
  0x60   :  { %v1516_v7 = vcombine.high %v1493_v60, %v1507_v61  ;;  %v8943_v40 = vld [vmem:[%s11222_s0 + $0x3f0] ss:$14 sps:$4 sm:$0xff]  }
  0x61   :  { %v3091_v13 = vpack.c.bf16 %v1373_v5, %v1302_v3  ;;  %v8965_v47 = vld [vmem:[#allocation2 + $0x340] ss:$16 sps:$4 sm:$0xff]   ;;  %v1848_v55 = vrot.slane %v8943_v40, %v9548_v54  ;;  %v8982_v3 = vld [vmem:[#allocation2 + $0x368] ss:$16 sps:$4 sm:$0xff]  }
  0x62   :  { %4615 = vmatpush1.bf16.msra.mxu0 %v8867_v9  ;;  %5387 = vmatpush1.bf16.msra.mxu1 %v8870_v10  ;;  %v8919_v9 = vld [vmem:[%s11222_s0 + $0x348] ss:$14 sps:$4 sm:$0xff]   ;;  %v8921_v10 = vld [vmem:[%s11222_s0 + $0x364] ss:$14 sps:$4 sm:$0xff]   ;;  %v3099_v14 = vpack.c.bf16 %v1516_v7, %v1445_v6  ;;  %v8957_v59 = vld [vmem:[%s11222_s0 + $0x460] ss:$14 sps:$4 sm:$0xff]  }
  0x63   :  { %4616 = vmatprep.subr.bf16.mxu0 %v8883_v15  ;;  %5388 = vmatprep.subr.bf16.mxu1 %v8886_v16  ;;  %v8940_v15 = vld [vmem:[#allocation2 + $0x308] ss:$16 sps:$4 sm:$0xff]   ;;  %v8942_v16 = vld [vmem:[#allocation2 + $0x30c] ss:$16 sps:$4 sm:$0xff]   ;;  %v1635_v19 = vrot.slane %v8919_v9, %v9548_v54  ;;  %v1649_v20 = vrot.slane %v8921_v10, %v9548_v54  ;;  %v1871_v5 = vcombine.high %v1848_v55, %v1862_v56 }
  0x64   :  { %4468 = vmatmul.mubr.bf16.gmra.mrb[8].mxu0 %v3070_v17  ;;  %5240 = vmatmul.mubr.bf16.gmra.mrb[8].mxu1 %v3070_v17  ;;  %v1564_v17 = vrot.slane %v8915_v4, %v9548_v54  ;;  %v8984_v4 = vld [vmem:[#allocation2 + $0x36c] ss:$16 sps:$4 sm:$0xff]   ;;  %v1990_v8 = vrot.slane %v8957_v59, %v9548_v54 }
  0x65   :  { %4477 = vmatprep.mubr.bf16.mxu0 %v3078_v22  ;;  %5249 = vmatprep.mubr.bf16.mxu1 %v3078_v22  ;;  %v1515_v22 = vcombine.low %v1493_v60, %v1507_v61  ;;  %v1658_v28 = vcombine.high %v1635_v19, %v1649_v20  ;;  %v1657_v44 = vcombine.low %v1635_v19, %v1649_v20  ;;  %v8959_v60 = vld [vmem:[%s11222_s0 + $0x47c] ss:$14 sps:$4 sm:$0xff]   ;;  %v8961_v61 = vld [vmem:[%s11222_s0 + $0x498] ss:$14 sps:$4 sm:$0xff]  }
  0x66   :  { %4617 = vmatpush1.bf16.msra.mxu0 %v8881_v23  ;;  %5389 = vmatpush1.bf16.msra.mxu1 %v8884_v24  ;;  %v8929_v23 = vld [vmem:[%s11222_s0 + $0x380] ss:$14 sps:$4 sm:$0xff]   ;;  %v8931_v24 = vld [vmem:[%s11222_s0 + $0x39c] ss:$14 sps:$4 sm:$0xff]   ;;  %v1587_v27 = vcombine.high %v1564_v17, %v1578_v18  ;;  %v1586_v39 = vcombine.low %v1564_v17, %v1578_v18  ;;  %v2004_v9 = vrot.slane %v8959_v60, %v9548_v54  ;;  %v8977_v19 = vld [vmem:[%s11222_s0 + $0x524] ss:$14 sps:$4 sm:$0xff]  }
  0x67   :  { %4618 = vmatprep.subr.bf16.mxu0 %v8897_v30  ;;  %5390 = vmatprep.subr.bf16.mxu1 %v8900_v36  ;;  %v8953_v30 = vld [vmem:[#allocation2 + $0x324] ss:$16 sps:$4 sm:$0xff]   ;;  %v3098_v31 = vpack.c.bf16 %v1515_v22, %v1444_v21  ;;  %v1777_v36 = vrot.slane %v8933_v25, %v9548_v54  ;;  %v2061_v10 = vrot.slane %v8961_v61, %v9548_v54  ;;  %v8973_v17 = vld [vmem:[%s11222_s0 + $0x4ec] ss:$14 sps:$4 sm:$0xff]  }
  0x68   :  { %v8975_v18 = vld [vmem:[%s11222_s0 + $0x508] ss:$14 sps:$4 sm:$0xff]   ;;  %v8998_v21 = vld [vmem:[#allocation2 + $0x38c] ss:$16 sps:$4 sm:$0xff]  }
  0x69   :  { %v8996_v20 = vld [vmem:[#allocation2 + $0x388] ss:$16 sps:$4 sm:$0xff]  }
  0x6a   :  { %4619 = vmatpush1.bf16.msra.mxu0 %v8895_v34  ;;  %5391 = vmatpush1.bf16.msra.mxu1 %v8898_v35  ;;  %v1706_v34 = vrot.slane %v8929_v23, %v9548_v54  ;;  %v1720_v35 = vrot.slane %v8931_v24, %v9548_v54  ;;  %v2013_v23 = vcombine.high %v1990_v8, %v2004_v9  ;;  %v9001_v60 = vld [vmem:[%s11222_s0 + $0x5cc] ss:$14 sps:$4 sm:$0xff]   ;;  %v9003_v61 = vld [vmem:[%s11222_s0 + $0x5e8] ss:$14 sps:$4 sm:$0xff]  }
  0x6b   :  { %4620 = vmatprep.subr.bf16.mxu0 %v8911_v49  ;;  %5392 = vmatprep.subr.bf16.mxu1 %v8914_v53  ;;  %v8967_v49 = vld [vmem:[#allocation2 + $0x344] ss:$16 sps:$4 sm:$0xff]  }
  0x6c   :  { %4478 = vmatmul.mubr.bf16.gmra.mrb[12].mxu0 %v3077_v37  ;;  %5250 = vmatmul.mubr.bf16.gmra.mrb[12].mxu1 %v3077_v37  ;;  %v1791_v37 = vrot.slane %v8935_v26, %v9548_v54  ;;  %v1729_v45 = vcombine.high %v1706_v34, %v1720_v35 }
  0x6d   :  { %4487 = vmatprep.mubr.bf16.mxu0 %v3085_v38  ;;  %5259 = vmatprep.mubr.bf16.mxu1 %v3085_v38  ;;  %v3106_v38 = vpack.c.bf16 %v1658_v28, %v1587_v27  ;;  %v9007_v27 = vld [vmem:[#allocation2 + $0x3a0] ss:$16 sps:$4 sm:$0xff]   ;;  %v9009_v28 = vld [vmem:[#allocation2 + $0x3a4] ss:$16 sps:$4 sm:$0xff]  }
  0x6e   :  { %4621 = vmatpush1.bf16.msra.mxu0 %v8909_v43  ;;  %5393 = vmatpush1.bf16.msra.mxu1 %v8912_v52  ;;  %v8949_v43 = vld [vmem:[%s11222_s0 + $0x444] ss:$14 sps:$4 sm:$0xff]   ;;  %v1800_v46 = vcombine.high %v1777_v36, %v1791_v37  ;;  %v3105_v52 = vpack.c.bf16 %v1657_v44, %v1586_v39  ;;  %v2012_v39 = vcombine.low %v1990_v8, %v2004_v9 }
  0x6f   :  { %4622 = vmatprep.subr.bf16.mxu0 %v8925_v63  ;;  %5394 = vmatprep.subr.bf16.mxu1 %v8928_v2  ;;  %v1933_v58 = vrot.slane %v8949_v43, %v9548_v54  ;;  %v1728_v63 = vcombine.low %v1706_v34, %v1720_v35  ;;  %v8981_v2 = vld [vmem:[#allocation2 + $0x364] ss:$16 sps:$4 sm:$0xff]   ;;  %v8985_v34 = vld [vmem:[%s11222_s0 + $0x540] ss:$14 sps:$4 sm:$0xff]   ;;  %v8987_v35 = vld [vmem:[%s11222_s0 + $0x55c] ss:$14 sps:$4 sm:$0xff]   ;;  %v2487_v8 = vrot.slane %v9003_v61, %v9548_v54 }
  0x70   :  { %v3113_v53 = vpack.c.bf16 %v1800_v46, %v1729_v45  ;;  %v9021_v44 = vld [vmem:[#allocation2 + $0x3c0] ss:$16 sps:$4 sm:$0xff]   ;;  %v9023_v45 = vld [vmem:[#allocation2 + $0x3c4] ss:$16 sps:$4 sm:$0xff]   ;;  %v2274_v46 = vrot.slane %v8985_v34, %v9548_v54  ;;  %v9049_v61 = vld [vmem:[%s11222_s0 + $0xac] ss:$14 sps:$4 sm:$0xff]  }
  0x72   :  { %4623 = vmatpush1.bf16.msra.mxu0 %v8923_v62  ;;  %5395 = vmatpush1.bf16.msra.mxu1 %v8926_v1  ;;  %v8963_v62 = vld [vmem:[%s11222_s0 + $0x4b4] ss:$14 sps:$4 sm:$0xff]  }
  0x73   :  { %4624 = vmatprep.subr.bf16.mxu0 %v8939_v12  ;;  %5396 = vmatprep.subr.bf16.mxu1 %v8942_v16  ;;  %v8979_v1 = vld [vmem:[#allocation2 + $0x360] ss:$16 sps:$4 sm:$0xff]  }
  0x74   :  { %4488 = vmatmul.mubr.bf16.gmra.mrb[16].mxu0 %v3084_v57  ;;  %5260 = vmatmul.mubr.bf16.gmra.mrb[16].mxu1 %v3084_v57  ;;  %v1919_v57 = vrot.slane %v8947_v42, %v9548_v54  ;;  %v8971_v16 = vld [vmem:[%s11222_s0 + $0x4d0] ss:$14 sps:$4 sm:$0xff]  }
  0x75   :  { %4497 = vmatprep.mubr.bf16.mxu0 %v3092_v0  ;;  %5269 = vmatprep.mubr.bf16.mxu1 %v3092_v0  ;;  %v1799_v0 = vcombine.low %v1777_v36, %v1791_v37  ;;  %v8989_v36 = vld [vmem:[%s11222_s0 + $0x578] ss:$14 sps:$4 sm:$0xff]   ;;  %v8991_v37 = vld [vmem:[%s11222_s0 + $0x594] ss:$14 sps:$4 sm:$0xff]  }
  0x76   :  { %4625 = vmatpush1.bf16.msra.mxu0 %v8937_v11  ;;  %5397 = vmatpush1.bf16.msra.mxu1 %v8940_v15  ;;  %v1942_v6 = vcombine.high %v1919_v57, %v1933_v58  ;;  %v2075_v11 = vrot.slane %v8963_v62, %v9548_v54  ;;  %v1870_v15 = vcombine.low %v1848_v55, %v1862_v56  ;;  %v8999_v56 = vld [vmem:[%s11222_s0 + $0x5b0] ss:$14 sps:$4 sm:$0xff]  }
  0x77   :  { %4626 = vmatprep.subr.bf16.mxu0 %v8953_v30  ;;  %5398 = vmatprep.subr.bf16.mxu1 %v8956_v33  ;;  %v3112_v7 = vpack.c.bf16 %v1799_v0, %v1728_v63  ;;  %v1941_v22 = vcombine.low %v1919_v57, %v1933_v58  ;;  %v2146_v30 = vrot.slane %v8973_v17, %v9548_v54  ;;  %v9010_v33 = vld [vmem:[#allocation2 + $0x3a8] ss:$16 sps:$4 sm:$0xff]   ;;  %v9005_v62 = vld [vmem:[%s11222_s0 + $0x604] ss:$14 sps:$4 sm:$0xff]  }
  0x78   :  { %v3120_v12 = vpack.c.bf16 %v1942_v6, %v1871_v5  ;;  %v2084_v24 = vcombine.high %v2061_v10, %v2075_v11  ;;  %v2083_v40 = vcombine.low %v2061_v10, %v2075_v11  ;;  %v9035_v63 = vld [vmem:[#allocation2 + $0x3e0] ss:$16 sps:$4 sm:$0xff]   ;;  %v9037_v0 = vld [vmem:[#allocation2 + $0x3e4] ss:$16 sps:$4 sm:$0xff]   ;;  %v2416_v5 = vrot.slane %v8999_v56, %v9548_v54  ;;  %v9046_v10 = vld [vmem:[#allocation2 + $0x40c] ss:$16 sps:$4 sm:$0xff]  }
  0x79   :  { %v3119_v25 = vpack.c.bf16 %v1941_v22, %v1870_v15  ;;  %v9043_v6 = vld [vmem:[#allocation2 + $0x404] ss:$16 sps:$4 sm:$0xff]   ;;  %v2501_v9 = vrot.slane %v9005_v62, %v9548_v54 }
  0x7a   :  { %4627 = vmatpush1.bf16.msra.mxu0 %v8951_v29  ;;  %5399 = vmatpush1.bf16.msra.mxu1 %v8954_v32  ;;  %v3127_v26 = vpack.c.bf16 %v2084_v24, %v2013_v23  ;;  %v2132_v29 = vrot.slane %v8971_v16, %v9548_v54  ;;  %v2217_v32 = vrot.slane %v8977_v19, %v9548_v54  ;;  %v9017_v15 = vld [vmem:[%s11222_s0 + $0x658] ss:$14 sps:$4 sm:$0xff]   ;;  %v9019_v16 = vld [vmem:[%s11222_s0 + $0x674] ss:$14 sps:$4 sm:$0xff]  }
  0x7b   :  { %4628 = vmatprep.subr.bf16.mxu0 %v8967_v49  ;;  %5400 = vmatprep.subr.bf16.mxu1 %v8970_v51  ;;  %v3126_v43 = vpack.c.bf16 %v2083_v40, %v2012_v39  ;;  %v2345_v49 = vrot.slane %v8989_v36, %v9548_v54  ;;  %v9024_v51 = vld [vmem:[#allocation2 + $0x3c8] ss:$16 sps:$4 sm:$0xff]   ;;  %v2629_v22 = vrot.slane %v9017_v15, %v9548_v54  ;;  %v8815_v39 = vld [vmem:[%s11222_s0 + $0x4] ss:$14 sps:$4 sm:$0xff]   ;;  %v8818_v40 = vld [vmem:[%s11222_s0 + $0x20] ss:$14 sps:$4 sm:$0xff]  }
  0x7c   :  { %4498 = vmatmul.mubr.bf16.gmra.mrb[20].mxu0 %v3091_v13  ;;  %5270 = vmatmul.mubr.bf16.gmra.mrb[20].mxu1 %v3091_v13  ;;  %v8993_v13 = vld [vmem:[#allocation2 + $0x380] ss:$16 sps:$4 sm:$0xff]   ;;  %v2155_v41 = vcombine.high %v2132_v29, %v2146_v30  ;;  %v2154_v55 = vcombine.low %v2132_v29, %v2146_v30  ;;  %v2643_v23 = vrot.slane %v9019_v16, %v9548_v54  ;;  %v9029_v30 = vld [vmem:[%s11222_s0 + $0x6ac] ss:$14 sps:$4 sm:$0xff]   ;;  %v9050_v62 = vld [vmem:[%s11222_s0 + $0xc8] ss:$14 sps:$4 sm:$0xff]  }
  0x7d   :  { %4507 = vmatprep.mubr.bf16.mxu0 %v3099_v14  ;;  %5279 = vmatprep.mubr.bf16.mxu1 %v3099_v14  ;;  %v8995_v14 = vld [vmem:[#allocation2 + $0x384] ss:$16 sps:$4 sm:$0xff]   ;;  %v2714_v36 = vrot.slane %v9029_v30, %v9548_v54  ;;  %v9044_v15 = vld [vmem:[#allocation2 + $0x408] ss:$16 sps:$4 sm:$0xff]  }
  0x7e   :  { %4629 = vmatpush1.bf16.msra.mxu0 %v8965_v47  ;;  %5401 = vmatpush1.bf16.msra.mxu1 %v8968_v50  ;;  %v2288_v47 = vrot.slane %v8987_v35, %v9548_v54  ;;  %v2359_v50 = vrot.slane %v8991_v37, %v9548_v54  ;;  %v2652_v29 = vcombine.high %v2629_v22, %v2643_v23 }
  0x7f   :  { %4630 = vmatprep.subr.bf16.mxu0 %v8981_v2  ;;  %5402 = vmatprep.subr.bf16.mxu1 %v8984_v4  ;;  %v9040_v2 = vld [vmem:[#allocation2 + $0x3ec] ss:$16 sps:$4 sm:$0xff]  }
  0x80   :  { %v2297_v58 = vcombine.high %v2274_v46, %v2288_v47  ;;  %v2368_v59 = vcombine.high %v2345_v49, %v2359_v50  ;;  %v2296_v11 = vcombine.low %v2274_v46, %v2288_v47 }
  0x82   :  { %4631 = vmatpush1.bf16.msra.mxu0 %v8979_v1  ;;  %5403 = vmatpush1.bf16.msra.mxu1 %v8982_v3  ;;  %v9038_v1 = vld [vmem:[#allocation2 + $0x3e8] ss:$16 sps:$4 sm:$0xff]   ;;  %v3141_v4 = vpack.c.bf16 %v2368_v59, %v2297_v58  ;;  %v9047_v59 = vld [vmem:[%s11222_s0 + $0x74] ss:$14 sps:$4 sm:$0xff]  }
  0x83   :  { %4632 = vmatprep.subr.bf16.mxu0 %v8995_v14  ;;  %5404 = vmatprep.subr.bf16.mxu1 %v8998_v21  ;;  %v9015_v14 = vld [vmem:[%s11222_s0 + $0x63c] ss:$14 sps:$4 sm:$0xff]  }
  0x84   :  { %4508 = vmatmul.mubr.bf16.gmra.mrb[24].mxu0 %v3098_v31  ;;  %5280 = vmatmul.mubr.bf16.gmra.mrb[24].mxu1 %v3098_v31  ;;  %v2203_v31 = vrot.slane %v8975_v18, %v9548_v54  ;;  %v2510_v18 = vcombine.high %v2487_v8, %v2501_v9  ;;  %v2572_v21 = vrot.slane %v9015_v14, %v9548_v54  ;;  %v9041_v14 = vld [vmem:[#allocation2 + $0x400] ss:$16 sps:$4 sm:$0xff]  }
  0x85   :  { %4517 = vmatprep.mubr.bf16.mxu0 %v3106_v38  ;;  %5289 = vmatprep.mubr.bf16.mxu1 %v3106_v38  ;;  %v9012_v38 = vld [vmem:[#allocation2 + $0x3ac] ss:$16 sps:$4 sm:$0xff]  }
  0x86   :  { %4633 = vmatpush1.bf16.msra.mxu0 %v8993_v13  ;;  %5405 = vmatpush1.bf16.msra.mxu1 %v8996_v20  ;;  %v2226_v42 = vcombine.high %v2203_v31, %v2217_v32  ;;  %v2225_v57 = vcombine.low %v2203_v31, %v2217_v32  ;;  %v9013_v13 = vld [vmem:[%s11222_s0 + $0x620] ss:$14 sps:$4 sm:$0xff]   ;;  %v9031_v31 = vld [vmem:[%s11222_s0 + $0x6c8] ss:$14 sps:$4 sm:$0xff]   ;;  %v9033_v32 = vld [vmem:[%s11222_s0 + $0x6e4] ss:$14 sps:$4 sm:$0xff]  }
  0x87   :  { %4634 = vmatprep.subr.bf16.mxu0 %v9009_v28  ;;  %5406 = vmatprep.subr.bf16.mxu1 %v9012_v38  ;;  %v2558_v20 = vrot.slane %v9013_v13, %v9548_v54  ;;  %v2771_v37 = vrot.slane %v9031_v31, %v9548_v54  ;;  %v2785_v38 = vrot.slane %v9033_v32, %v9548_v54  ;;  %v9070_v32 = vld [vmem:[%s11222_s0 + $0x1a8] ss:$14 sps:$4 sm:$0xff]  }
  0x88   :  { %v3133_v3 = vpack.c.bf16 %v2225_v57, %v2154_v55 }
  0x89   :  { %v2581_v28 = vcombine.high %v2558_v20, %v2572_v21  ;;  %v2794_v46 = vcombine.high %v2771_v37, %v2785_v38  ;;  %v2793_v56 = vcombine.low %v2771_v37, %v2785_v38 }
  0x8a   :  { %4635 = vmatpush1.bf16.msra.mxu0 %v9007_v27  ;;  %5407 = vmatpush1.bf16.msra.mxu1 %v9010_v33  ;;  %v2509_v27 = vcombine.low %v2487_v8, %v2501_v9  ;;  %v9058_v8 = vld [vmem:[%s11222_s0 + $0x100] ss:$14 sps:$4 sm:$0xff]   ;;  %v9059_v9 = vld [vmem:[%s11222_s0 + $0x11c] ss:$14 sps:$4 sm:$0xff]  }
  0x8b   :  { %4636 = vmatprep.subr.bf16.mxu0 %v9023_v45  ;;  %v3155_v34 = vpack.c.bf16 %v2652_v29, %v2581_v28  ;;  %v9068_v28 = vld [vmem:[%s11222_s0 + $0x170] ss:$14 sps:$4 sm:$0xff]   ;;  %v9069_v29 = vld [vmem:[%s11222_s0 + $0x18c] ss:$14 sps:$4 sm:$0xff]  }
  0x8c   :  { %4518 = vmatmul.mubr.bf16.gmra.mrb[28].mxu0 %v3105_v52  ;;  %5290 = vmatmul.mubr.bf16.gmra.mrb[28].mxu1 %v3105_v52  ;;  %v9026_v52 = vld [vmem:[#allocation2 + $0x3cc] ss:$16 sps:$4 sm:$0xff]   ;;  %v9882_v37 = vrot.slane %v9068_v28, %v9548_v54 }
  0x8d   :  { %4527 = vmatprep.mubr.bf16.mxu0 %v3113_v53  ;;  %5299 = vmatprep.mubr.bf16.mxu1 %v3113_v53  ;;  %v3134_v53 = vpack.c.bf16 %v2226_v42, %v2155_v41  ;;  %v8821_v41 = vld [vmem:[%s11222_s0 + $0x3c] ss:$14 sps:$4 sm:$0xff]   ;;  %v2580_v42 = vcombine.low %v2558_v20, %v2572_v21  ;;  %v9053_v21 = vld [vmem:[#allocation2 + $0x424] ss:$16 sps:$4 sm:$0xff]  }
  0x8e   :  { %4637 = vmatpush1.bf16.msra.mxu0 %v9021_v44  ;;  %5408 = vmatprep.subr.bf16.mxu1 %v9026_v52  ;;  %v8824_v44 = vld [vmem:[%s11222_s0 + $0x58] ss:$14 sps:$4 sm:$0xff]   ;;  %v648_v52 = vrot.slane %v8821_v41, %v9548_v54  ;;  %v9061_v41 = vld [vmem:[#allocation2 + $0x440] ss:$16 sps:$4 sm:$0xff]   ;;  %v9116_v28 = vld [vmem:[#allocation2 + $0x4ec] ss:$16 sps:$4 sm:$0xff]  }
  0x8f   :  { %5409 = vmatpush1.bf16.msra.mxu1 %v9024_v51  ;;  %4638 = vmatprep.subr.bf16.mxu0 %v9037_v0  ;;  %v591_v51 = vrot.slane %v8818_v40, %v9548_v54  ;;  %v1088_v40 = vrot.slane %v9070_v32, %v9548_v54  ;;  %v9100_v32 = vld [vmem:[%s11222_s0 + $0x2f8] ss:$14 sps:$4 sm:$0xff]  }
  0x90   :  { %5410 = vmatprep.subr.bf16.mxu1 %v9040_v2 }
  0x92   :  { %4639 = vmatpush1.bf16.msra.mxu0 %v9035_v63 }
  0x93   :  { %5411 = vmatpush1.bf16.msra.mxu1 %v9038_v1  ;;  %4801 = vmatprep.subr.bf16.mxu0 %v9043_v6  ;;  %v719_v1 = vrot.slane %v9047_v59, %v9548_v54 }
  0x94   :  { %4528 = vmatmul.mubr.bf16.gmra.mrb[32].mxu0 %v3112_v7  ;;  %5300 = vmatmul.mubr.bf16.gmra.mrb[32].mxu1 %v3112_v7  ;;  %v2430_v7 = vrot.slane %v9001_v60, %v9548_v54  ;;  %v9048_v60 = vld [vmem:[%s11222_s0 + $0x90] ss:$14 sps:$4 sm:$0xff]  }
  0x95   :  { %4537 = vmatprep.mubr.bf16.mxu0 %v3120_v12  ;;  %5309 = vmatprep.mubr.bf16.mxu1 %v3120_v12  ;;  %v2367_v12 = vcombine.low %v2345_v49, %v2359_v50  ;;  %v577_v49 = vrot.slane %v8815_v39, %v9548_v54  ;;  %v733_v2 = vrot.slane %v9048_v60, %v9548_v54 }
  0x96   :  { %v2439_v17 = vcombine.high %v2416_v5, %v2430_v7  ;;  %5573 = vmatprep.subr.bf16.mxu1 %v9046_v10  ;;  %v9060_v10 = vld [vmem:[%s11222_s0 + $0x138] ss:$14 sps:$4 sm:$0xff]   ;;  %v9885_v39 = vrot.slane %v9069_v29, %v9548_v54 }
  0x97   :  { %v3140_v19 = vpack.c.bf16 %v2367_v12, %v2296_v11  ;;  %v595_v57 = vcombine.high %v577_v49, %v591_v51  ;;  %v594_v6 = vcombine.low %v577_v49, %v591_v51  ;;  %v737_v11 = vcombine.high %v719_v1, %v733_v2  ;;  %v9078_v49 = vld [vmem:[%s11222_s0 + $0x1e0] ss:$14 sps:$4 sm:$0xff]  }
  0x98   :  { %v3148_v24 = vpack.c.bf16 %v2510_v18, %v2439_v17  ;;  %v875_v17 = vrot.slane %v9058_v8, %v9548_v54  ;;  %v932_v18 = vrot.slane %v9059_v9, %v9548_v54  ;;  %v9096_v8 = vld [vmem:[#allocation2 + $0x4ac] ss:$16 sps:$4 sm:$0xff]  }
  0x9c   :  { %4538 = vmatmul.mubr.bf16.gmra.mrb[36].mxu0 %v3119_v25  ;;  %5310 = vmatmul.mubr.bf16.gmra.mrb[36].mxu1 %v3119_v25  ;;  %v2438_v25 = vcombine.low %v2416_v5, %v2430_v7  ;;  %v9057_v5 = vld [vmem:[%s11222_s0 + $0xe4] ss:$14 sps:$4 sm:$0xff]  }
  0x9d   :  { %4547 = vmatprep.mubr.bf16.mxu0 %v3127_v26  ;;  %5319 = vmatprep.mubr.bf16.mxu1 %v3127_v26  ;;  %v9027_v26 = vld [vmem:[%s11222_s0 + $0x690] ss:$14 sps:$4 sm:$0xff]   ;;  %v861_v16 = vrot.slane %v9057_v5, %v9548_v54  ;;  %v9089_v5 = vld [vmem:[%s11222_s0 + $0x26c] ss:$14 sps:$4 sm:$0xff]  }
  0x9e   :  { %v3147_v33 = vpack.c.bf16 %v2509_v27, %v2438_v25  ;;  %v2700_v35 = vrot.slane %v9027_v26, %v9548_v54  ;;  %v9067_v25 = vld [vmem:[%s11222_s0 + $0x154] ss:$14 sps:$4 sm:$0xff]   ;;  %v736_v26 = vcombine.low %v719_v1, %v733_v2  ;;  %v9084_v2 = vld [vmem:[#allocation2 + $0x488] ss:$16 sps:$4 sm:$0xff]  }
  0x9f   :  { %v879_v30 = vcombine.high %v861_v16, %v875_v17  ;;  %v9081_v1 = vld [vmem:[#allocation2 + $0x480] ss:$16 sps:$4 sm:$0xff]  }
  0xa0   :  { %v2723_v45 = vcombine.high %v2700_v35, %v2714_v36  ;;  %v2722_v55 = vcombine.low %v2700_v35, %v2714_v36  ;;  %v9879_v36 = vrot.slane %v9067_v25, %v9548_v54  ;;  %v9104_v25 = vld [vmem:[#allocation2 + $0x4c8] ss:$16 sps:$4 sm:$0xff]  }
  0xa2   :  { %v3162_v50 = vpack.c.bf16 %v2794_v46, %v2723_v45  ;;  %v3161_v63 = vpack.c.bf16 %v2793_v56, %v2722_v55  ;;  %v9077_v45 = vld [vmem:[%s11222_s0 + $0x1c4] ss:$14 sps:$4 sm:$0xff]   ;;  %v878_v46 = vcombine.low %v861_v16, %v875_v17  ;;  %v1021_v51 = vcombine.high %v9879_v36, %v9882_v37  ;;  %v9074_v56 = vld [vmem:[#allocation2 + $0x468] ss:$16 sps:$4 sm:$0xff]   ;;  %v9106_v16 = vld [vmem:[#allocation2 + $0x4cc] ss:$16 sps:$4 sm:$0xff]  }
  0xa3   :  { %v9071_v55 = vld [vmem:[#allocation2 + $0x460] ss:$16 sps:$4 sm:$0xff]   ;;  %v9904_v60 = vrot.slane %v9077_v45, %v9548_v54  ;;  %v1020_v9 = vcombine.low %v9879_v36, %v9882_v37  ;;  %v9114_v36 = vld [vmem:[#allocation2 + $0x4e8] ss:$16 sps:$4 sm:$0xff]   ;;  %v9123_v37 = vld [vmem:[#allocation2 + $0x504] ss:$16 sps:$4 sm:$0xff]  }
  0xa4   :  { %4548 = vmatmul.mubr.bf16.gmra.mrb[40].mxu0 %v3126_v43  ;;  %5320 = vmatmul.mubr.bf16.gmra.mrb[40].mxu1 %v3126_v43  ;;  %v2651_v43 = vcombine.low %v2629_v22, %v2643_v23  ;;  %v9051_v22 = vld [vmem:[#allocation2 + $0x420] ss:$16 sps:$4 sm:$0xff]   ;;  %v9054_v23 = vld [vmem:[#allocation2 + $0x428] ss:$16 sps:$4 sm:$0xff]  }
  0xa5   :  { %4557 = vmatprep.mubr.bf16.mxu0 %v3134_v53  ;;  %5329 = vmatprep.mubr.bf16.mxu1 %v3134_v53  ;;  %v662_v53 = vrot.slane %v8824_v44, %v9548_v54  ;;  %v9076_v44 = vld [vmem:[#allocation2 + $0x46c] ss:$16 sps:$4 sm:$0xff]   ;;  %v9107_v45 = vld [vmem:[%s11222_s0 + $0x314] ss:$14 sps:$4 sm:$0xff]  }
  0xa6   :  { %v3154_v47 = vpack.c.bf16 %v2651_v43, %v2580_v42  ;;  %v9064_v42 = vld [vmem:[#allocation2 + $0x448] ss:$16 sps:$4 sm:$0xff]   ;;  %v9073_v43 = vld [vmem:[#allocation2 + $0x464] ss:$16 sps:$4 sm:$0xff]  }
  0xa7   :  { %v666_v58 = vcombine.high %v648_v52, %v662_v53  ;;  %v665_v7 = vcombine.low %v648_v52, %v662_v53  ;;  %v1092_v52 = vcombine.high %v9885_v39, %v1088_v40  ;;  %v9080_v53 = vld [vmem:[%s11222_s0 + $0x218] ss:$14 sps:$4 sm:$0xff]  }
  0xa9   :  { %v3059_v0 = vpack.c.bf16 %v666_v58, %v595_v57  ;;  %v3058_v13 = vpack.c.bf16 %v665_v7, %v594_v6  ;;  %v9083_v57 = vld [vmem:[#allocation2 + $0x484] ss:$16 sps:$4 sm:$0xff]   ;;  %v9086_v58 = vld [vmem:[#allocation2 + $0x48c] ss:$16 sps:$4 sm:$0xff]  }
  0xaa   :  { %v9090_v6 = vld [vmem:[%s11222_s0 + $0x288] ss:$14 sps:$4 sm:$0xff]  }
  0xab   :  { %v9093_v7 = vld [vmem:[#allocation2 + $0x4a4] ss:$16 sps:$4 sm:$0xff]  }
  0xac   :  { %4558 = vmatmul.mubr.bf16.gmra.mrb[44].mxu0 %v3133_v3  ;;  %5330 = vmatmul.mubr.bf16.gmra.mrb[44].mxu1 %v3133_v3  ;;  %v790_v3 = vrot.slane %v9049_v61, %v9548_v54  ;;  %v3080_v61 = vpack.c.bf16 %v1092_v52, %v1021_v51  ;;  %v9133_v51 = vld [vmem:[#allocation2 + $0x524] ss:$16 sps:$4 sm:$0xff]   ;;  %v9136_v52 = vld [vmem:[#allocation2 + $0x52c] ss:$16 sps:$4 sm:$0xff]  }
  0xad   :  { %4567 = vmatprep.mubr.bf16.mxu0 %v3141_v4  ;;  %5339 = vmatprep.mubr.bf16.mxu1 %v3141_v4  ;;  %v804_v4 = vrot.slane %v9050_v62, %v9548_v54  ;;  %v9907_v62 = vrot.slane %v9078_v49, %v9548_v54  ;;  %v9108_v49 = vld [vmem:[%s11222_s0 + $0x330] ss:$14 sps:$4 sm:$0xff]  }
  0xaf   :  { %v808_v12 = vcombine.high %v790_v3, %v804_v4  ;;  %v807_v27 = vcombine.low %v790_v3, %v804_v4  ;;  %v9087_v3 = vld [vmem:[%s11222_s0 + $0x234] ss:$14 sps:$4 sm:$0xff]   ;;  %v9088_v4 = vld [vmem:[%s11222_s0 + $0x250] ss:$14 sps:$4 sm:$0xff]   ;;  %v1162_v29 = vcombine.low %v9904_v60, %v9907_v62 }
  0xb1   :  { %v3066_v20 = vpack.c.bf16 %v808_v12, %v737_v11  ;;  %v3065_v35 = vpack.c.bf16 %v807_v27, %v736_v26  ;;  %v9091_v11 = vld [vmem:[#allocation2 + $0x4a0] ss:$16 sps:$4 sm:$0xff]   ;;  %v9094_v12 = vld [vmem:[#allocation2 + $0x4a8] ss:$16 sps:$4 sm:$0xff]   ;;  %v9113_v27 = vld [vmem:[#allocation2 + $0x4e4] ss:$16 sps:$4 sm:$0xff]  }
  0xb2   :  { %v9098_v26 = vld [vmem:[%s11222_s0 + $0x2c0] ss:$14 sps:$4 sm:$0xff]  }
  0xb4   :  { %4568 = vmatmul.mubr.bf16.gmra.mrb[48].mxu0 %v3140_v19  ;;  %5340 = vmatmul.mubr.bf16.gmra.mrb[48].mxu1 %v3140_v19  ;;  %v946_v19 = vrot.slane %v9060_v10, %v9548_v54  ;;  %v1091_v10 = vcombine.low %v9885_v39, %v1088_v40 }
  0xb5   :  { %4577 = vmatprep.mubr.bf16.mxu0 %v3148_v24  ;;  %5349 = vmatprep.mubr.bf16.mxu1 %v3148_v24  ;;  %v9056_v24 = vld [vmem:[#allocation2 + $0x42c] ss:$16 sps:$4 sm:$0xff]  }
  0xb6   :  { %v950_v31 = vcombine.high %v932_v18, %v946_v19  ;;  %v3079_v17 = vpack.c.bf16 %v1091_v10, %v1020_v9  ;;  %v9119_v9 = vld [vmem:[%s11222_s0 + $0x3bc] ss:$14 sps:$4 sm:$0xff]   ;;  %v9120_v10 = vld [vmem:[%s11222_s0 + $0x3d8] ss:$14 sps:$4 sm:$0xff]  }
  0xb8   :  { %v3073_v38 = vpack.c.bf16 %v950_v31, %v879_v30  ;;  %v9099_v31 = vld [vmem:[%s11222_s0 + $0x2dc] ss:$14 sps:$4 sm:$0xff]  }
  0xbc   :  { %4578 = vmatmul.mubr.bf16.gmra.mrb[52].mxu0 %v3147_v33  ;;  %5350 = vmatmul.mubr.bf16.gmra.mrb[52].mxu1 %v3147_v33  ;;  %v9063_v33 = vld [vmem:[#allocation2 + $0x444] ss:$16 sps:$4 sm:$0xff]  }
  0xbd   :  { %4587 = vmatprep.mubr.bf16.mxu0 %v3155_v34  ;;  %5359 = vmatprep.mubr.bf16.mxu1 %v3155_v34  ;;  %v9066_v34 = vld [vmem:[#allocation2 + $0x44c] ss:$16 sps:$4 sm:$0xff]  }
  0xc4   :  { %4588 = vmatmul.mubr.bf16.gmra.mrb[56].mxu0 %v3154_v47  ;;  %5360 = vmatmul.mubr.bf16.gmra.mrb[56].mxu1 %v3154_v47  ;;  %v949_v47 = vcombine.low %v932_v18, %v946_v19  ;;  %v9935_v18 = vrot.slane %v9087_v3, %v9548_v54 }
  0xc5   :  { %4597 = vmatprep.mubr.bf16.mxu0 %v3162_v50  ;;  %5369 = vmatprep.mubr.bf16.mxu1 %v3162_v50  ;;  %v9079_v50 = vld [vmem:[%s11222_s0 + $0x1fc] ss:$14 sps:$4 sm:$0xff]  }
  0xc6   :  { %v3072_v59 = vpack.c.bf16 %v949_v47, %v878_v46  ;;  %v9121_v46 = vld [vmem:[#allocation2 + $0x500] ss:$16 sps:$4 sm:$0xff]   ;;  %v9124_v47 = vld [vmem:[#allocation2 + $0x508] ss:$16 sps:$4 sm:$0xff]  }
  0xcc   :  { %4598 = vmatmul.mubr.bf16.gmra.mrb[60].mxu0 %v3161_v63  ;;  %5370 = vmatmul.mubr.bf16.gmra.mrb[60].mxu1 %v3161_v63  ;;  %v9910_v63 = vrot.slane %v9079_v50, %v9548_v54  ;;  %v9109_v50 = vld [vmem:[%s11222_s0 + $0x34c] ss:$14 sps:$4 sm:$0xff]  }
  0xcd   :  { %4640 = vmatprep.mubr.bf16.mxu0 %v3059_v0  ;;  %5412 = vmatprep.mubr.bf16.mxu1 %v3059_v0  ;;  %v9913_v0 = vrot.slane %v9080_v53, %v9548_v54  ;;  %v10005_v3 = vrot.slane %v9109_v50, %v9548_v54 }
  0xcf   :  { %v1233_v30 = vcombine.low %v9910_v63, %v9913_v0 }
  0xd1   :  { %v3086_v39 = vpack.c.bf16 %v1233_v30, %v1162_v29  ;;  %v9173_v29 = vld [vmem:[#allocation2 + $0x5a4] ss:$16 sps:$4 sm:$0xff]   ;;  %v9176_v30 = vld [vmem:[#allocation2 + $0x5ac] ss:$16 sps:$4 sm:$0xff]  }
  0xd4   :  { %4641 = vmatmul.mubr.bf16.vlgmr.msra.gmra.mrb[0].mxu0 %v3058_v13  ;;  %5413 = vmatmul.mubr.bf16.vlgmr.msra.gmra.mrb[0].mxu1 %v3058_v13  ;;  %v1163_v13 = vcombine.high %v9904_v60, %v9907_v62  ;;  %v9146_v62 = vld [vmem:[#allocation2 + $0x54c] ss:$16 sps:$4 sm:$0xff]  }
  0xd5   :  { %4802 = vmatpush1.bf16.msra.mxu0 %v9041_v14  ;;  %5574 = vmatpush1.bf16.msra.mxu1 %v9044_v15  ;;  %v1234_v14 = vcombine.high %v9910_v63, %v9913_v0  ;;  %v9103_v15 = vld [vmem:[#allocation2 + $0x4c4] ss:$16 sps:$4 sm:$0xff]   ;;  %v9999_v0 = vrot.slane %v9107_v45, %v9548_v54  ;;  %v9181_v45 = vld [vmem:[#allocation2 + $0x5c0] ss:$16 sps:$4 sm:$0xff]  }
  0xd6   :  { %4650 = vmatprep.mubr.bf16.mxu0 %v3066_v20  ;;  %5422 = vmatprep.mubr.bf16.mxu1 %v3066_v20  ;;  %v9938_v20 = vrot.slane %v9088_v4, %v9548_v54 }
  0xd7   :  { %4803 = vmatprep.subr.bf16.mxu0 %v9053_v21  ;;  %5575 = vmatprep.subr.bf16.mxu1 %v9056_v24  ;;  %v3087_v19 = vpack.c.bf16 %v1234_v14, %v1163_v13  ;;  %v9941_v21 = vrot.slane %v9089_v5, %v9548_v54  ;;  %v9101_v24 = vld [vmem:[#allocation2 + $0x4c0] ss:$16 sps:$4 sm:$0xff]  }
  0xd8   :  { %v1304_v53 = vcombine.low %v9935_v18, %v9938_v20  ;;  %v9117_v5 = vld [vmem:[%s11222_s0 + $0x384] ss:$14 sps:$4 sm:$0xff]  }
  0xd9   :  { %4804 = vmatpush1.bf16.msra.mxu0 %v9051_v22  ;;  %5576 = vmatpush1.bf16.msra.mxu1 %v9054_v23  ;;  %v9944_v22 = vrot.slane %v9090_v6, %v9548_v54  ;;  %v9097_v23 = vld [vmem:[%s11222_s0 + $0x2a4] ss:$14 sps:$4 sm:$0xff]  }
  0xda   :  { %4805 = vmatprep.subr.bf16.mxu0 %v9063_v33  ;;  %5577 = vmatprep.subr.bf16.mxu1 %v9066_v34  ;;  %v1305_v33 = vcombine.high %v9935_v18, %v9938_v20  ;;  %v9967_v40 = vrot.slane %v9097_v23, %v9548_v54  ;;  %v9141_v6 = vld [vmem:[#allocation2 + $0x540] ss:$16 sps:$4 sm:$0xff]   ;;  %v9154_v18 = vld [vmem:[#allocation2 + $0x568] ss:$16 sps:$4 sm:$0xff]   ;;  %v9166_v20 = vld [vmem:[#allocation2 + $0x58c] ss:$16 sps:$4 sm:$0xff]  }
  0xdb   :  { %v1376_v34 = vcombine.high %v9941_v21, %v9944_v22  ;;  %v9161_v23 = vld [vmem:[#allocation2 + $0x580] ss:$16 sps:$4 sm:$0xff]  }
  0xdc   :  { %4651 = vmatmul.mubr.bf16.gmra.mrb[4].mxu0 %v3065_v35  ;;  %5423 = vmatmul.mubr.bf16.gmra.mrb[4].mxu1 %v3065_v35  ;;  %v9111_v35 = vld [vmem:[#allocation2 + $0x4e0] ss:$16 sps:$4 sm:$0xff]  }
  0xdd   :  { %4660 = vmatprep.mubr.bf16.mxu0 %v3073_v38  ;;  %5432 = vmatprep.mubr.bf16.mxu1 %v3073_v38  ;;  %v9126_v38 = vld [vmem:[#allocation2 + $0x50c] ss:$16 sps:$4 sm:$0xff]  }
  0xde   :  { %4806 = vmatpush1.bf16.msra.mxu0 %v9061_v41  ;;  %5578 = vmatpush1.bf16.msra.mxu1 %v9064_v42  ;;  %v3094_v41 = vpack.c.bf16 %v1376_v34, %v1305_v33  ;;  %v9970_v42 = vrot.slane %v9098_v26, %v9548_v54  ;;  %v10037_v26 = vrot.slane %v9119_v9, %v9548_v54  ;;  %v9127_v33 = vld [vmem:[%s11222_s0 + $0x3f4] ss:$14 sps:$4 sm:$0xff]  }
  0xdf   :  { %4807 = vmatprep.subr.bf16.mxu0 %v9073_v43  ;;  %5579 = vmatprep.subr.bf16.mxu1 %v9076_v44  ;;  %v9973_v43 = vrot.slane %v9099_v31, %v9548_v54  ;;  %v9976_v44 = vrot.slane %v9100_v32, %v9548_v54 }
  0xe0   :  { %v1446_v13 = vcombine.low %v9967_v40, %v9970_v42 }
  0xe1   :  { %v1518_v60 = vcombine.high %v9973_v43, %v9976_v44  ;;  %v1517_v14 = vcombine.low %v9973_v43, %v9976_v44  ;;  %v1855_v44 = vrot.slane %v9127_v33, %v9548_v54 }
  0xe2   :  { %4808 = vmatpush1.bf16.msra.mxu0 %v9071_v55  ;;  %5580 = vmatpush1.bf16.msra.mxu1 %v9074_v56  ;;  %v1375_v55 = vcombine.low %v9941_v21, %v9944_v22  ;;  %v9110_v56 = vld [vmem:[%s11222_s0 + $0x368] ss:$14 sps:$4 sm:$0xff]   ;;  %v10031_v22 = vrot.slane %v9117_v5, %v9548_v54 }
  0xe3   :  { %4809 = vmatprep.subr.bf16.mxu0 %v9083_v57  ;;  %5581 = vmatprep.subr.bf16.mxu1 %v9086_v58  ;;  %v9131_v57 = vld [vmem:[#allocation2 + $0x520] ss:$16 sps:$4 sm:$0xff]   ;;  %v9134_v58 = vld [vmem:[#allocation2 + $0x528] ss:$16 sps:$4 sm:$0xff]   ;;  %v10008_v4 = vrot.slane %v9110_v56, %v9548_v54  ;;  %v3100_v21 = vpack.c.bf16 %v1517_v14, %v1446_v13 }
  0xe4   :  { %4661 = vmatmul.mubr.bf16.gmra.mrb[8].mxu0 %v3072_v59  ;;  %5433 = vmatmul.mubr.bf16.gmra.mrb[8].mxu1 %v3072_v59  ;;  %v1447_v59 = vcombine.high %v9967_v40, %v9970_v42  ;;  %v3093_v63 = vpack.c.bf16 %v1375_v55, %v1304_v53  ;;  %v9174_v40 = vld [vmem:[#allocation2 + $0x5a8] ss:$16 sps:$4 sm:$0xff]   ;;  %v9186_v42 = vld [vmem:[#allocation2 + $0x5cc] ss:$16 sps:$4 sm:$0xff]  }
  0xe5   :  { %4670 = vmatprep.mubr.bf16.mxu0 %v3080_v61  ;;  %5442 = vmatprep.mubr.bf16.mxu1 %v3080_v61  ;;  %v9143_v61 = vld [vmem:[#allocation2 + $0x544] ss:$16 sps:$4 sm:$0xff]   ;;  %v1659_v32 = vcombine.low %v10005_v3, %v10008_v4  ;;  %v9196_v53 = vld [vmem:[#allocation2 + $0x5ec] ss:$16 sps:$4 sm:$0xff]  }
  0xe6   :  { %4810 = vmatpush1.bf16.msra.mxu0 %v9081_v1  ;;  %5582 = vmatpush1.bf16.msra.mxu1 %v9084_v2  ;;  %v3101_v1 = vpack.c.bf16 %v1518_v60, %v1447_v59  ;;  %v10002_v2 = vrot.slane %v9108_v49, %v9548_v54 }
  0xe7   :  { %4811 = vmatprep.subr.bf16.mxu0 %v9093_v7  ;;  %5583 = vmatprep.subr.bf16.mxu1 %v9096_v8  ;;  %v9144_v7 = vld [vmem:[#allocation2 + $0x548] ss:$16 sps:$4 sm:$0xff]   ;;  %v9118_v8 = vld [vmem:[%s11222_s0 + $0x3a0] ss:$14 sps:$4 sm:$0xff]  }
  0xe8   :  { %v1588_v31 = vcombine.low %v9999_v0, %v10002_v2 }
  0xea   :  { %4812 = vmatpush1.bf16.msra.mxu0 %v9091_v11  ;;  %5584 = vmatpush1.bf16.msra.mxu1 %v9094_v12  ;;  %v9153_v11 = vld [vmem:[#allocation2 + $0x564] ss:$16 sps:$4 sm:$0xff]   ;;  %v9156_v12 = vld [vmem:[#allocation2 + $0x56c] ss:$16 sps:$4 sm:$0xff]   ;;  %v3107_v43 = vpack.c.bf16 %v1659_v32, %v1588_v31 }
  0xeb   :  { %4813 = vmatprep.subr.bf16.mxu0 %v9103_v15  ;;  %5585 = vmatprep.subr.bf16.mxu1 %v9106_v16  ;;  %v1589_v15 = vcombine.high %v9999_v0, %v10002_v2  ;;  %v1660_v16 = vcombine.high %v10005_v3, %v10008_v4  ;;  %v9194_v0 = vld [vmem:[#allocation2 + $0x5e8] ss:$16 sps:$4 sm:$0xff]   ;;  %v9214_v2 = vld [vmem:[#allocation2 + $0x60c] ss:$16 sps:$4 sm:$0xff]  }
  0xec   :  { %4671 = vmatmul.mubr.bf16.gmra.mrb[12].mxu0 %v3079_v17  ;;  %5443 = vmatmul.mubr.bf16.gmra.mrb[12].mxu1 %v3079_v17  ;;  %v9151_v17 = vld [vmem:[#allocation2 + $0x560] ss:$16 sps:$4 sm:$0xff]  }
  0xed   :  { %4680 = vmatprep.mubr.bf16.mxu0 %v3087_v19  ;;  %5452 = vmatprep.mubr.bf16.mxu1 %v3087_v19  ;;  %v9163_v19 = vld [vmem:[#allocation2 + $0x584] ss:$16 sps:$4 sm:$0xff]  }
  0xee   :  { %4814 = vmatpush1.bf16.msra.mxu0 %v9101_v24  ;;  %5586 = vmatpush1.bf16.msra.mxu1 %v9104_v25  ;;  %v3108_v24 = vpack.c.bf16 %v1660_v16, %v1589_v15  ;;  %v10034_v25 = vrot.slane %v9118_v8, %v9548_v54  ;;  %v9149_v15 = vld [vmem:[%s11222_s0 + $0x50c] ss:$14 sps:$4 sm:$0xff]   ;;  %v9150_v16 = vld [vmem:[%s11222_s0 + $0x528] ss:$14 sps:$4 sm:$0xff]  }
  0xef   :  { %4815 = vmatprep.subr.bf16.mxu0 %v9113_v27  ;;  %5587 = vmatprep.subr.bf16.mxu1 %v9116_v28  ;;  %v10040_v27 = vrot.slane %v9120_v10, %v9548_v54  ;;  %v9164_v28 = vld [vmem:[#allocation2 + $0x588] ss:$16 sps:$4 sm:$0xff]  }
  0xf0   :  { %v1731_v34 = vcombine.high %v10031_v22, %v10034_v25  ;;  %v1730_v55 = vcombine.low %v10031_v22, %v10034_v25  ;;  %v2224_v22 = vrot.slane %v9150_v16, %v9548_v54  ;;  %v9159_v25 = vld [vmem:[%s11222_s0 + $0x57c] ss:$14 sps:$4 sm:$0xff]  }
  0xf1   :  { %v1801_v56 = vcombine.low %v10037_v26, %v10040_v27 }
  0xf2   :  { %4816 = vmatpush1.bf16.msra.mxu0 %v9111_v35  ;;  %5588 = vmatpush1.bf16.msra.mxu1 %v9114_v36  ;;  %v1802_v35 = vcombine.high %v10037_v26, %v10040_v27  ;;  %v9128_v36 = vld [vmem:[%s11222_s0 + $0x410] ss:$14 sps:$4 sm:$0xff]   ;;  %v9160_v26 = vld [vmem:[%s11222_s0 + $0x598] ss:$14 sps:$4 sm:$0xff]  }
  0xf3   :  { %4817 = vmatprep.subr.bf16.mxu0 %v9123_v37  ;;  %5589 = vmatprep.subr.bf16.mxu1 %v9126_v38  ;;  %v9129_v37 = vld [vmem:[%s11222_s0 + $0x42c] ss:$14 sps:$4 sm:$0xff]   ;;  %v9130_v38 = vld [vmem:[%s11222_s0 + $0x448] ss:$14 sps:$4 sm:$0xff]   ;;  %v1869_v49 = vrot.slane %v9128_v36, %v9548_v54  ;;  %v3114_v3 = vpack.c.bf16 %v1801_v56, %v1730_v55  ;;  %v2366_v36 = vrot.slane %v9160_v26, %v9548_v54  ;;  %v9177_v55 = vld [vmem:[%s11222_s0 + $0x624] ss:$14 sps:$4 sm:$0xff]  }
  0xf4   :  { %4681 = vmatmul.mubr.bf16.gmra.mrb[16].mxu0 %v3086_v39  ;;  %5453 = vmatmul.mubr.bf16.gmra.mrb[16].mxu1 %v3086_v39  ;;  %v9171_v39 = vld [vmem:[#allocation2 + $0x5a0] ss:$16 sps:$4 sm:$0xff]   ;;  %v1926_v50 = vrot.slane %v9129_v37, %v9548_v54 }
  0xf5   :  { %4690 = vmatprep.mubr.bf16.mxu0 %v3094_v41  ;;  %5462 = vmatprep.mubr.bf16.mxu1 %v3094_v41  ;;  %v9183_v41 = vld [vmem:[#allocation2 + $0x5c4] ss:$16 sps:$4 sm:$0xff]   ;;  %v1873_v59 = vcombine.high %v1855_v44, %v1869_v49  ;;  %v1872_v9 = vcombine.low %v1855_v44, %v1869_v49 }
  0xf6   :  { %4818 = vmatpush1.bf16.msra.mxu0 %v9121_v46  ;;  %5590 = vmatpush1.bf16.msra.mxu1 %v9124_v47  ;;  %v9184_v46 = vld [vmem:[#allocation2 + $0x5c8] ss:$16 sps:$4 sm:$0xff]   ;;  %v3115_v47 = vpack.c.bf16 %v1802_v35, %v1731_v34  ;;  %v2352_v35 = vrot.slane %v9159_v25, %v9548_v54  ;;  %v9167_v37 = vld [vmem:[%s11222_s0 + $0x5b4] ss:$14 sps:$4 sm:$0xff]  }
  0xf7   :  { %4819 = vmatprep.subr.bf16.mxu0 %v9133_v51  ;;  %5591 = vmatprep.subr.bf16.mxu1 %v9136_v52  ;;  %v1940_v51 = vrot.slane %v9130_v38, %v9548_v54  ;;  %v9193_v52 = vld [vmem:[#allocation2 + $0x5e4] ss:$16 sps:$4 sm:$0xff]   ;;  %v9168_v38 = vld [vmem:[%s11222_s0 + $0x5d0] ss:$14 sps:$4 sm:$0xff]  }
  0xf8   :  { %v9170_v44 = vld [vmem:[%s11222_s0 + $0x608] ss:$14 sps:$4 sm:$0xff]   ;;  %v2437_v49 = vrot.slane %v9168_v38, %v9548_v54  ;;  %v9224_v38 = vld [vmem:[%s11222_s0 + $0xcc] ss:$14 sps:$4 sm:$0xff]  }
  0xf9   :  { %v1944_v60 = vcombine.high %v1926_v50, %v1940_v51  ;;  %v1943_v10 = vcombine.low %v1926_v50, %v1940_v51  ;;  %v2508_v51 = vrot.slane %v9170_v44, %v9548_v54  ;;  %v833_v44 = vrot.slane %v9224_v38, %v9548_v54 }
  0xfa   :  { %4820 = vmatpush1.bf16.msra.mxu0 %v9131_v57  ;;  %5592 = vmatpush1.bf16.msra.mxu1 %v9134_v58  ;;  %v9137_v57 = vld [vmem:[%s11222_s0 + $0x464] ss:$14 sps:$4 sm:$0xff]   ;;  %v9138_v58 = vld [vmem:[%s11222_s0 + $0x480] ss:$14 sps:$4 sm:$0xff]  }
  0xfb   :  { %4821 = vmatprep.subr.bf16.mxu0 %v9143_v61  ;;  %5593 = vmatprep.subr.bf16.mxu1 %v9146_v62  ;;  %v9139_v61 = vld [vmem:[%s11222_s0 + $0x49c] ss:$14 sps:$4 sm:$0xff]   ;;  %v9140_v62 = vld [vmem:[%s11222_s0 + $0x4b8] ss:$14 sps:$4 sm:$0xff]   ;;  %v1997_v4 = vrot.slane %v9137_v57, %v9548_v54  ;;  %v3122_v5 = vpack.c.bf16 %v1944_v60, %v1873_v59 }
  0xfc   :  { %4691 = vmatmul.mubr.bf16.gmra.mrb[20].mxu0 %v3093_v63  ;;  %5463 = vmatmul.mubr.bf16.gmra.mrb[20].mxu1 %v3093_v63  ;;  %v9191_v63 = vld [vmem:[#allocation2 + $0x5e0] ss:$16 sps:$4 sm:$0xff]   ;;  %v2082_v8 = vrot.slane %v9140_v62, %v9548_v54  ;;  %v9179_v59 = vld [vmem:[%s11222_s0 + $0x65c] ss:$14 sps:$4 sm:$0xff]   ;;  %v9180_v60 = vld [vmem:[%s11222_s0 + $0x678] ss:$14 sps:$4 sm:$0xff]   ;;  %v2565_v62 = vrot.slane %v9177_v55, %v9548_v54 }
  0xfd   :  { %4700 = vmatprep.mubr.bf16.mxu0 %v3101_v1  ;;  %5472 = vmatprep.mubr.bf16.mxu1 %v3101_v1  ;;  %v9211_v1 = vld [vmem:[#allocation2 + $0x604] ss:$16 sps:$4 sm:$0xff]  }
  0xfe   :  { %4822 = vmatpush1.bf16.msra.mxu0 %v9141_v6  ;;  %5594 = vmatpush1.bf16.msra.mxu1 %v9144_v7  ;;  %v2011_v6 = vrot.slane %v9138_v58, %v9548_v54  ;;  %v2068_v7 = vrot.slane %v9139_v61, %v9548_v54  ;;  %v9178_v58 = vld [vmem:[%s11222_s0 + $0x640] ss:$14 sps:$4 sm:$0xff]  }
  0xff   :  { %4823 = vmatprep.subr.bf16.mxu0 %v9153_v11  ;;  %5595 = vmatprep.subr.bf16.mxu1 %v9156_v12  ;;  %v9147_v11 = vld [vmem:[%s11222_s0 + $0x4d4] ss:$14 sps:$4 sm:$0xff]   ;;  %v9148_v12 = vld [vmem:[%s11222_s0 + $0x4f0] ss:$14 sps:$4 sm:$0xff]  }
 0x100   :  { %v2015_v13 = vcombine.high %v1997_v4, %v2011_v6  ;;  %v2086_v14 = vcombine.high %v2068_v7, %v2082_v8  ;;  %v2014_v27 = vcombine.low %v1997_v4, %v2011_v6  ;;  %v9188_v6 = vld [vmem:[%s11222_s0 + $0x6b0] ss:$14 sps:$4 sm:$0xff]  }
 0x102   :  { %4824 = vmatpush1.bf16.msra.mxu0 %v9151_v17  ;;  %5596 = vmatpush1.bf16.msra.mxu1 %v9154_v18  ;;  %v3121_v17 = vpack.c.bf16 %v1943_v10, %v1872_v9  ;;  %v2139_v18 = vrot.slane %v9147_v11, %v9548_v54 }
 0x103   :  { %4825 = vmatprep.subr.bf16.mxu0 %v9163_v19  ;;  %5597 = vmatprep.subr.bf16.mxu1 %v9166_v20  ;;  %v3129_v19 = vpack.c.bf16 %v2086_v14, %v2015_v13  ;;  %v2153_v20 = vrot.slane %v9148_v12, %v9548_v54  ;;  %v2721_v13 = vrot.slane %v9188_v6, %v9548_v54 }
 0x104   :  { %4701 = vmatmul.mubr.bf16.gmra.mrb[24].mxu0 %v3100_v21  ;;  %5473 = vmatmul.mubr.bf16.gmra.mrb[24].mxu1 %v3100_v21  ;;  %v2210_v21 = vrot.slane %v9149_v15, %v9548_v54 }
 0x105   :  { %4710 = vmatprep.mubr.bf16.mxu0 %v3108_v24  ;;  %5482 = vmatprep.mubr.bf16.mxu1 %v3108_v24  ;;  %v9158_v24 = vld [vmem:[%s11222_s0 + $0x560] ss:$14 sps:$4 sm:$0xff]  }
 0x106   :  { %4826 = vmatpush1.bf16.msra.mxu0 %v9161_v23  ;;  %5598 = vmatpush1.bf16.msra.mxu1 %v9164_v28  ;;  %v9157_v23 = vld [vmem:[%s11222_s0 + $0x544] ss:$14 sps:$4 sm:$0xff]   ;;  %v2085_v28 = vcombine.low %v2068_v7, %v2082_v8  ;;  %v2295_v34 = vrot.slane %v9158_v24, %v9548_v54  ;;  %v9189_v7 = vld [vmem:[%s11222_s0 + $0x6cc] ss:$14 sps:$4 sm:$0xff]   ;;  %v9190_v8 = vld [vmem:[%s11222_s0 + $0x6e8] ss:$14 sps:$4 sm:$0xff]  }
 0x107   :  { %4827 = vmatprep.subr.bf16.mxu0 %v9173_v29  ;;  %5599 = vmatprep.subr.bf16.mxu1 %v9176_v30  ;;  %v2157_v29 = vcombine.high %v2139_v18, %v2153_v20  ;;  %v2228_v30 = vcombine.high %v2210_v21, %v2224_v22  ;;  %v2281_v32 = vrot.slane %v9157_v23, %v9548_v54  ;;  %v9203_v23 = vld [vmem:[%s11222_s0 + $0x40] ss:$14 sps:$4 sm:$0xff]   ;;  %v9206_v24 = vld [vmem:[%s11222_s0 + $0x5c] ss:$14 sps:$4 sm:$0xff]  }
 0x108   :  { %v3128_v31 = vpack.c.bf16 %v2085_v28, %v2014_v27  ;;  %v2778_v14 = vrot.slane %v9189_v7, %v9548_v54  ;;  %v2792_v15 = vrot.slane %v9190_v8, %v9548_v54 }
 0x109   :  { %v3136_v33 = vpack.c.bf16 %v2228_v30, %v2157_v29  ;;  %v677_v29 = vrot.slane %v9203_v23, %v9548_v54  ;;  %v691_v30 = vrot.slane %v9206_v24, %v9548_v54 }
 0x10a   :  { %4828 = vmatpush1.bf16.msra.mxu0 %v9171_v39  ;;  %5600 = vmatpush1.bf16.msra.mxu1 %v9174_v40  ;;  %v2156_v39 = vcombine.low %v2139_v18, %v2153_v20  ;;  %v2227_v40 = vcombine.low %v2210_v21, %v2224_v22  ;;  %v9197_v18 = vld [vmem:[%s11222_s0 + $0x8] ss:$14 sps:$4 sm:$0xff]   ;;  %v2796_v22 = vcombine.high %v2778_v14, %v2792_v15 }
 0x10b   :  { %4829 = vmatprep.subr.bf16.mxu0 %v9183_v41  ;;  %5601 = vmatprep.subr.bf16.mxu1 %v9186_v42  ;;  %v2299_v41 = vcombine.high %v2281_v32, %v2295_v34  ;;  %v2370_v42 = vcombine.high %v2352_v35, %v2366_v36  ;;  %v606_v27 = vrot.slane %v9197_v18, %v9548_v54 }
 0x10c   :  { %4711 = vmatmul.mubr.bf16.gmra.mrb[28].mxu0 %v3107_v43  ;;  %5483 = vmatmul.mubr.bf16.gmra.mrb[28].mxu1 %v3107_v43  ;;  %v9169_v43 = vld [vmem:[%s11222_s0 + $0x5ec] ss:$14 sps:$4 sm:$0xff]  }
 0x10d   :  { %4720 = vmatprep.mubr.bf16.mxu0 %v3115_v47  ;;  %5492 = vmatprep.mubr.bf16.mxu1 %v3115_v47  ;;  %v3143_v47 = vpack.c.bf16 %v2370_v42, %v2299_v41  ;;  %v2494_v50 = vrot.slane %v9169_v43, %v9548_v54 }
 0x10e   :  { %4830 = vmatpush1.bf16.msra.mxu0 %v9181_v45  ;;  %5602 = vmatpush1.bf16.msra.mxu1 %v9184_v46  ;;  %v3135_v45 = vpack.c.bf16 %v2227_v40, %v2156_v39  ;;  %v2423_v46 = vrot.slane %v9167_v37, %v9548_v54  ;;  %v9221_v37 = vld [vmem:[%s11222_s0 + $0xb0] ss:$14 sps:$4 sm:$0xff]  }
 0x10f   :  { %4831 = vmatprep.subr.bf16.mxu0 %v9193_v52  ;;  %5603 = vmatprep.subr.bf16.mxu1 %v9196_v53  ;;  %v2298_v52 = vcombine.low %v2281_v32, %v2295_v34  ;;  %v2369_v53 = vcombine.low %v2352_v35, %v2366_v36  ;;  %v2512_v57 = vcombine.high %v2494_v50, %v2508_v51  ;;  %v9215_v35 = vld [vmem:[%s11222_s0 + $0x78] ss:$14 sps:$4 sm:$0xff]   ;;  %v9218_v36 = vld [vmem:[%s11222_s0 + $0x94] ss:$14 sps:$4 sm:$0xff]  }
 0x110   :  { %v2441_v56 = vcombine.high %v2423_v46, %v2437_v49  ;;  %v2511_v4 = vcombine.low %v2494_v50, %v2508_v51  ;;  %v2795_v32 = vcombine.low %v2778_v14, %v2792_v15  ;;  %v700_v34 = vcombine.high %v677_v29, %v691_v30  ;;  %v9233_v50 = vld [vmem:[%s11222_s0 + $0x120] ss:$14 sps:$4 sm:$0xff]   ;;  %v9236_v51 = vld [vmem:[%s11222_s0 + $0x13c] ss:$14 sps:$4 sm:$0xff]   ;;  %v9254_v14 = vld [vmem:[%s11222_s0 + $0x1e4] ss:$14 sps:$4 sm:$0xff]  }
 0x111   :  { %v3142_v61 = vpack.c.bf16 %v2369_v53, %v2298_v52  ;;  %v748_v41 = vrot.slane %v9215_v35, %v9548_v54  ;;  %v762_v42 = vrot.slane %v9218_v36, %v9548_v54  ;;  %v819_v43 = vrot.slane %v9221_v37, %v9548_v54  ;;  %v9257_v15 = vld [vmem:[%s11222_s0 + $0x200] ss:$14 sps:$4 sm:$0xff]  }
 0x112   :  { %4832 = vmatpush1.bf16.msra.mxu0 %v9191_v63  ;;  %5604 = vmatpush1.bf16.msra.mxu1 %v9194_v0  ;;  %v3150_v63 = vpack.c.bf16 %v2512_v57, %v2441_v56  ;;  %v2579_v0 = vrot.slane %v9178_v58, %v9548_v54  ;;  %v9209_v56 = vld [vmem:[#allocation2 + $0x600] ss:$16 sps:$4 sm:$0xff]   ;;  %v9212_v57 = vld [vmem:[#allocation2 + $0x608] ss:$16 sps:$4 sm:$0xff]   ;;  %v1188_v23 = vrot.slane %v9254_v14, %v9548_v54 }
 0x113   :  { %4994 = vmatprep.subr.bf16.mxu0 %v9211_v1  ;;  %5766 = vmatprep.subr.bf16.mxu1 %v9214_v2  ;;  %v2636_v1 = vrot.slane %v9179_v59, %v9548_v54  ;;  %v2650_v2 = vrot.slane %v9180_v60, %v9548_v54  ;;  %v771_v52 = vcombine.high %v748_v41, %v762_v42 }
 0x114   :  { %4721 = vmatmul.mubr.bf16.gmra.mrb[32].mxu0 %v3114_v3  ;;  %5493 = vmatmul.mubr.bf16.gmra.mrb[32].mxu1 %v3114_v3  ;;  %v2440_v3 = vcombine.low %v2423_v46, %v2437_v49  ;;  %v2583_v9 = vcombine.high %v2565_v62, %v2579_v0  ;;  %v9230_v46 = vld [vmem:[%s11222_s0 + $0x104] ss:$14 sps:$4 sm:$0xff]   ;;  %v699_v49 = vcombine.low %v677_v29, %v691_v30 }
 0x115   :  { %4730 = vmatprep.mubr.bf16.mxu0 %v3122_v5  ;;  %5502 = vmatprep.mubr.bf16.mxu1 %v3122_v5  ;;  %v9187_v5 = vld [vmem:[%s11222_s0 + $0x694] ss:$14 sps:$4 sm:$0xff]   ;;  %v2654_v10 = vcombine.high %v2636_v1, %v2650_v2  ;;  %v2653_v20 = vcombine.low %v2636_v1, %v2650_v2  ;;  %v842_v53 = vcombine.high %v819_v43, %v833_v44  ;;  %v9245_v2 = vld [vmem:[%s11222_s0 + $0x190] ss:$14 sps:$4 sm:$0xff]  }
 0x116   :  { %v3149_v11 = vpack.c.bf16 %v2511_v4, %v2440_v3  ;;  %v2707_v12 = vrot.slane %v9187_v5, %v9548_v54  ;;  %v904_v59 = vrot.slane %v9230_v46, %v9548_v54  ;;  %v961_v60 = vrot.slane %v9233_v50, %v9548_v54  ;;  %v9242_v1 = vld [vmem:[%s11222_s0 + $0x174] ss:$14 sps:$4 sm:$0xff]   ;;  %v9248_v3 = vld [vmem:[%s11222_s0 + $0x1ac] ss:$14 sps:$4 sm:$0xff]   ;;  %v9269_v30 = vld [vmem:[%s11222_s0 + $0x270] ss:$14 sps:$4 sm:$0xff]  }
 0x117   :  { %v3157_v16 = vpack.c.bf16 %v2654_v10, %v2583_v9  ;;  %v841_v4 = vcombine.low %v819_v43, %v833_v44  ;;  %v1046_v10 = vrot.slane %v9242_v1, %v9548_v54  ;;  %v1245_v24 = vrot.slane %v9257_v15, %v9548_v54  ;;  %v9266_v29 = vld [vmem:[%s11222_s0 + $0x254] ss:$14 sps:$4 sm:$0xff]   ;;  %v9284_v46 = vld [vmem:[%s11222_s0 + $0x2fc] ss:$14 sps:$4 sm:$0xff]  }
 0x118   :  { %v2725_v21 = vcombine.high %v2707_v12, %v2721_v13  ;;  %v1330_v38 = vrot.slane %v9266_v29, %v9548_v54  ;;  %v9275_v43 = vld [vmem:[%s11222_s0 + $0x2a8] ss:$14 sps:$4 sm:$0xff]   ;;  %v9278_v44 = vld [vmem:[%s11222_s0 + $0x2c4] ss:$14 sps:$4 sm:$0xff]  }
 0x11a   :  { %v3164_v26 = vpack.c.bf16 %v2796_v22, %v2725_v21 }
 0x11c   :  { %4731 = vmatmul.mubr.bf16.gmra.mrb[36].mxu0 %v3121_v17  ;;  %5503 = vmatmul.mubr.bf16.gmra.mrb[36].mxu1 %v3121_v17  ;;  %v2582_v17 = vcombine.low %v2565_v62, %v2579_v0  ;;  %v3068_v62 = vpack.c.bf16 %v842_v53, %v771_v52  ;;  %v9239_v0 = vld [vmem:[%s11222_s0 + $0x158] ss:$14 sps:$4 sm:$0xff]   ;;  %v1472_v52 = vrot.slane %v9278_v44, %v9548_v54 }
 0x11d   :  { %4740 = vmatprep.mubr.bf16.mxu0 %v3129_v19  ;;  %5512 = vmatprep.mubr.bf16.mxu1 %v3129_v19  ;;  %v9200_v19 = vld [vmem:[%s11222_s0 + $0x24] ss:$14 sps:$4 sm:$0xff]   ;;  %v1032_v9 = vrot.slane %v9239_v0, %v9548_v54  ;;  %v9296_v0 = vld [vmem:[%s11222_s0 + $0x36c] ss:$14 sps:$4 sm:$0xff]  }
 0x11e   :  { %v3156_v25 = vpack.c.bf16 %v2653_v20, %v2582_v17  ;;  %v620_v28 = vrot.slane %v9200_v19, %v9548_v54 }
 0x11f   :  { %v1055_v19 = vcombine.high %v1032_v9, %v1046_v10 }
 0x124   :  { %4741 = vmatmul.mubr.bf16.gmra.mrb[40].mxu0 %v3128_v31  ;;  %5513 = vmatmul.mubr.bf16.gmra.mrb[40].mxu1 %v3128_v31  ;;  %v2724_v31 = vcombine.low %v2707_v12, %v2721_v13  ;;  %v1117_v12 = vrot.slane %v9248_v3, %v9548_v54  ;;  %v9251_v13 = vld [vmem:[%s11222_s0 + $0x1c8] ss:$14 sps:$4 sm:$0xff]  }
 0x125   :  { %4750 = vmatprep.mubr.bf16.mxu0 %v3136_v33  ;;  %5522 = vmatprep.mubr.bf16.mxu1 %v3136_v33  ;;  %v629_v33 = vcombine.high %v606_v27, %v620_v28  ;;  %v1174_v22 = vrot.slane %v9251_v13, %v9548_v54 }
 0x126   :  { %v3163_v39 = vpack.c.bf16 %v2795_v32, %v2724_v31 }
 0x127   :  { %v3061_v40 = vpack.c.bf16 %v700_v34, %v629_v33  ;;  %v1197_v32 = vcombine.high %v1174_v22, %v1188_v23  ;;  %v9272_v34 = vld [vmem:[%s11222_s0 + $0x28c] ss:$14 sps:$4 sm:$0xff]  }
 0x12c   :  { %4751 = vmatmul.mubr.bf16.gmra.mrb[44].mxu0 %v3135_v45  ;;  %5523 = vmatmul.mubr.bf16.gmra.mrb[44].mxu1 %v3135_v45  ;;  %v9227_v45 = vld [vmem:[%s11222_s0 + $0xe8] ss:$14 sps:$4 sm:$0xff]  }
 0x12d   :  { %4760 = vmatprep.mubr.bf16.mxu0 %v3143_v47  ;;  %5532 = vmatprep.mubr.bf16.mxu1 %v3143_v47  ;;  %v628_v47 = vcombine.low %v606_v27, %v620_v28  ;;  %v890_v58 = vrot.slane %v9227_v45, %v9548_v54  ;;  %v1054_v27 = vcombine.low %v1032_v9, %v1046_v10  ;;  %v9263_v28 = vld [vmem:[%s11222_s0 + $0x238] ss:$14 sps:$4 sm:$0xff]   ;;  %v9281_v45 = vld [vmem:[%s11222_s0 + $0x2e0] ss:$14 sps:$4 sm:$0xff]  }
 0x12e   :  { %v1316_v37 = vrot.slane %v9263_v28, %v9548_v54  ;;  %v1529_v53 = vrot.slane %v9281_v45, %v9548_v54  ;;  %v9299_v9 = vld [vmem:[%s11222_s0 + $0x388] ss:$14 sps:$4 sm:$0xff]   ;;  %v9302_v10 = vld [vmem:[%s11222_s0 + $0x3a4] ss:$14 sps:$4 sm:$0xff]   ;;  %v9320_v28 = vld [vmem:[%s11222_s0 + $0x44c] ss:$14 sps:$4 sm:$0xff]  }
 0x12f   :  { %v3060_v55 = vpack.c.bf16 %v699_v49, %v628_v47  ;;  %v913_v5 = vcombine.high %v890_v58, %v904_v59  ;;  %v912_v17 = vcombine.low %v890_v58, %v904_v59 }
 0x130   :  { %v1339_v47 = vcombine.high %v1316_v37, %v1330_v38 }
 0x134   :  { %4761 = vmatmul.mubr.bf16.gmra.mrb[48].mxu0 %v3142_v61  ;;  %5533 = vmatmul.mubr.bf16.gmra.mrb[48].mxu1 %v3142_v61  ;;  %v975_v61 = vrot.slane %v9236_v51, %v9548_v54  ;;  %v1458_v51 = vrot.slane %v9275_v43, %v9548_v54 }
 0x135   :  { %4770 = vmatprep.mubr.bf16.mxu0 %v3150_v63  ;;  %5542 = vmatprep.mubr.bf16.mxu1 %v3150_v63  ;;  %v770_v63 = vcombine.low %v748_v41, %v762_v42  ;;  %v1196_v41 = vcombine.low %v1174_v22, %v1188_v23 }
 0x136   :  { %v984_v6 = vcombine.high %v961_v60, %v975_v61  ;;  %v983_v18 = vcombine.low %v961_v60, %v975_v61  ;;  %v1481_v59 = vcombine.high %v1458_v51, %v1472_v52  ;;  %v9287_v61 = vld [vmem:[%s11222_s0 + $0x318] ss:$14 sps:$4 sm:$0xff]  }
 0x137   :  { %v3067_v7 = vpack.c.bf16 %v841_v4, %v770_v63  ;;  %v9293_v63 = vld [vmem:[%s11222_s0 + $0x350] ss:$14 sps:$4 sm:$0xff]   ;;  %v1600_v3 = vrot.slane %v9287_v61, %v9548_v54 }
 0x138   :  { %v3075_v8 = vpack.c.bf16 %v984_v6, %v913_v5  ;;  %v3074_v21 = vpack.c.bf16 %v983_v18, %v912_v17  ;;  %v1671_v5 = vrot.slane %v9293_v63, %v9548_v54  ;;  %v1685_v6 = vrot.slane %v9296_v0, %v9548_v54 }
 0x139   :  { %v1756_v17 = vrot.slane %v9302_v10, %v9548_v54 }
 0x13a   :  { %v1694_v14 = vcombine.high %v1671_v5, %v1685_v6  ;;  %v1693_v22 = vcombine.low %v1671_v5, %v1685_v6  ;;  %v9353_v5 = vld [vmem:[%s11222_s0 + $0x580] ss:$14 sps:$4 sm:$0xff]   ;;  %v9356_v6 = vld [vmem:[%s11222_s0 + $0x59c] ss:$14 sps:$4 sm:$0xff]  }
 0x13c   :  { %4771 = vmatmul.mubr.bf16.gmra.mrb[52].mxu0 %v3149_v11  ;;  %5543 = vmatmul.mubr.bf16.gmra.mrb[52].mxu1 %v3149_v11  ;;  %v1103_v11 = vrot.slane %v9245_v2, %v9548_v54 }
 0x13d   :  { %4780 = vmatprep.mubr.bf16.mxu0 %v3157_v16  ;;  %5552 = vmatprep.mubr.bf16.mxu1 %v3157_v16  ;;  %v9260_v16 = vld [vmem:[%s11222_s0 + $0x21c] ss:$14 sps:$4 sm:$0xff]  }
 0x13e   :  { %v1126_v20 = vcombine.high %v1103_v11, %v1117_v12  ;;  %v1125_v31 = vcombine.low %v1103_v11, %v1117_v12  ;;  %v9305_v11 = vld [vmem:[%s11222_s0 + $0x3c0] ss:$14 sps:$4 sm:$0xff]   ;;  %v9308_v12 = vld [vmem:[%s11222_s0 + $0x3dc] ss:$14 sps:$4 sm:$0xff]  }
 0x13f   :  { %v1813_v18 = vrot.slane %v9305_v11, %v9548_v54 }
 0x140   :  { %v3081_v35 = vpack.c.bf16 %v1125_v31, %v1054_v27  ;;  %v9317_v27 = vld [vmem:[%s11222_s0 + $0x430] ss:$14 sps:$4 sm:$0xff]  }
 0x144   :  { %4781 = vmatmul.mubr.bf16.gmra.mrb[56].mxu0 %v3156_v25  ;;  %5553 = vmatmul.mubr.bf16.gmra.mrb[56].mxu1 %v3156_v25  ;;  %v1259_v25 = vrot.slane %v9260_v16, %v9548_v54  ;;  %v1742_v16 = vrot.slane %v9299_v9, %v9548_v54 }
 0x145   :  { %4790 = vmatprep.mubr.bf16.mxu0 %v3164_v26  ;;  %5562 = vmatprep.mubr.bf16.mxu1 %v3164_v26  ;;  %v3082_v26 = vpack.c.bf16 %v1126_v20, %v1055_v19  ;;  %v1827_v19 = vrot.slane %v9308_v12, %v9548_v54  ;;  %v2381_v12 = vrot.slane %v9353_v5, %v9548_v54  ;;  %v9205_v5 = vld [vmem:[%s11222_s0 + $0x44] ss:$14 sps:$4 sm:$0x33]  }
 0x146   :  { %v1268_v33 = vcombine.high %v1245_v24, %v1259_v25  ;;  %v1267_v42 = vcombine.low %v1245_v24, %v1259_v25  ;;  %v1765_v23 = vcombine.high %v1742_v16, %v1756_v17  ;;  %v9311_v25 = vld [vmem:[%s11222_s0 + $0x3f8] ss:$14 sps:$4 sm:$0xff]  }
 0x147   :  { %v1836_v24 = vcombine.high %v1813_v18, %v1827_v19  ;;  %v1884_v31 = vrot.slane %v9311_v25, %v9548_v54 }
 0x148   :  { %v3089_v36 = vpack.c.bf16 %v1268_v33, %v1197_v32  ;;  %v3088_v50 = vpack.c.bf16 %v1267_v42, %v1196_v41  ;;  %v1955_v33 = vrot.slane %v9317_v27, %v9548_v54 }
 0x14c   :  { %4791 = vmatmul.mubr.bf16.gmra.mrb[60].mxu0 %v3163_v39  ;;  %5563 = vmatmul.mubr.bf16.gmra.mrb[60].mxu1 %v3163_v39  ;;  %v1387_v39 = vrot.slane %v9269_v30, %v9548_v54  ;;  %v3117_v30 = vpack.c.bf16 %v1836_v24, %v1765_v23 }
 0x14d   :  { %4833 = vmatprep.mubr.bf16.mxu0 %v3061_v40  ;;  %5605 = vmatprep.mubr.bf16.mxu1 %v3061_v40  ;;  %v1401_v40 = vrot.slane %v9272_v34, %v9548_v54  ;;  %v1969_v34 = vrot.slane %v9320_v28, %v9548_v54 }
 0x14f   :  { %v1410_v49 = vcombine.high %v1387_v39, %v1401_v40  ;;  %v1409_v58 = vcombine.low %v1387_v39, %v1401_v40  ;;  %v9329_v39 = vld [vmem:[%s11222_s0 + $0x4a0] ss:$14 sps:$4 sm:$0xff]   ;;  %v9332_v40 = vld [vmem:[%s11222_s0 + $0x4bc] ss:$14 sps:$4 sm:$0xff]   ;;  %v1978_v42 = vcombine.high %v1955_v33, %v1969_v34 }
 0x154   :  { %4834 = vmatmul.mubr.bf16.vlgmr.msra.gmra.mrb[0].mxu0 %v3060_v55  ;;  %5606 = vmatmul.mubr.bf16.vlgmr.msra.gmra.mrb[0].mxu1 %v3060_v55  ;;  %v1543_v55 = vrot.slane %v9284_v46, %v9548_v54  ;;  %v2097_v46 = vrot.slane %v9329_v39, %v9548_v54 }
 0x155   :  { %4995 = vmatpush1.bf16.msra.mxu0 %v9209_v56  ;;  %5767 = vmatpush1.bf16.msra.mxu1 %v9212_v57  ;;  %v3096_v56 = vpack.c.bf16 %v1410_v49, %v1339_v47  ;;  %v1338_v57 = vcombine.low %v1316_v37, %v1330_v38  ;;  %v9323_v37 = vld [vmem:[%s11222_s0 + $0x468] ss:$14 sps:$4 sm:$0xff]   ;;  %v9326_v38 = vld [vmem:[%s11222_s0 + $0x484] ss:$14 sps:$4 sm:$0xff]   ;;  %v2111_v47 = vrot.slane %v9332_v40, %v9548_v54 }
 0x156   :  { %4843 = vmatprep.mubr.bf16.mxu0 %v3068_v62  ;;  %5615 = vmatprep.mubr.bf16.mxu1 %v3068_v62  ;;  %v1552_v60 = vcombine.high %v1529_v53, %v1543_v55  ;;  %v9290_v62 = vld [vmem:[%s11222_s0 + $0x334] ss:$14 sps:$4 sm:$0xff]   ;;  %v2026_v44 = vrot.slane %v9323_v37, %v9548_v54  ;;  %v2040_v45 = vrot.slane %v9326_v38, %v9548_v54 }
 0x157   :  { %v3095_v1 = vpack.c.bf16 %v1409_v58, %v1338_v57  ;;  %v1614_v4 = vrot.slane %v9290_v62, %v9548_v54  ;;  %v9341_v57 = vld [vmem:[%s11222_s0 + $0x510] ss:$14 sps:$4 sm:$0xff]   ;;  %v9344_v58 = vld [vmem:[%s11222_s0 + $0x52c] ss:$14 sps:$4 sm:$0xff]  }
 0x158   :  { %v3103_v2 = vpack.c.bf16 %v1552_v60, %v1481_v59  ;;  %v2239_v63 = vrot.slane %v9341_v57, %v9548_v54  ;;  %v2253_v0 = vrot.slane %v9344_v58, %v9548_v54 }
 0x159   :  { %v1623_v13 = vcombine.high %v1600_v3, %v1614_v4 }
 0x15b   :  { %v3110_v20 = vpack.c.bf16 %v1694_v14, %v1623_v13  ;;  %v2395_v13 = vrot.slane %v9356_v6, %v9548_v54  ;;  %v9208_v6 = vld [vmem:[%s11222_s0 + $0x60] ss:$14 sps:$4 sm:$0x33]  }
 0x15c   :  { %4844 = vmatmul.mubr.bf16.gmra.mrb[4].mxu0 %v3067_v7  ;;  %5616 = vmatmul.mubr.bf16.gmra.mrb[4].mxu1 %v3067_v7  ;;  %v1480_v7 = vcombine.low %v1458_v51, %v1472_v52  ;;  %v1977_v51 = vcombine.low %v1955_v33, %v1969_v34  ;;  %v2049_v52 = vcombine.high %v2026_v44, %v2040_v45  ;;  %v9377_v33 = vld [vmem:[%s11222_s0 + $0x660] ss:$14 sps:$4 sm:$0xff]   ;;  %v9380_v34 = vld [vmem:[%s11222_s0 + $0x67c] ss:$14 sps:$4 sm:$0xff]  }
 0x15d   :  { %4853 = vmatprep.mubr.bf16.mxu0 %v3075_v8  ;;  %5625 = vmatprep.mubr.bf16.mxu1 %v3075_v8  ;;  %v1551_v8 = vcombine.low %v1529_v53, %v1543_v55  ;;  %v2120_v53 = vcombine.high %v2097_v46, %v2111_v47  ;;  %v9335_v55 = vld [vmem:[%s11222_s0 + $0x4d8] ss:$14 sps:$4 sm:$0xff]  }
 0x15e   :  { %v2168_v61 = vrot.slane %v9335_v55, %v9548_v54 }
 0x15f   :  { %v3102_v15 = vpack.c.bf16 %v1551_v8, %v1480_v7  ;;  %v3131_v60 = vpack.c.bf16 %v2120_v53, %v2049_v52  ;;  %v2262_v8 = vcombine.high %v2239_v63, %v2253_v0  ;;  %v9389_v52 = vld [vmem:[%s11222_s0 + $0x6d0] ss:$14 sps:$4 sm:$0xff]   ;;  %v9392_v53 = vld [vmem:[%s11222_s0 + $0x6ec] ss:$14 sps:$4 sm:$0xff]  }
 0x164   :  { %4854 = vmatmul.mubr.bf16.gmra.mrb[8].mxu0 %v3074_v21  ;;  %5626 = vmatmul.mubr.bf16.gmra.mrb[8].mxu1 %v3074_v21  ;;  %v1622_v21 = vcombine.low %v1600_v3, %v1614_v4  ;;  %v9347_v3 = vld [vmem:[%s11222_s0 + $0x548] ss:$14 sps:$4 sm:$0xff]   ;;  %v9350_v4 = vld [vmem:[%s11222_s0 + $0x564] ss:$14 sps:$4 sm:$0xff]  }
 0x165   :  { %4863 = vmatprep.mubr.bf16.mxu0 %v3082_v26  ;;  %5635 = vmatprep.mubr.bf16.mxu1 %v3082_v26  ;;  %v9314_v26 = vld [vmem:[%s11222_s0 + $0x414] ss:$14 sps:$4 sm:$0xff]   ;;  %v2310_v10 = vrot.slane %v9347_v3, %v9548_v54  ;;  %v2324_v11 = vrot.slane %v9350_v4, %v9548_v54  ;;  %v9199_v3 = vld [vmem:[%s11222_s0 + $0xc] ss:$14 sps:$4 sm:$0x33]  }
 0x166   :  { %v3109_v29 = vpack.c.bf16 %v1693_v22, %v1622_v21  ;;  %v1898_v32 = vrot.slane %v9314_v26, %v9548_v54  ;;  %v9365_v21 = vld [vmem:[%s11222_s0 + $0x5f0] ss:$14 sps:$4 sm:$0xff]   ;;  %v9368_v22 = vld [vmem:[%s11222_s0 + $0x60c] ss:$14 sps:$4 sm:$0xff]  }
 0x167   :  { %v2523_v27 = vrot.slane %v9365_v21, %v9548_v54  ;;  %v2537_v28 = vrot.slane %v9368_v22, %v9548_v54  ;;  %v9202_v4 = vld [vmem:[%s11222_s0 + $0x28] ss:$14 sps:$4 sm:$0x33]   ;;  %v9229_v22 = vld [vmem:[%s11222_s0 + $0xec] ss:$14 sps:$4 sm:$0x33]  }
 0x168   :  { %v1907_v41 = vcombine.high %v1884_v31, %v1898_v32 }
 0x169   :  { %v2546_v37 = vcombine.high %v2523_v27, %v2537_v28 }
 0x16a   :  { %v3124_v49 = vpack.c.bf16 %v1978_v42, %v1907_v41  ;;  %v2665_v41 = vrot.slane %v9377_v33, %v9548_v54  ;;  %v2679_v42 = vrot.slane %v9380_v34, %v9548_v54  ;;  %v9401_v33 = vld [vmem:[%s11225_s3 + $0xc8] sm:$0xff]  }
 0x16c   :  { %4864 = vmatmul.mubr.bf16.gmra.mrb[12].mxu0 %v3081_v35  ;;  %5636 = vmatmul.mubr.bf16.gmra.mrb[12].mxu1 %v3081_v35  ;;  %v1764_v35 = vcombine.low %v1742_v16, %v1756_v17  ;;  %v2261_v16 = vcombine.low %v2239_v63, %v2253_v0  ;;  %v2333_v17 = vcombine.high %v2310_v10, %v2324_v11 }
 0x16d   :  { %4873 = vmatprep.mubr.bf16.mxu0 %v3089_v36  ;;  %5645 = vmatprep.mubr.bf16.mxu1 %v3089_v36  ;;  %v1835_v36 = vcombine.low %v1813_v18, %v1827_v19  ;;  %v2404_v18 = vcombine.high %v2381_v12, %v2395_v13  ;;  %v9359_v19 = vld [vmem:[%s11222_s0 + $0x5b8] ss:$14 sps:$4 sm:$0xff]  }
 0x16e   :  { %v2452_v25 = vrot.slane %v9359_v19, %v9548_v54  ;;  %v9226_v19 = vld [vmem:[%s11222_s0 + $0xd0] ss:$14 sps:$4 sm:$0x33]  }
 0x16f   :  { %v3116_v43 = vpack.c.bf16 %v1835_v36, %v1764_v35  ;;  %v3145_v24 = vpack.c.bf16 %v2404_v18, %v2333_v17  ;;  %v9395_v35 = vld [vmem:[%s11225_s3 + $0x40] sm:$0xff]  }
 0x170   :  { %7723 = vmatprep.subr.bf16.mxu0 %v9395_v35  ;;  %v9220_v17 = vld [vmem:[%s11222_s0 + $0x98] ss:$14 sps:$4 sm:$0x33]   ;;  %v9223_v18 = vld [vmem:[%s11222_s0 + $0xb4] ss:$14 sps:$4 sm:$0x33]  }
 0x174   :  { %4874 = vmatmul.mubr.bf16.gmra.mrb[16].mxu0 %v3088_v50  ;;  %5646 = vmatmul.mubr.bf16.gmra.mrb[16].mxu1 %v3088_v50  ;;  %v1906_v50 = vcombine.low %v1884_v31, %v1898_v32  ;;  %v9371_v31 = vld [vmem:[%s11222_s0 + $0x628] ss:$14 sps:$4 sm:$0xff]   ;;  %v9374_v32 = vld [vmem:[%s11222_s0 + $0x644] ss:$14 sps:$4 sm:$0xff]  }
 0x175   :  { %4883 = vmatprep.mubr.bf16.mxu0 %v3096_v56  ;;  %5655 = vmatprep.mubr.bf16.mxu1 %v3096_v56  ;;  %v9338_v56 = vld [vmem:[%s11222_s0 + $0x4f4] ss:$14 sps:$4 sm:$0xff]   ;;  %v2594_v39 = vrot.slane %v9371_v31, %v9548_v54  ;;  %v2608_v40 = vrot.slane %v9374_v32, %v9548_v54  ;;  %v9238_v31 = vld [vmem:[%s11222_s0 + $0x140] ss:$14 sps:$4 sm:$0x33]  }
 0x176   :  { %v3123_v59 = vpack.c.bf16 %v1977_v51, %v1906_v50  ;;  %v2182_v62 = vrot.slane %v9338_v56, %v9548_v54  ;;  %v9397_v50 = vld [vmem:[%s11225_s3 + $0xc0] sm:$0xff]   ;;  %v9399_v32 = vld [vmem:[%s11225_s3 + $0x48] sm:$0xff]  }
 0x177   :  { %v9386_v51 = vld [vmem:[%s11222_s0 + $0x6b4] ss:$14 sps:$4 sm:$0xff]   ;;  %7835 = vmatprep.subr.bf16.mxu1 %v9397_v50 }
 0x178   :  { %v2191_v7 = vcombine.high %v2168_v61, %v2182_v62  ;;  %v2750_v58 = vrot.slane %v9386_v51, %v9548_v54 }
 0x17a   :  { %v3138_v14 = vpack.c.bf16 %v2262_v8, %v2191_v7 }
 0x17c   :  { %4884 = vmatmul.mubr.bf16.gmra.mrb[20].mxu0 %v3095_v1  ;;  %5656 = vmatmul.mubr.bf16.gmra.mrb[20].mxu1 %v3095_v1  ;;  %v2048_v1 = vcombine.low %v2026_v44, %v2040_v45  ;;  %v2545_v45 = vcombine.low %v2523_v27, %v2537_v28  ;;  %v9232_v27 = vld [vmem:[%s11222_s0 + $0x108] ss:$14 sps:$4 sm:$0x33]   ;;  %v9235_v28 = vld [vmem:[%s11222_s0 + $0x124] ss:$14 sps:$4 sm:$0x33]  }
 0x17d   :  { %4893 = vmatprep.mubr.bf16.mxu0 %v3103_v2  ;;  %5665 = vmatprep.mubr.bf16.mxu1 %v3103_v2  ;;  %v2119_v2 = vcombine.low %v2097_v46, %v2111_v47  ;;  %v2617_v46 = vcombine.high %v2594_v39, %v2608_v40  ;;  %v2688_v47 = vcombine.high %v2665_v41, %v2679_v42 }
 0x17f   :  { %v3130_v9 = vpack.c.bf16 %v2119_v2, %v2048_v1  ;;  %v3159_v56 = vpack.c.bf16 %v2688_v47, %v2617_v46  ;;  %v9404_v46 = vld [vmem:[%s11225_s3 + $0x10] sm:$0xff]  }
 0x180   :  { %v9406_v47 = vld [vmem:[%s11225_s3 + $0x90] sm:$0xff]  }
 0x184   :  { %4894 = vmatmul.mubr.bf16.gmra.mrb[24].mxu0 %v3102_v15  ;;  %5666 = vmatmul.mubr.bf16.gmra.mrb[24].mxu1 %v3102_v15  ;;  %v2190_v15 = vcombine.low %v2168_v61, %v2182_v62  ;;  %v2616_v61 = vcombine.low %v2594_v39, %v2608_v40  ;;  %v2687_v62 = vcombine.low %v2665_v41, %v2679_v42  ;;  %v9403_v42 = vld [vmem:[%s11225_s3 + $0x50] sm:$0xff]  }
 0x185   :  { %4903 = vmatprep.mubr.bf16.mxu0 %v3110_v20  ;;  %5675 = vmatprep.mubr.bf16.mxu1 %v3110_v20  ;;  %v9362_v20 = vld [vmem:[%s11222_s0 + $0x5d4] ss:$14 sps:$4 sm:$0xff]   ;;  %v911_v39 = vrot.slane %v9232_v27, %v9548_v54  ;;  %v968_v40 = vrot.slane %v9235_v28, %v9548_v54  ;;  %v982_v41 = vrot.slane %v9238_v31, %v9548_v54  ;;  %v9423_v28 = vld [vmem:[%s11225_s3 + $0x78] sm:$0xff]  }
 0x186   :  { %v3137_v23 = vpack.c.bf16 %v2261_v16, %v2190_v15  ;;  %v2466_v26 = vrot.slane %v9362_v20, %v9548_v54  ;;  %v3158_v1 = vpack.c.bf16 %v2687_v62, %v2616_v61  ;;  %v9217_v16 = vld [vmem:[%s11222_s0 + $0x7c] ss:$14 sps:$4 sm:$0x33]   ;;  %v9479_v20 = vmov 0   ;;  %v9413_v61 = vld [vmem:[%s11225_s3 + $0xe0] sm:$0xff]  }
 0x187   :  { %v985_v51 = vcombine.low %v968_v40, %v982_v41  ;;  %v9274_v31 = vld [vmem:[%s11222_s0 + $0x290] ss:$14 sps:$4 sm:$0x33]   ;;  %v9280_v40 = vld [vmem:[%s11222_s0 + $0x2c8] ss:$14 sps:$4 sm:$0x33]  }
 0x188   :  { %v2475_v36 = vcombine.high %v2452_v25, %v2466_v26  ;;  %v2474_v44 = vcombine.low %v2452_v25, %v2466_v26  ;;  %v826_v25 = vrot.slane %v9223_v18, %v9548_v54  ;;  %v840_v26 = vrot.slane %v9226_v19, %v9548_v54  ;;  %v9419_v18 = vld [vmem:[%s11225_s3 + $0x70] sm:$0xff]  }
 0x189   :  { %v9421_v19 = vld [vmem:[%s11225_s3 + $0xf0] sm:$0xff]  }
 0x18a   :  { %v3151_v55 = vpack.c.bf16 %v2545_v45, %v2474_v44  ;;  %v843_v35 = vcombine.low %v826_v25, %v840_v26  ;;  %v9241_v45 = vld [vmem:[%s11222_s0 + $0x15c] ss:$14 sps:$4 sm:$0x33]   ;;  %v9268_v25 = vld [vmem:[%s11222_s0 + $0x258] ss:$14 sps:$4 sm:$0x33]  }
 0x18b   :  { %v1039_v62 = vrot.slane %v9241_v45, %v9548_v54  ;;  %v9283_v41 = vld [vmem:[%s11222_s0 + $0x2e4] ss:$14 sps:$4 sm:$0x33]  }
 0x18c   :  { %4904 = vmatmul.mubr.bf16.gmra.mrb[28].mxu0 %v3109_v29  ;;  %5676 = vmatmul.mubr.bf16.gmra.mrb[28].mxu1 %v3109_v29  ;;  %v2332_v29 = vcombine.low %v2310_v10, %v2324_v11  ;;  %v627_v10 = vrot.slane %v9202_v4, %v9548_v54  ;;  %v684_v11 = vrot.slane %v9205_v5, %v9548_v54  ;;  %v9259_v4 = vld [vmem:[%s11222_s0 + $0x204] ss:$14 sps:$4 sm:$0x33]  }
 0x18d   :  { %4913 = vmatprep.mubr.bf16.mxu0 %v3117_v30  ;;  %5685 = vmatprep.mubr.bf16.mxu1 %v3117_v30  ;;  %v2403_v30 = vcombine.low %v2381_v12, %v2395_v13  ;;  %v698_v12 = vrot.slane %v9208_v6, %v9548_v54  ;;  %v9412_v5 = vld [vmem:[%s11225_s3 + $0x20] sm:$0xff]  }
 0x18e   :  { %v9414_v6 = vld [vmem:[%s11225_s3 + $0xa0] sm:$0xff]  }
 0x18f   :  { %v3144_v38 = vpack.c.bf16 %v2403_v30, %v2332_v29  ;;  %v701_v15 = vcombine.low %v684_v11, %v698_v12  ;;  %v9396_v29 = vld [vmem:[%s11225_s3] sm:$0xff]  }
 0x190   :  { %v9398_v30 = vld [vmem:[%s11225_s3 + $0x80] sm:$0xff]  }
 0x194   :  { %4914 = vmatmul.mubr.bf16.gmra.mrb[32].mxu0 %v3116_v43  ;;  %5686 = vmatmul.mubr.bf16.gmra.mrb[32].mxu1 %v3116_v43  ;;  %v3152_v43 = vpack.c.bf16 %v2546_v37, %v2475_v36  ;;  %v897_v36 = vrot.slane %v9229_v22, %v9548_v54  ;;  %v9400_v37 = vld [vmem:[%s11225_s3 + $0x8] sm:$0xff]  }
 0x195   :  { %4923 = vmatprep.mubr.bf16.mxu0 %v3124_v49  ;;  %5695 = vmatprep.mubr.bf16.mxu1 %v3124_v49  ;;  %v9383_v49 = vld [vmem:[%s11222_s0 + $0x698] ss:$14 sps:$4 sm:$0xff]   ;;  %v9265_v22 = vld [vmem:[%s11222_s0 + $0x23c] ss:$14 sps:$4 sm:$0x33]  }
 0x196   :  { %v2736_v57 = vrot.slane %v9383_v49, %v9548_v54  ;;  %v9244_v49 = vld [vmem:[%s11222_s0 + $0x178] ss:$14 sps:$4 sm:$0x33]   ;;  %v914_v50 = vcombine.low %v897_v36, %v911_v39  ;;  %v1337_v36 = vrot.slane %v9268_v25, %v9548_v54  ;;  %v9277_v39 = vld [vmem:[%s11222_s0 + $0x2ac] ss:$14 sps:$4 sm:$0x33]  }
 0x197   :  { %v1465_v45 = vrot.slane %v9277_v39, %v9548_v54  ;;  %v9334_v25 = vld [vmem:[%s11222_s0 + $0x4c0] ss:$14 sps:$4 sm:$0x33]  }
 0x198   :  { %v2759_v63 = vcombine.high %v2736_v57, %v2750_v58  ;;  %v2758_v7 = vcombine.low %v2736_v57, %v2750_v58  ;;  %v9408_v57 = vld [vmem:[%s11225_s3 + $0x18] sm:$0xff]  }
 0x199   :  { %v9410_v58 = vld [vmem:[%s11225_s3 + $0x98] sm:$0xff]  }
 0x19c   :  { %4924 = vmatmul.mubr.bf16.gmra.mrb[36].mxu0 %v3123_v59  ;;  %5696 = vmatmul.mubr.bf16.gmra.mrb[36].mxu1 %v3123_v59  ;;  %v2807_v59 = vrot.slane %v9389_v52, %v9548_v54  ;;  %v9407_v52 = vld [vmem:[%s11225_s3 + $0x58] sm:$0xff]  }
 0x19d   :  { %4933 = vmatprep.mubr.bf16.mxu0 %v3131_v60  ;;  %5705 = vmatprep.mubr.bf16.mxu1 %v3131_v60  ;;  %v2821_v60 = vrot.slane %v9392_v53, %v9548_v54  ;;  %v9409_v53 = vld [vmem:[%s11225_s3 + $0xd8] sm:$0xff]  }
 0x19f   :  { %v2830_v0 = vcombine.high %v2807_v59, %v2821_v60  ;;  %v2829_v8 = vcombine.low %v2807_v59, %v2821_v60  ;;  %v3076_v59 = vpack.c.bf16 %v985_v51, %v914_v50  ;;  %v9411_v60 = vld [vmem:[%s11225_s3 + $0x60] sm:$0xff]   ;;  %v9289_v51 = vld [vmem:[%s11222_s0 + $0x31c] ss:$14 sps:$4 sm:$0x33]  }
 0x1a1   :  { %v3166_v2 = vpack.c.bf16 %v2830_v0, %v2759_v63  ;;  %v3165_v13 = vpack.c.bf16 %v2829_v8, %v2758_v7  ;;  %v1053_v63 = vrot.slane %v9244_v49, %v9548_v54  ;;  %v9262_v7 = vld [vmem:[%s11222_s0 + $0x220] ss:$14 sps:$4 sm:$0x33]  }
 0x1a2   :  { %v9415_v8 = vld [vmem:[%s11225_s3 + $0x68] sm:$0xff]  }
 0x1a4   :  { %4934 = vmatmul.mubr.bf16.gmra.mrb[40].mxu0 %v3130_v9  ;;  %5706 = vmatmul.mubr.bf16.gmra.mrb[40].mxu1 %v3130_v9  ;;  %v613_v9 = vrot.slane %v9199_v3, %v9548_v54  ;;  %v9256_v3 = vld [vmem:[%s11222_s0 + $0x1e8] ss:$14 sps:$4 sm:$0x33]  }
 0x1a5   :  { %4943 = vmatprep.mubr.bf16.mxu0 %v3138_v14  ;;  %5715 = vmatprep.mubr.bf16.mxu1 %v3138_v14 }
 0x1a6   :  { %v630_v14 = vcombine.low %v613_v9, %v627_v10  ;;  %v9417_v9 = vld [vmem:[%s11225_s3 + $0xe8] sm:$0xff]   ;;  %v1056_v10 = vcombine.low %v1039_v62, %v1053_v63 }
 0x1a7   :  { %v9301_v63 = vld [vmem:[%s11222_s0 + $0x38c] ss:$14 sps:$4 sm:$0x33]  }
 0x1a8   :  { %v3062_v21 = vpack.c.bf16 %v701_v15, %v630_v14  ;;  %v9418_v14 = vld [vmem:[%s11225_s3 + $0xa8] sm:$0xff]   ;;  %v1195_v15 = vrot.slane %v9256_v3, %v9548_v54 }
 0x1ac   :  { %4944 = vmatmul.mubr.bf16.gmra.mrb[44].mxu0 %v3137_v23  ;;  %5716 = vmatmul.mubr.bf16.gmra.mrb[44].mxu1 %v3137_v23  ;;  %v755_v23 = vrot.slane %v9217_v16, %v9548_v54  ;;  %v1252_v16 = vrot.slane %v9259_v4, %v9548_v54 }
 0x1ad   :  { %4953 = vmatprep.mubr.bf16.mxu0 %v3145_v24  ;;  %5725 = vmatprep.mubr.bf16.mxu1 %v3145_v24  ;;  %v769_v24 = vrot.slane %v9220_v17, %v9548_v54  ;;  %v1266_v17 = vrot.slane %v9262_v7, %v9548_v54 }
 0x1af   :  { %v772_v34 = vcombine.low %v755_v23, %v769_v24  ;;  %v9420_v23 = vld [vmem:[%s11225_s3 + $0x30] sm:$0xff]   ;;  %v1269_v27 = vcombine.low %v1252_v16, %v1266_v17 }
 0x1b0   :  { %v9422_v24 = vld [vmem:[%s11225_s3 + $0xb0] sm:$0xff]  }
 0x1b1   :  { %v3069_v44 = vpack.c.bf16 %v843_v35, %v772_v34  ;;  %v1323_v35 = vrot.slane %v9265_v22, %v9548_v54  ;;  %v9325_v22 = vld [vmem:[%s11222_s0 + $0x46c] ss:$14 sps:$4 sm:$0x33]  }
 0x1b4   :  { %4954 = vmatmul.mubr.bf16.gmra.mrb[48].mxu0 %v3144_v38  ;;  %5726 = vmatmul.mubr.bf16.gmra.mrb[48].mxu1 %v3144_v38  ;;  %v9402_v38 = vld [vmem:[%s11225_s3 + $0x88] sm:$0xff]  }
 0x1b5   :  { %4963 = vmatprep.mubr.bf16.mxu0 %v3152_v43  ;;  %5735 = vmatprep.mubr.bf16.mxu1 %v3152_v43  ;;  %v9405_v43 = vld [vmem:[%s11225_s3 + $0xd0] sm:$0xff]  }
 0x1bc   :  { %4964 = vmatmul.mubr.bf16.gmra.mrb[52].mxu0 %v3151_v55  ;;  %5736 = vmatmul.mubr.bf16.gmra.mrb[52].mxu1 %v3151_v55  ;;  %v9247_v55 = vld [vmem:[%s11222_s0 + $0x194] ss:$14 sps:$4 sm:$0x33]  }
 0x1bd   :  { %4973 = vmatprep.mubr.bf16.mxu0 %v3159_v56  ;;  %5745 = vmatprep.mubr.bf16.mxu1 %v3159_v56  ;;  %v9250_v56 = vld [vmem:[%s11222_s0 + $0x1b0] ss:$14 sps:$4 sm:$0x33]   ;;  %v1110_v0 = vrot.slane %v9247_v55, %v9548_v54 }
 0x1c4   :  { %4974 = vmatmul.mubr.bf16.gmra.mrb[56].mxu0 %v3158_v1  ;;  %5746 = vmatmul.mubr.bf16.gmra.mrb[56].mxu1 %v3158_v1  ;;  %v1124_v1 = vrot.slane %v9250_v56, %v9548_v54  ;;  %v9295_v56 = vld [vmem:[%s11222_s0 + $0x354] ss:$14 sps:$4 sm:$0x33]  }
 0x1c5   :  { %4983 = vmatprep.mubr.bf16.mxu0 %v3166_v2  ;;  %5755 = vmatprep.mubr.bf16.mxu1 %v3166_v2  ;;  %v9253_v2 = vld [vmem:[%s11222_s0 + $0x1cc] ss:$14 sps:$4 sm:$0x33]  }
 0x1c6   :  { %v1127_v11 = vcombine.low %v1110_v0, %v1124_v1  ;;  %v1181_v12 = vrot.slane %v9253_v2, %v9548_v54  ;;  %v9304_v0 = vld [vmem:[%s11222_s0 + $0x3a8] ss:$14 sps:$4 sm:$0x33]   ;;  %v9307_v1 = vld [vmem:[%s11222_s0 + $0x3c4] ss:$14 sps:$4 sm:$0x33]  }
 0x1c7   :  { %v9310_v2 = vld [vmem:[%s11222_s0 + $0x3e0] ss:$14 sps:$4 sm:$0x33]   ;;  %v1820_v7 = vrot.slane %v9307_v1, %v9548_v54 }
 0x1c8   :  { %v1198_v26 = vcombine.low %v1181_v12, %v1195_v15  ;;  %v9322_v15 = vld [vmem:[%s11222_s0 + $0x450] ss:$14 sps:$4 sm:$0x33]  }
 0x1ca   :  { %v3090_v34 = vpack.c.bf16 %v1269_v27, %v1198_v26 }
 0x1cc   :  { %4984 = vmatmul.mubr.bf16.gmra.mrb[60].mxu0 %v3165_v13  ;;  %5756 = vmatmul.mubr.bf16.gmra.mrb[60].mxu1 %v3165_v13  ;;  %v9416_v13 = vld [vmem:[%s11225_s3 + $0x28] sm:$0xff]  }
 0x1cd   :  { %5026 = vmatprep.mubr.bf16.mxu0 %v9479_v20  ;;  %5798 = vmatprep.mubr.bf16.mxu1 %v9479_v20 }
 0x1d4   :  { %7624 = vmatmul.mubr.msk.bf16.vlgmr.msra.gmra.mrb[0].mxu0 %vm4366_vm0, %v3062_v21  ;;  %7640 = vmatmul.mubr.msk.bf16.vlgmr.msra.gmra.mrb[0].mxu1 %vm4366_vm0, %v3062_v21  ;;  %v3083_v21 = vpack.c.bf16 %v1127_v11, %v1056_v10  ;;  %v9313_v10 = vld [vmem:[%s11222_s0 + $0x3fc] ss:$14 sps:$4 sm:$0x33]   ;;  %v9316_v11 = vld [vmem:[%s11222_s0 + $0x418] ss:$14 sps:$4 sm:$0x33]  }
 0x1d5   :  { %5036 = vmatprep.mubr.bf16.mxu0 %v9479_v20  ;;  %5808 = vmatprep.mubr.bf16.mxu1 %v9479_v20  ;;  %v1891_v17 = vrot.slane %v9313_v10, %v9548_v54 }
 0x1d6   :  { %7724 = vmatpush3.bf16.msra.mxu0 %v9396_v29  ;;  %7836 = vmatpush3.bf16.msra.mxu1 %v9398_v30  ;;  %v9425_v29 = vld [vmem:[%s11225_s3 + $0xf8] sm:$0xff]   ;;  %v9271_v30 = vld [vmem:[%s11222_s0 + $0x274] ss:$14 sps:$4 sm:$0x33]  }
 0x1d7   :  { %7725 = vmatprep.subr.bf16.mxu0 %v9399_v32  ;;  %7837 = vmatprep.subr.bf16.mxu1 %v9401_v33  ;;  %v9424_v32 = vld [vmem:[%s11225_s3 + $0x38] sm:$0xff]  }
 0x1d8   :  { %v9426_v33 = vld [vmem:[%s11225_s3 + $0xb8] sm:$0xff]  }
 0x1da   :  { %7726 = vmatpush3.bf16.msra.mxu0 %v9400_v37  ;;  %7838 = vmatpush3.bf16.msra.mxu1 %v9402_v38  ;;  %v1394_v37 = vrot.slane %v9271_v30, %v9548_v54  ;;  %v1408_v38 = vrot.slane %v9274_v31, %v9548_v54  ;;  %v2118_v31 = vrot.slane %v9334_v25, %v9548_v54 }
 0x1db   :  { %7727 = vmatprep.subr.bf16.mxu0 %v9403_v42  ;;  %7839 = vmatprep.subr.bf16.mxu1 %v9405_v43  ;;  %v9286_v42 = vld [vmem:[%s11222_s0 + $0x300] ss:$14 sps:$4 sm:$0x33]   ;;  %v1340_v43 = vcombine.low %v1323_v35, %v1337_v36 }
 0x1dc   :  { %7625 = vmatmul.mubr.msk.bf16.gmra.mrb[4].mxu0 %vm4366_vm0, %v3069_v44  ;;  %7641 = vmatmul.mubr.msk.bf16.gmra.mrb[4].mxu1 %vm4366_vm0, %v3069_v44  ;;  %v1411_v44 = vcombine.low %v1394_v37, %v1408_v38  ;;  %v1550_v49 = vrot.slane %v9286_v42, %v9548_v54  ;;  %v9343_v37 = vld [vmem:[%s11222_s0 + $0x514] ss:$14 sps:$4 sm:$0x33]   ;;  %v9346_v38 = vld [vmem:[%s11222_s0 + $0x530] ss:$14 sps:$4 sm:$0x33]  }
 0x1dd   :  { %5046 = vmatprep.mubr.bf16.mxu0 %v9479_v20  ;;  %5818 = vmatprep.mubr.bf16.mxu1 %v9479_v20  ;;  %v2246_v42 = vrot.slane %v9343_v37, %v9548_v54 }
 0x1de   :  { %7728 = vmatpush3.bf16.msra.mxu0 %v9404_v46  ;;  %7840 = vmatpush3.bf16.msra.mxu1 %v9406_v47  ;;  %v1479_v46 = vrot.slane %v9280_v40, %v9548_v54  ;;  %v1536_v47 = vrot.slane %v9283_v41, %v9548_v54  ;;  %v3097_v50 = vpack.c.bf16 %v1411_v44, %v1340_v43  ;;  %v9349_v44 = vld [vmem:[%s11222_s0 + $0x54c] ss:$14 sps:$4 sm:$0x33]  }
 0x1df   :  { %7729 = vmatprep.subr.bf16.mxu0 %v9407_v52  ;;  %7841 = vmatprep.subr.bf16.mxu1 %v9409_v53  ;;  %v9292_v52 = vld [vmem:[%s11222_s0 + $0x338] ss:$14 sps:$4 sm:$0x33]   ;;  %v2260_v43 = vrot.slane %v9346_v38, %v9548_v54 }
 0x1e0   :  { %v1482_v53 = vcombine.low %v1465_v45, %v1479_v46  ;;  %v1553_v55 = vcombine.low %v1536_v47, %v1550_v49  ;;  %v9352_v45 = vld [vmem:[%s11222_s0 + $0x568] ss:$14 sps:$4 sm:$0x33]   ;;  %v9355_v46 = vld [vmem:[%s11222_s0 + $0x584] ss:$14 sps:$4 sm:$0x33]  }
 0x1e1   :  { %v9358_v47 = vld [vmem:[%s11222_s0 + $0x5a0] ss:$14 sps:$4 sm:$0x33]  }
 0x1e2   :  { %7730 = vmatpush3.bf16.msra.mxu0 %v9408_v57  ;;  %7842 = vmatpush3.bf16.msra.mxu1 %v9410_v58  ;;  %v9298_v57 = vld [vmem:[%s11222_s0 + $0x370] ss:$14 sps:$4 sm:$0x33]   ;;  %v3104_v58 = vpack.c.bf16 %v1553_v55, %v1482_v53  ;;  %v2388_v53 = vrot.slane %v9355_v46, %v9548_v54  ;;  %v2402_v55 = vrot.slane %v9358_v47, %v9548_v54 }
 0x1e3   :  { %7731 = vmatprep.subr.bf16.mxu0 %v9411_v60  ;;  %7843 = vmatprep.subr.bf16.mxu1 %v9413_v61  ;;  %v1621_v60 = vrot.slane %v9292_v52, %v9548_v54  ;;  %v1678_v61 = vrot.slane %v9295_v56, %v9548_v54  ;;  %v1692_v62 = vrot.slane %v9298_v57, %v9548_v54  ;;  %v9361_v57 = vld [vmem:[%s11222_s0 + $0x5bc] ss:$14 sps:$4 sm:$0x33]  }
 0x1e4   :  { %7626 = vmatmul.mubr.msk.bf16.gmra.mrb[8].mxu0 %vm4366_vm0, %v3076_v59  ;;  %7642 = vmatmul.mubr.msk.bf16.gmra.mrb[8].mxu1 %vm4366_vm0, %v3076_v59  ;;  %v1607_v59 = vrot.slane %v9289_v51, %v9548_v54  ;;  %v2317_v51 = vrot.slane %v9349_v44, %v9548_v54  ;;  %v2331_v52 = vrot.slane %v9352_v45, %v9548_v54 }
 0x1e5   :  { %5056 = vmatprep.mubr.bf16.mxu0 %v9479_v20  ;;  %5828 = vmatprep.mubr.bf16.mxu1 %v9479_v20  ;;  %v1695_v4 = vcombine.low %v1678_v61, %v1692_v62  ;;  %v9367_v61 = vld [vmem:[%s11222_s0 + $0x5f4] ss:$14 sps:$4 sm:$0x33]   ;;  %v9370_v62 = vld [vmem:[%s11222_s0 + $0x610] ss:$14 sps:$4 sm:$0x33]  }
 0x1e6   :  { %7732 = vmatpush3.bf16.msra.mxu0 %v9412_v5  ;;  %7844 = vmatpush3.bf16.msra.mxu1 %v9414_v6  ;;  %v1624_v3 = vcombine.low %v1607_v59, %v1621_v60  ;;  %v1749_v5 = vrot.slane %v9301_v63, %v9548_v54  ;;  %v1763_v6 = vrot.slane %v9304_v0, %v9548_v54 }
 0x1e7   :  { %7733 = vmatprep.subr.bf16.mxu0 %v9415_v8  ;;  %7845 = vmatprep.subr.bf16.mxu1 %v9417_v9  ;;  %v1834_v8 = vrot.slane %v9310_v2, %v9548_v54  ;;  %v2334_v59 = vcombine.low %v2317_v51, %v2331_v52  ;;  %v2405_v60 = vcombine.low %v2388_v53, %v2402_v55  ;;  %v6768_v51 = vld [vmem:[%s11227_s5] sm:$0xff]  ;;  %v6769_v52 = vld [vmem:[%s11227_s5 + $0x8] sm:$0xff] }
 0x1e8   :  { %v3111_v9 = vpack.c.bf16 %v1695_v4, %v1624_v3  ;;  %v1766_v12 = vcombine.low %v1749_v5, %v1763_v6  ;;  %v2459_v0 = vrot.slane %v9361_v57, %v9548_v54  ;;  %v2530_v2 = vrot.slane %v9367_v61, %v9548_v54  ;;  %v9373_v4 = vld [vmem:[%s11222_s0 + $0x62c] ss:$14 sps:$4 sm:$0x33]   ;;  %v9376_v5 = vld [vmem:[%s11222_s0 + $0x648] ss:$14 sps:$4 sm:$0x33]  }
 0x1e9   :  { %v3146_v63 = vpack.c.bf16 %v2405_v60, %v2334_v59  ;;  %v2544_v3 = vrot.slane %v9370_v62, %v9548_v54  ;;  %v9379_v6 = vld [vmem:[%s11222_s0 + $0x664] ss:$14 sps:$4 sm:$0x33]   ;;  %v2601_v10 = vrot.slane %v9373_v4, %v9548_v54  ;;  %v8161_v60 = vpack.c.bf16 %v6769_v52, %v6768_v51  ;;  %v6777_v52 = vld [vmem:[%s11227_s5 + $0x48] sm:$0xff] }
 0x1ea   :  { %7734 = vmatpush3.bf16.msra.mxu0 %v9416_v13  ;;  %7846 = vmatpush3.bf16.msra.mxu1 %v9418_v14  ;;  %v1837_v13 = vcombine.low %v1820_v7, %v1834_v8  ;;  %v9319_v14 = vld [vmem:[%s11222_s0 + $0x434] ss:$14 sps:$4 sm:$0x33]   ;;  %v9382_v7 = vld [vmem:[%s11222_s0 + $0x680] ss:$14 sps:$4 sm:$0x33]  }
 0x1eb   :  { %7735 = vmatprep.subr.bf16.mxu0 %v9419_v18  ;;  %7847 = vmatprep.subr.bf16.mxu1 %v9421_v19  ;;  %v1905_v18 = vrot.slane %v9316_v11, %v9548_v54  ;;  %v1962_v19 = vrot.slane %v9319_v14, %v9548_v54  ;;  %v2615_v11 = vrot.slane %v9376_v5, %v9548_v54  ;;  %v6776_v51 = vld [vmem:[%s11227_s5 + $0x40] sm:$0xff] }
 0x1ec   :  { %7627 = vmatmul.mubr.msk.bf16.gmra.mrb[12].mxu0 %vm4366_vm0, %v3083_v21  ;;  %7643 = vmatmul.mubr.msk.bf16.gmra.mrb[12].mxu1 %vm4366_vm0, %v3083_v21  ;;  %v3118_v16 = vpack.c.bf16 %v1837_v13, %v1766_v12  ;;  %v1976_v21 = vrot.slane %v9322_v15, %v9548_v54  ;;  %v2672_v12 = vrot.slane %v9379_v6, %v9548_v54  ;;  %v9385_v15 = vld [vmem:[%s11222_s0 + $0x69c] ss:$14 sps:$4 sm:$0x33]  }
 0x1ed   :  { %5066 = vmatprep.mubr.bf16.mxu0 %v9479_v20  ;;  %5838 = vmatprep.mubr.bf16.mxu1 %v9479_v20  ;;  %v1908_v26 = vcombine.low %v1891_v17, %v1905_v18  ;;  %v2686_v13 = vrot.slane %v9382_v7, %v9548_v54  ;;  %v2618_v17 = vcombine.low %v2601_v10, %v2615_v11 }
 0x1ee   :  { %7736 = vmatpush3.bf16.msra.mxu0 %v9420_v23  ;;  %7848 = vmatpush3.bf16.msra.mxu1 %v9422_v24  ;;  %v9328_v23 = vld [vmem:[%s11222_s0 + $0x488] ss:$14 sps:$4 sm:$0x33]   ;;  %v9331_v24 = vld [vmem:[%s11222_s0 + $0x4a4] ss:$14 sps:$4 sm:$0x33]   ;;  %v1979_v27 = vcombine.low %v1962_v19, %v1976_v21 }
 0x1ef   :  { %7737 = vmatprep.subr.bf16.mxu0 %v9423_v28  ;;  %7849 = vmatprep.subr.bf16.mxu1 %v9425_v29  ;;  %v2033_v28 = vrot.slane %v9325_v22, %v9548_v54  ;;  %v2047_v29 = vrot.slane %v9328_v23, %v9548_v54  ;;  %v2104_v30 = vrot.slane %v9331_v24, %v9548_v54  ;;  %v9391_v19 = vld [vmem:[%s11222_s0 + $0x6d4] ss:$14 sps:$4 sm:$0x33]   ;;  %v9394_v21 = vld [vmem:[%s11222_s0 + $0x6f0] ss:$14 sps:$4 sm:$0x33]  }
 0x1f0   :  { %v2689_v18 = vcombine.low %v2672_v12, %v2686_v13  ;;  %v2743_v23 = vrot.slane %v9385_v15, %v9548_v54  ;;  %v2814_v25 = vrot.slane %v9391_v19, %v9548_v54  ;;  %v6773_v15 = vld [vmem:[%s11227_s5 + $0x28] sm:$0xff] }
 0x1f1   :  { %v2050_v35 = vcombine.low %v2033_v28, %v2047_v29  ;;  %v2121_v36 = vcombine.low %v2104_v30, %v2118_v31  ;;  %v3368_v30 = vsub.s32 0, %v9545_v48  ;;  %v3376_v31 = vsub.s32 2, %v9545_v48 }
 0x1f2   :  { %7738 = vmatpush3.bf16.msra.mxu0 %v9424_v32  ;;  %7850 = vmatpush3.bf16.msra.mxu1 %v9426_v33  ;;  %v3125_v32 = vpack.c.bf16 %v1979_v27, %v1908_v26  ;;  %v9337_v33 = vld [vmem:[%s11222_s0 + $0x4dc] ss:$14 sps:$4 sm:$0x33]   ;;  %v3160_v22 = vpack.c.bf16 %v2689_v18, %v2618_v17  ;;  %v2828_v26 = vrot.slane %v9394_v21, %v9548_v54 }
 0x1f3   :  { %v3132_v39 = vpack.c.bf16 %v2121_v36, %v2050_v35  ;;  %v2175_v40 = vrot.slane %v9337_v33, %v9548_v54  ;;  %v3380_v33 = vsub.s32 3, %v9545_v48  ;;  %8162 = vmatprep.subr.bf16.mxu0 %v8161_v60 }
 0x1f4   :  { %7628 = vmatmul.mubr.msk.bf16.gmra.mrb[16].mxu0 %vm4366_vm0, %v3090_v34  ;;  %7644 = vmatmul.mubr.msk.bf16.gmra.mrb[16].mxu1 %vm4366_vm0, %v3090_v34  ;;  %v9340_v34 = vld [vmem:[%s11222_s0 + $0x4f8] ss:$14 sps:$4 sm:$0x33]   ;;  %v2831_v28 = vcombine.low %v2814_v25, %v2828_v26 }
 0x1f5   :  { %5076 = vmatprep.mubr.bf16.mxu0 %v9479_v20  ;;  %5848 = vmatprep.mubr.bf16.mxu1 %v9479_v20  ;;  %v2189_v41 = vrot.slane %v9340_v34, %v9548_v54 }
 0x1f7   :  { %v2192_v49 = vcombine.low %v2175_v40, %v2189_v41 }
 0x1fc   :  { %7629 = vmatmul.mubr.msk.bf16.gmra.mrb[20].mxu0 %vm4366_vm0, %v3097_v50  ;;  %7645 = vmatmul.mubr.msk.bf16.gmra.mrb[20].mxu1 %vm4366_vm0, %v3097_v50  ;;  %v2263_v50 = vcombine.low %v2246_v42, %v2260_v43 }
 0x1fd   :  { %5086 = vmatprep.mubr.bf16.mxu0 %v9479_v20  ;;  %5858 = vmatprep.mubr.bf16.mxu1 %v9479_v20 }
 0x1fe   :  { %v3139_v56 = vpack.c.bf16 %v2263_v50, %v2192_v49 }
 0x204   :  { %7630 = vmatmul.mubr.msk.bf16.gmra.mrb[24].mxu0 %vm4366_vm0, %v3104_v58  ;;  %7646 = vmatmul.mubr.msk.bf16.gmra.mrb[24].mxu1 %vm4366_vm0, %v3104_v58  ;;  %v9364_v58 = vld [vmem:[%s11222_s0 + $0x5d8] ss:$14 sps:$4 sm:$0x33]  }
 0x205   :  { %5096 = vmatprep.mubr.bf16.mxu0 %v9479_v20  ;;  %5868 = vmatprep.mubr.bf16.mxu1 %v9479_v20  ;;  %v2473_v1 = vrot.slane %v9364_v58, %v9548_v54 }
 0x207   :  { %v2476_v8 = vcombine.low %v2459_v0, %v2473_v1  ;;  %v6770_v1 = vld [vmem:[%s11227_s5 + $0x10] sm:$0xff] }
 0x20c   :  { %7631 = vmatmul.mubr.msk.bf16.gmra.mrb[28].mxu0 %vm4366_vm0, %v3111_v9  ;;  %7647 = vmatmul.mubr.msk.bf16.gmra.mrb[28].mxu1 %vm4366_vm0, %v3111_v9  ;;  %v2547_v9 = vcombine.low %v2530_v2, %v2544_v3  ;;  %v6771_v2 = vld [vmem:[%s11227_s5 + $0x18] sm:$0xff] }
 0x20d   :  { %5106 = vmatprep.mubr.bf16.mxu0 %v9479_v20  ;;  %5878 = vmatprep.mubr.bf16.mxu1 %v9479_v20  ;;  %v8165_v13 = vpack.c.bf16 %v6771_v2, %v6770_v1 }
 0x20e   :  { %v3153_v14 = vpack.c.bf16 %v2547_v9, %v2476_v8 }
 0x214   :  { %7632 = vmatmul.mubr.msk.bf16.gmra.mrb[32].mxu0 %vm4366_vm0, %v3118_v16  ;;  %7648 = vmatmul.mubr.msk.bf16.gmra.mrb[32].mxu1 %vm4366_vm0, %v3118_v16  ;;  %v9388_v16 = vld [vmem:[%s11222_s0 + $0x6b8] ss:$14 sps:$4 sm:$0x33]  }
 0x215   :  { %5116 = vmatprep.mubr.bf16.mxu0 %v9479_v20  ;;  %5888 = vmatprep.mubr.bf16.mxu1 %v9479_v20  ;;  %v2757_v24 = vrot.slane %v9388_v16, %v9548_v54  ;;  %v3364_v54 = vld [vmem:[%s11224_s2] sm:$0xf] }
 0x216   :  { %v10845_v34 = vrot.slane %v3364_v54, %v3368_v30  ;;  %v10851_v36 = vrot.slane %v3364_v54, %v3380_v33 }
 0x217   :  { %v2760_v27 = vcombine.low %v2743_v23, %v2757_v24 }
 0x219   :  { %v3167_v29 = vpack.c.bf16 %v2831_v28, %v2760_v27 }
 0x21c   :  { %7633 = vmatmul.mubr.msk.bf16.gmra.mrb[36].mxu0 %vm4366_vm0, %v3125_v32  ;;  %7649 = vmatmul.mubr.msk.bf16.gmra.mrb[36].mxu1 %vm4366_vm0, %v3125_v32  ;;  %v3372_v32 = vsub.s32 1, %v9545_v48 }
 0x21d   :  { %5126 = vmatprep.mubr.bf16.mxu0 %v9479_v20  ;;  %5898 = vmatprep.mubr.bf16.mxu1 %v9479_v20 }
 0x21e   :  { %v10849_v35 = vrot.slane %v3364_v54, %v3372_v32 }
 0x224   :  { %7634 = vmatmul.mubr.msk.bf16.gmra.mrb[40].mxu0 %vm4366_vm0, %v3132_v39  ;;  %7650 = vmatmul.mubr.msk.bf16.gmra.mrb[40].mxu1 %vm4366_vm0, %v3132_v39 }
 0x225   :  { %5136 = vmatprep.mubr.bf16.mxu0 %v9479_v20  ;;  %5908 = vmatprep.mubr.bf16.mxu1 %v9479_v20 }
 0x22c   :  { %7635 = vmatmul.mubr.msk.bf16.gmra.mrb[44].mxu0 %vm4366_vm0, %v3139_v56  ;;  %7651 = vmatmul.mubr.msk.bf16.gmra.mrb[44].mxu1 %vm4366_vm0, %v3139_v56 }
 0x22d   :  { %5146 = vmatprep.mubr.bf16.mxu0 %v9479_v20  ;;  %5918 = vmatprep.mubr.bf16.mxu1 %v9479_v20 }
 0x234   :  { %7636 = vmatmul.mubr.msk.bf16.gmra.mrb[48].mxu0 %vm4366_vm0, %v3146_v63  ;;  %7652 = vmatmul.mubr.msk.bf16.gmra.mrb[48].mxu1 %vm4366_vm0, %v3146_v63 }
 0x235   :  { %5156 = vmatprep.mubr.bf16.mxu0 %v9479_v20  ;;  %5928 = vmatprep.mubr.bf16.mxu1 %v9479_v20 }
 0x23c   :  { %7637 = vmatmul.mubr.msk.bf16.gmra.mrb[52].mxu0 %vm4366_vm0, %v3153_v14  ;;  %7653 = vmatmul.mubr.msk.bf16.gmra.mrb[52].mxu1 %vm4366_vm0, %v3153_v14  ;;  %v6772_v14 = vld [vmem:[%s11227_s5 + $0x20] sm:$0xff] }
 0x23d   :  { %5166 = vmatprep.mubr.bf16.mxu0 %v9479_v20  ;;  %5938 = vmatprep.mubr.bf16.mxu1 %v9479_v20  ;;  %v8169_v27 = vpack.c.bf16 %v6773_v15, %v6772_v14 }
 0x244   :  { %7638 = vmatmul.mubr.msk.bf16.gmra.mrb[56].mxu0 %vm4366_vm0, %v3160_v22  ;;  %7654 = vmatmul.mubr.msk.bf16.gmra.mrb[56].mxu1 %vm4366_vm0, %v3160_v22 }
 0x245   :  { %5176 = vmatprep.mubr.bf16.mxu0 %v9479_v20  ;;  %5948 = vmatprep.mubr.bf16.mxu1 %v9479_v20  ;;  %v10847_v20 = vrot.slane %v3364_v54, %v3376_v31 }
 0x24c   :  { %7639 = vmatmul.mubr.msk.bf16.gmra.mrb[60].mxu0 %vm4366_vm0, %v3167_v29  ;;  %7655 = vmatmul.mubr.msk.bf16.gmra.mrb[60].mxu1 %vm4366_vm0, %v3167_v29 }
 0x2a7   :  { %v5028_v37 = vpop.f32.mrb[0].mxu0  ;;  %v5800_v38 = vpop.f32.mrb[0].mxu1 }
 0x2a8   :  { %v8197_v39 = vadd.f32 %v5028_v37, %v10845_v34  ;;  %v8261_v40 = vadd.f32 %v5800_v38, %v10847_v20  ;;  %v5030_v41 = vpop.f32.mrb[1].mxu0  ;;  %v5802_v42 = vpop.f32.mrb[1].mxu1  ;;  %v6774_v38 = vld [vmem:[%s11227_s5 + $0x30] sm:$0xff] }
 0x2a9   :  { %v8198_v43 = vadd.f32 %v5030_v41, %v10849_v35  ;;  %v8262_v48 = vadd.f32 %v5802_v42, %v10851_v36  ;;  %v5032_v44 = vpop.f32.mrb[2].mxu0  ;;  %v5804_v45 = vpop.f32.mrb[2].mxu1 }
 0x2aa   :  { %v8199_v46 = vadd.f32 %v5032_v44, %v10845_v34  ;;  %v8263_v47 = vadd.f32 %v5804_v45, %v10847_v20  ;;  %v5034_v49 = vpop.f32.mrb[3].mxu0  ;;  %v5806_v50 = vpop.f32.mrb[3].mxu1  ;;  %v5959_v53 = vmax.f32 %v8197_v39, 0.0  ;;  %v5961_v57 = vmax.f32 %v8261_v40, 0.0  ;;  %v6775_v39 = vld [vmem:[%s11227_s5 + $0x38] sm:$0xff] }
 0x2ab   :  { %v8200_v55 = vadd.f32 %v5034_v49, %v10849_v35  ;;  %v8264_v56 = vadd.f32 %v5806_v50, %v10851_v36  ;;  %v5960_v61 = vmax.f32 %v8198_v43, 0.0  ;;  %v5962_v62 = vmax.f32 %v8262_v48, 0.0 }
 0x2ac   :  { %v5963_v58 = vmax.f32 %v8199_v46, 0.0  ;;  %v5965_v59 = vmax.f32 %v8263_v47, 0.0  ;;  %v8173_v50 = vpack.c.bf16 %v6775_v39, %v6774_v38 }
 0x2ad   :  { %v5964_v63 = vmax.f32 %v8200_v55, 0.0  ;;  %v5966_v0 = vmax.f32 %v8264_v56, 0.0 }
 0x2ae   :  { %v6087_v3 = vpack.c.bf16 %v5963_v58, %v5959_v53  ;;  %v6089_v4 = vpack.c.bf16 %v5965_v59, %v5961_v57 }
 0x2af   :  { %v6088_v5 = vpack.c.bf16 %v5964_v63, %v5960_v61  ;;  %v6090_v6 = vpack.c.bf16 %v5966_v0, %v5962_v62  ;;  %v5038_v7 = vpop.f32.mrb[4].mxu0  ;;  %v5810_v8 = vpop.f32.mrb[4].mxu1  ;;  %v8177_v0 = vpack.c.bf16 %v6777_v52, %v6776_v51 }
 0x2b0   :  { %v8201_v9 = vadd.f32 %v5038_v7, %v10845_v34  ;;  %v8265_v10 = vadd.f32 %v5810_v8, %v10847_v20  ;;  %v5040_v11 = vpop.f32.mrb[5].mxu0  ;;  %v5812_v12 = vpop.f32.mrb[5].mxu1 }
 0x2b1   :  { %v8202_v16 = vadd.f32 %v5040_v11, %v10849_v35  ;;  %v8266_v17 = vadd.f32 %v5812_v12, %v10851_v36  ;;  %v5042_v18 = vpop.f32.mrb[6].mxu0  ;;  %v5814_v19 = vpop.f32.mrb[6].mxu1  ;;  %6446 = vmatprep.mubr.bf16.mxu0 %v6088_v5  ;;  %6607 = vmatprep.mubr.bf16.mxu1 %v6090_v6 }
 0x2b2   :  { %v8203_v21 = vadd.f32 %v5042_v18, %v10845_v34  ;;  %v8267_v22 = vadd.f32 %v5814_v19, %v10847_v20  ;;  %v5044_v23 = vpop.f32.mrb[7].mxu0  ;;  %v5816_v24 = vpop.f32.mrb[7].mxu1  ;;  %6447 = vmatmul.mubr.bf16.vlgmr.msra.gmra.mrb[64].mxu0 %v6087_v3  ;;  %6608 = vmatmul.mubr.bf16.vlgmr.msra.gmra.mrb[64].mxu1 %v6089_v4  ;;  %v5967_v28 = vmax.f32 %v8201_v9, 0.0  ;;  %v5969_v29 = vmax.f32 %v8265_v10, 0.0 }
 0x2b3   :  { %v8204_v25 = vadd.f32 %v5044_v23, %v10849_v35  ;;  %v8268_v26 = vadd.f32 %v5816_v24, %v10851_v36  ;;  %8164 = vmatpush3.bf16.msra.mxu0 %v8161_v60  ;;  %v5968_v54 = vmax.f32 %v8202_v16, 0.0  ;;  %v5970_v32 = vmax.f32 %v8266_v17, 0.0 }
 0x2b4   :  { %v5971_v30 = vmax.f32 %v8203_v21, 0.0  ;;  %v5973_v31 = vmax.f32 %v8267_v22, 0.0  ;;  %8166 = vmatprep.subr.bf16.mxu0 %v8165_v13 }
 0x2b5   :  { %v5972_v33 = vmax.f32 %v8204_v25, 0.0  ;;  %v5974_v37 = vmax.f32 %v8268_v26, 0.0 }
 0x2b6   :  { %v6091_v40 = vpack.c.bf16 %v5971_v30, %v5967_v28  ;;  %v6093_v41 = vpack.c.bf16 %v5973_v31, %v5969_v29 }
 0x2b7   :  { %v6092_v42 = vpack.c.bf16 %v5972_v33, %v5968_v54  ;;  %v6094_v43 = vpack.c.bf16 %v5974_v37, %v5970_v32  ;;  %v5048_v48 = vpop.f32.mrb[8].mxu0  ;;  %v5820_v44 = vpop.f32.mrb[8].mxu1  ;;  %8168 = vmatpush3.bf16.msra.mxu0 %v8165_v13 }
 0x2b8   :  { %v8205_v45 = vadd.f32 %v5048_v48, %v10845_v34  ;;  %v8269_v46 = vadd.f32 %v5820_v44, %v10847_v20  ;;  %v5050_v47 = vpop.f32.mrb[9].mxu0  ;;  %v5822_v49 = vpop.f32.mrb[9].mxu1  ;;  %8170 = vmatprep.subr.bf16.mxu0 %v8169_v27 }
 0x2b9   :  { %v8206_v53 = vadd.f32 %v5050_v47, %v10849_v35  ;;  %v8270_v55 = vadd.f32 %v5822_v49, %v10851_v36  ;;  %v5052_v56 = vpop.f32.mrb[10].mxu0  ;;  %v5824_v57 = vpop.f32.mrb[10].mxu1  ;;  %6454 = vmatprep.mubr.bf16.mxu0 %v6092_v42  ;;  %6615 = vmatprep.mubr.bf16.mxu1 %v6094_v43 }
 0x2ba   :  { %v8207_v58 = vadd.f32 %v5052_v56, %v10845_v34  ;;  %v8271_v59 = vadd.f32 %v5824_v57, %v10847_v20  ;;  %v5054_v60 = vpop.f32.mrb[11].mxu0  ;;  %v5826_v61 = vpop.f32.mrb[11].mxu1  ;;  %6455 = vmatmul.mubr.bf16.gmra.mrb[68].mxu0 %v6091_v40  ;;  %6616 = vmatmul.mubr.bf16.gmra.mrb[68].mxu1 %v6093_v41  ;;  %v5975_v1 = vmax.f32 %v8205_v45, 0.0  ;;  %v5977_v2 = vmax.f32 %v8269_v46, 0.0 }
 0x2bb   :  { %v8208_v62 = vadd.f32 %v5054_v60, %v10849_v35  ;;  %v8272_v63 = vadd.f32 %v5826_v61, %v10851_v36  ;;  %8172 = vmatpush3.bf16.msra.mxu0 %v8169_v27  ;;  %v5976_v5 = vmax.f32 %v8206_v53, 0.0  ;;  %v5978_v6 = vmax.f32 %v8270_v55, 0.0 }
 0x2bc   :  { %v5979_v3 = vmax.f32 %v8207_v58, 0.0  ;;  %v5981_v4 = vmax.f32 %v8271_v59, 0.0  ;;  %8174 = vmatprep.subr.bf16.mxu0 %v8173_v50 }
 0x2bd   :  { %v5980_v7 = vmax.f32 %v8208_v62, 0.0  ;;  %v5982_v8 = vmax.f32 %v8272_v63, 0.0 }
 0x2be   :  { %v6095_v9 = vpack.c.bf16 %v5979_v3, %v5975_v1  ;;  %v6097_v10 = vpack.c.bf16 %v5981_v4, %v5977_v2 }
 0x2bf   :  { %v6096_v11 = vpack.c.bf16 %v5980_v7, %v5976_v5  ;;  %v6098_v12 = vpack.c.bf16 %v5982_v8, %v5978_v6  ;;  %v5058_v13 = vpop.f32.mrb[12].mxu0  ;;  %v5830_v14 = vpop.f32.mrb[12].mxu1  ;;  %8176 = vmatpush3.bf16.msra.mxu0 %v8173_v50 }
 0x2c0   :  { %v8209_v15 = vadd.f32 %v5058_v13, %v10845_v34  ;;  %v8273_v16 = vadd.f32 %v5830_v14, %v10847_v20  ;;  %v5060_v17 = vpop.f32.mrb[13].mxu0  ;;  %v5832_v18 = vpop.f32.mrb[13].mxu1  ;;  %8178 = vmatprep.subr.bf16.mxu0 %v8177_v0 }
 0x2c1   :  { %v8210_v19 = vadd.f32 %v5060_v17, %v10849_v35  ;;  %v8274_v21 = vadd.f32 %v5832_v18, %v10851_v36  ;;  %v5062_v22 = vpop.f32.mrb[14].mxu0  ;;  %v5834_v23 = vpop.f32.mrb[14].mxu1  ;;  %6462 = vmatprep.mubr.bf16.mxu0 %v6096_v11  ;;  %6623 = vmatprep.mubr.bf16.mxu1 %v6098_v12 }
 0x2c2   :  { %v8211_v24 = vadd.f32 %v5062_v22, %v10845_v34  ;;  %v8275_v25 = vadd.f32 %v5834_v23, %v10847_v20  ;;  %v5064_v26 = vpop.f32.mrb[15].mxu0  ;;  %v5836_v27 = vpop.f32.mrb[15].mxu1  ;;  %6463 = vmatmul.mubr.bf16.gmra.mrb[72].mxu0 %v6095_v9  ;;  %6624 = vmatmul.mubr.bf16.gmra.mrb[72].mxu1 %v6097_v10  ;;  %v5983_v30 = vmax.f32 %v8209_v15, 0.0  ;;  %v5985_v31 = vmax.f32 %v8273_v16, 0.0 }
 0x2c3   :  { %v8212_v28 = vadd.f32 %v5064_v26, %v10849_v35  ;;  %v8276_v29 = vadd.f32 %v5836_v27, %v10851_v36  ;;  %8180 = vmatpush3.bf16.msra.mxu0 %v8177_v0  ;;  %v5984_v33 = vmax.f32 %v8210_v19, 0.0  ;;  %v5986_v37 = vmax.f32 %v8274_v21, 0.0 }
 0x2c4   :  { %v5987_v54 = vmax.f32 %v8211_v24, 0.0  ;;  %v5989_v32 = vmax.f32 %v8275_v25, 0.0 }
 0x2c5   :  { %v5988_v38 = vmax.f32 %v8212_v28, 0.0  ;;  %v5990_v39 = vmax.f32 %v8276_v29, 0.0 }
 0x2c6   :  { %v6099_v40 = vpack.c.bf16 %v5987_v54, %v5983_v30  ;;  %v6101_v41 = vpack.c.bf16 %v5989_v32, %v5985_v31 }
 0x2c7   :  { %v6100_v42 = vpack.c.bf16 %v5988_v38, %v5984_v33  ;;  %v6102_v43 = vpack.c.bf16 %v5990_v39, %v5986_v37  ;;  %v5068_v48 = vpop.f32.mrb[16].mxu0  ;;  %v5840_v44 = vpop.f32.mrb[16].mxu1 }
 0x2c8   :  { %v8213_v45 = vadd.f32 %v5068_v48, %v10845_v34  ;;  %v8277_v46 = vadd.f32 %v5840_v44, %v10847_v20  ;;  %v5070_v47 = vpop.f32.mrb[17].mxu0  ;;  %v5842_v49 = vpop.f32.mrb[17].mxu1 }
 0x2c9   :  { %v8214_v50 = vadd.f32 %v5070_v47, %v10849_v35  ;;  %v8278_v51 = vadd.f32 %v5842_v49, %v10851_v36  ;;  %v5072_v52 = vpop.f32.mrb[18].mxu0  ;;  %v5844_v53 = vpop.f32.mrb[18].mxu1  ;;  %6470 = vmatprep.mubr.bf16.mxu0 %v6100_v42  ;;  %6631 = vmatprep.mubr.bf16.mxu1 %v6102_v43 }
 0x2ca   :  { %v8215_v55 = vadd.f32 %v5072_v52, %v10845_v34  ;;  %v8279_v56 = vadd.f32 %v5844_v53, %v10847_v20  ;;  %v5074_v57 = vpop.f32.mrb[19].mxu0  ;;  %v5846_v58 = vpop.f32.mrb[19].mxu1  ;;  %6471 = vmatmul.mubr.bf16.gmra.mrb[76].mxu0 %v6099_v40  ;;  %6632 = vmatmul.mubr.bf16.gmra.mrb[76].mxu1 %v6101_v41  ;;  %v5991_v61 = vmax.f32 %v8213_v45, 0.0  ;;  %v5993_v62 = vmax.f32 %v8277_v46, 0.0 }
 0x2cb   :  { %v8216_v59 = vadd.f32 %v5074_v57, %v10849_v35  ;;  %v8280_v60 = vadd.f32 %v5846_v58, %v10851_v36  ;;  %v5992_v1 = vmax.f32 %v8214_v50, 0.0  ;;  %v5994_v2 = vmax.f32 %v8278_v51, 0.0 }
 0x2cc   :  { %v5995_v63 = vmax.f32 %v8215_v55, 0.0  ;;  %v5997_v0 = vmax.f32 %v8279_v56, 0.0 }
 0x2cd   :  { %v5996_v3 = vmax.f32 %v8216_v59, 0.0  ;;  %v5998_v4 = vmax.f32 %v8280_v60, 0.0 }
 0x2ce   :  { %v6103_v5 = vpack.c.bf16 %v5995_v63, %v5991_v61  ;;  %v6105_v6 = vpack.c.bf16 %v5997_v0, %v5993_v62 }
 0x2cf   :  { %v6104_v7 = vpack.c.bf16 %v5996_v3, %v5992_v1  ;;  %v6106_v8 = vpack.c.bf16 %v5998_v4, %v5994_v2  ;;  %v5078_v9 = vpop.f32.mrb[20].mxu0  ;;  %v5850_v10 = vpop.f32.mrb[20].mxu1 }
 0x2d0   :  { %v8217_v11 = vadd.f32 %v5078_v9, %v10845_v34  ;;  %v8281_v12 = vadd.f32 %v5850_v10, %v10847_v20  ;;  %v5080_v13 = vpop.f32.mrb[21].mxu0  ;;  %v5852_v14 = vpop.f32.mrb[21].mxu1 }
 0x2d1   :  { %v8218_v15 = vadd.f32 %v5080_v13, %v10849_v35  ;;  %v8282_v16 = vadd.f32 %v5852_v14, %v10851_v36  ;;  %v5082_v17 = vpop.f32.mrb[22].mxu0  ;;  %v5854_v18 = vpop.f32.mrb[22].mxu1  ;;  %6478 = vmatprep.mubr.bf16.mxu0 %v6104_v7  ;;  %6639 = vmatprep.mubr.bf16.mxu1 %v6106_v8 }
 0x2d2   :  { %v8219_v19 = vadd.f32 %v5082_v17, %v10845_v34  ;;  %v8283_v21 = vadd.f32 %v5854_v18, %v10847_v20  ;;  %v5084_v22 = vpop.f32.mrb[23].mxu0  ;;  %v5856_v23 = vpop.f32.mrb[23].mxu1  ;;  %6479 = vmatmul.mubr.bf16.gmra.mrb[80].mxu0 %v6103_v5  ;;  %6640 = vmatmul.mubr.bf16.gmra.mrb[80].mxu1 %v6105_v6  ;;  %v5999_v26 = vmax.f32 %v8217_v11, 0.0  ;;  %v6001_v27 = vmax.f32 %v8281_v12, 0.0 }
 0x2d3   :  { %v8220_v24 = vadd.f32 %v5084_v22, %v10849_v35  ;;  %v8284_v25 = vadd.f32 %v5856_v23, %v10851_v36  ;;  %v6000_v30 = vmax.f32 %v8218_v15, 0.0  ;;  %v6002_v31 = vmax.f32 %v8282_v16, 0.0 }
 0x2d4   :  { %v6003_v28 = vmax.f32 %v8219_v19, 0.0  ;;  %v6005_v29 = vmax.f32 %v8283_v21, 0.0 }
 0x2d5   :  { %v6004_v54 = vmax.f32 %v8220_v24, 0.0  ;;  %v6006_v32 = vmax.f32 %v8284_v25, 0.0 }
 0x2d6   :  { %v6107_v33 = vpack.c.bf16 %v6003_v28, %v5999_v26  ;;  %v6109_v37 = vpack.c.bf16 %v6005_v29, %v6001_v27 }
 0x2d7   :  { %v6108_v38 = vpack.c.bf16 %v6004_v54, %v6000_v30  ;;  %v6110_v39 = vpack.c.bf16 %v6006_v32, %v6002_v31  ;;  %v5088_v40 = vpop.f32.mrb[24].mxu0  ;;  %v5860_v41 = vpop.f32.mrb[24].mxu1 }
 0x2d8   :  { %v8221_v42 = vadd.f32 %v5088_v40, %v10845_v34  ;;  %v8285_v43 = vadd.f32 %v5860_v41, %v10847_v20  ;;  %v5090_v48 = vpop.f32.mrb[25].mxu0  ;;  %v5862_v44 = vpop.f32.mrb[25].mxu1 }
 0x2d9   :  { %v8222_v45 = vadd.f32 %v5090_v48, %v10849_v35  ;;  %v8286_v46 = vadd.f32 %v5862_v44, %v10851_v36  ;;  %v5092_v47 = vpop.f32.mrb[26].mxu0  ;;  %v5864_v49 = vpop.f32.mrb[26].mxu1  ;;  %6486 = vmatprep.mubr.bf16.mxu0 %v6108_v38  ;;  %6647 = vmatprep.mubr.bf16.mxu1 %v6110_v39 }
 0x2da   :  { %v8223_v50 = vadd.f32 %v5092_v47, %v10845_v34  ;;  %v8287_v51 = vadd.f32 %v5864_v49, %v10847_v20  ;;  %v5094_v52 = vpop.f32.mrb[27].mxu0  ;;  %v5866_v53 = vpop.f32.mrb[27].mxu1  ;;  %6487 = vmatmul.mubr.bf16.gmra.mrb[84].mxu0 %v6107_v33  ;;  %6648 = vmatmul.mubr.bf16.gmra.mrb[84].mxu1 %v6109_v37  ;;  %v6007_v57 = vmax.f32 %v8221_v42, 0.0  ;;  %v6009_v58 = vmax.f32 %v8285_v43, 0.0 }
 0x2db   :  { %v8224_v55 = vadd.f32 %v5094_v52, %v10849_v35  ;;  %v8288_v56 = vadd.f32 %v5866_v53, %v10851_v36  ;;  %v6008_v61 = vmax.f32 %v8222_v45, 0.0  ;;  %v6010_v62 = vmax.f32 %v8286_v46, 0.0 }
 0x2dc   :  { %v6011_v59 = vmax.f32 %v8223_v50, 0.0  ;;  %v6013_v60 = vmax.f32 %v8287_v51, 0.0 }
 0x2dd   :  { %v6012_v63 = vmax.f32 %v8224_v55, 0.0  ;;  %v6014_v0 = vmax.f32 %v8288_v56, 0.0 }
 0x2de   :  { %v6111_v1 = vpack.c.bf16 %v6011_v59, %v6007_v57  ;;  %v6113_v2 = vpack.c.bf16 %v6013_v60, %v6009_v58 }
 0x2df   :  { %v6112_v3 = vpack.c.bf16 %v6012_v63, %v6008_v61  ;;  %v6114_v4 = vpack.c.bf16 %v6014_v0, %v6010_v62  ;;  %v5098_v5 = vpop.f32.mrb[28].mxu0  ;;  %v5870_v6 = vpop.f32.mrb[28].mxu1 }
 0x2e0   :  { %v8225_v7 = vadd.f32 %v5098_v5, %v10845_v34  ;;  %v8289_v8 = vadd.f32 %v5870_v6, %v10847_v20  ;;  %v5100_v9 = vpop.f32.mrb[29].mxu0  ;;  %v5872_v10 = vpop.f32.mrb[29].mxu1 }
 0x2e1   :  { %v8226_v11 = vadd.f32 %v5100_v9, %v10849_v35  ;;  %v8290_v12 = vadd.f32 %v5872_v10, %v10851_v36  ;;  %v5102_v13 = vpop.f32.mrb[30].mxu0  ;;  %v5874_v14 = vpop.f32.mrb[30].mxu1  ;;  %6494 = vmatprep.mubr.bf16.mxu0 %v6112_v3  ;;  %6655 = vmatprep.mubr.bf16.mxu1 %v6114_v4 }
 0x2e2   :  { %v8227_v15 = vadd.f32 %v5102_v13, %v10845_v34  ;;  %v8291_v16 = vadd.f32 %v5874_v14, %v10847_v20  ;;  %v5104_v17 = vpop.f32.mrb[31].mxu0  ;;  %v5876_v18 = vpop.f32.mrb[31].mxu1  ;;  %6495 = vmatmul.mubr.bf16.gmra.mrb[88].mxu0 %v6111_v1  ;;  %6656 = vmatmul.mubr.bf16.gmra.mrb[88].mxu1 %v6113_v2  ;;  %v6015_v22 = vmax.f32 %v8225_v7, 0.0  ;;  %v6017_v23 = vmax.f32 %v8289_v8, 0.0 }
 0x2e3   :  { %v8228_v19 = vadd.f32 %v5104_v17, %v10849_v35  ;;  %v8292_v21 = vadd.f32 %v5876_v18, %v10851_v36  ;;  %v6016_v26 = vmax.f32 %v8226_v11, 0.0  ;;  %v6018_v27 = vmax.f32 %v8290_v12, 0.0 }
 0x2e4   :  { %v6019_v24 = vmax.f32 %v8227_v15, 0.0  ;;  %v6021_v25 = vmax.f32 %v8291_v16, 0.0 }
 0x2e5   :  { %v6020_v28 = vmax.f32 %v8228_v19, 0.0  ;;  %v6022_v29 = vmax.f32 %v8292_v21, 0.0 }
 0x2e6   :  { %v6115_v30 = vpack.c.bf16 %v6019_v24, %v6015_v22  ;;  %v6117_v31 = vpack.c.bf16 %v6021_v25, %v6017_v23 }
 0x2e7   :  { %v6116_v54 = vpack.c.bf16 %v6020_v28, %v6016_v26  ;;  %v6118_v32 = vpack.c.bf16 %v6022_v29, %v6018_v27  ;;  %v5108_v33 = vpop.f32.mrb[32].mxu0  ;;  %v5880_v37 = vpop.f32.mrb[32].mxu1 }
 0x2e8   :  { %v8229_v38 = vadd.f32 %v5108_v33, %v10845_v34  ;;  %v8293_v39 = vadd.f32 %v5880_v37, %v10847_v20  ;;  %v5110_v40 = vpop.f32.mrb[33].mxu0  ;;  %v5882_v41 = vpop.f32.mrb[33].mxu1 }
 0x2e9   :  { %v8230_v42 = vadd.f32 %v5110_v40, %v10849_v35  ;;  %v8294_v43 = vadd.f32 %v5882_v41, %v10851_v36  ;;  %v5112_v48 = vpop.f32.mrb[34].mxu0  ;;  %v5884_v44 = vpop.f32.mrb[34].mxu1  ;;  %6502 = vmatprep.mubr.bf16.mxu0 %v6116_v54  ;;  %6663 = vmatprep.mubr.bf16.mxu1 %v6118_v32 }
 0x2ea   :  { %v8231_v45 = vadd.f32 %v5112_v48, %v10845_v34  ;;  %v8295_v46 = vadd.f32 %v5884_v44, %v10847_v20  ;;  %v5114_v47 = vpop.f32.mrb[35].mxu0  ;;  %v5886_v49 = vpop.f32.mrb[35].mxu1  ;;  %6503 = vmatmul.mubr.bf16.gmra.mrb[92].mxu0 %v6115_v30  ;;  %6664 = vmatmul.mubr.bf16.gmra.mrb[92].mxu1 %v6117_v31  ;;  %v6023_v52 = vmax.f32 %v8229_v38, 0.0  ;;  %v6025_v53 = vmax.f32 %v8293_v39, 0.0 }
 0x2eb   :  { %v8232_v50 = vadd.f32 %v5114_v47, %v10849_v35  ;;  %v8296_v51 = vadd.f32 %v5886_v49, %v10851_v36  ;;  %v6024_v57 = vmax.f32 %v8230_v42, 0.0  ;;  %v6026_v58 = vmax.f32 %v8294_v43, 0.0 }
 0x2ec   :  { %v6027_v55 = vmax.f32 %v8231_v45, 0.0  ;;  %v6029_v56 = vmax.f32 %v8295_v46, 0.0 }
 0x2ed   :  { %v6028_v59 = vmax.f32 %v8232_v50, 0.0  ;;  %v6030_v60 = vmax.f32 %v8296_v51, 0.0 }
 0x2ee   :  { %v6119_v61 = vpack.c.bf16 %v6027_v55, %v6023_v52  ;;  %v6121_v62 = vpack.c.bf16 %v6029_v56, %v6025_v53 }
 0x2ef   :  { %v6120_v63 = vpack.c.bf16 %v6028_v59, %v6024_v57  ;;  %v6122_v0 = vpack.c.bf16 %v6030_v60, %v6026_v58  ;;  %v5118_v1 = vpop.f32.mrb[36].mxu0  ;;  %v5890_v2 = vpop.f32.mrb[36].mxu1 }
 0x2f0   :  { %v8233_v3 = vadd.f32 %v5118_v1, %v10845_v34  ;;  %v8297_v4 = vadd.f32 %v5890_v2, %v10847_v20  ;;  %v5120_v5 = vpop.f32.mrb[37].mxu0  ;;  %v5892_v6 = vpop.f32.mrb[37].mxu1 }
 0x2f1   :  { %v8234_v7 = vadd.f32 %v5120_v5, %v10849_v35  ;;  %v8298_v8 = vadd.f32 %v5892_v6, %v10851_v36  ;;  %v5122_v9 = vpop.f32.mrb[38].mxu0  ;;  %v5894_v10 = vpop.f32.mrb[38].mxu1  ;;  %6510 = vmatprep.mubr.bf16.mxu0 %v6120_v63  ;;  %6671 = vmatprep.mubr.bf16.mxu1 %v6122_v0 }
 0x2f2   :  { %v8235_v11 = vadd.f32 %v5122_v9, %v10845_v34  ;;  %v8299_v12 = vadd.f32 %v5894_v10, %v10847_v20  ;;  %v5124_v13 = vpop.f32.mrb[39].mxu0  ;;  %v5896_v14 = vpop.f32.mrb[39].mxu1  ;;  %6511 = vmatmul.mubr.bf16.gmra.mrb[96].mxu0 %v6119_v61  ;;  %6672 = vmatmul.mubr.bf16.gmra.mrb[96].mxu1 %v6121_v62  ;;  %v6031_v17 = vmax.f32 %v8233_v3, 0.0  ;;  %v6033_v18 = vmax.f32 %v8297_v4, 0.0 }
 0x2f3   :  { %v8236_v15 = vadd.f32 %v5124_v13, %v10849_v35  ;;  %v8300_v16 = vadd.f32 %v5896_v14, %v10851_v36  ;;  %v6032_v22 = vmax.f32 %v8234_v7, 0.0  ;;  %v6034_v23 = vmax.f32 %v8298_v8, 0.0 }
 0x2f4   :  { %v6035_v19 = vmax.f32 %v8235_v11, 0.0  ;;  %v6037_v21 = vmax.f32 %v8299_v12, 0.0  ;;  %v6778_v11 = vld [vmem:[%s11227_s5 + $0x50] sm:$0xff]  ;;  %v6779_v12 = vld [vmem:[%s11227_s5 + $0x58] sm:$0xff] }
 0x2f5   :  { %v6036_v24 = vmax.f32 %v8236_v15, 0.0  ;;  %v6038_v25 = vmax.f32 %v8300_v16, 0.0 }
 0x2f6   :  { %v6123_v26 = vpack.c.bf16 %v6035_v19, %v6031_v17  ;;  %v6125_v27 = vpack.c.bf16 %v6037_v21, %v6033_v18  ;;  %v8181_v19 = vpack.c.bf16 %v6779_v12, %v6778_v11 }
 0x2f7   :  { %v6124_v28 = vpack.c.bf16 %v6036_v24, %v6032_v22  ;;  %v6126_v29 = vpack.c.bf16 %v6038_v25, %v6034_v23  ;;  %v5128_v30 = vpop.f32.mrb[40].mxu0  ;;  %v5900_v31 = vpop.f32.mrb[40].mxu1 }
 0x2f8   :  { %v8237_v54 = vadd.f32 %v5128_v30, %v10845_v34  ;;  %v8301_v32 = vadd.f32 %v5900_v31, %v10847_v20  ;;  %v5130_v33 = vpop.f32.mrb[41].mxu0  ;;  %v5902_v37 = vpop.f32.mrb[41].mxu1  ;;  %8182 = vmatprep.subr.bf16.mxu0 %v8181_v19 }
 0x2f9   :  { %v8238_v38 = vadd.f32 %v5130_v33, %v10849_v35  ;;  %v8302_v39 = vadd.f32 %v5902_v37, %v10851_v36  ;;  %v5132_v40 = vpop.f32.mrb[42].mxu0  ;;  %v5904_v41 = vpop.f32.mrb[42].mxu1  ;;  %6518 = vmatprep.mubr.bf16.mxu0 %v6124_v28  ;;  %6679 = vmatprep.mubr.bf16.mxu1 %v6126_v29  ;;  %v6781_v28 = vld [vmem:[%s11227_s5 + $0x68] sm:$0xff] }
 0x2fa   :  { %v8239_v42 = vadd.f32 %v5132_v40, %v10845_v34  ;;  %v8303_v43 = vadd.f32 %v5904_v41, %v10847_v20  ;;  %v5134_v48 = vpop.f32.mrb[43].mxu0  ;;  %v5906_v44 = vpop.f32.mrb[43].mxu1  ;;  %6519 = vmatmul.mubr.bf16.gmra.mrb[100].mxu0 %v6123_v26  ;;  %6680 = vmatmul.mubr.bf16.gmra.mrb[100].mxu1 %v6125_v27  ;;  %v6039_v47 = vmax.f32 %v8237_v54, 0.0  ;;  %v6041_v49 = vmax.f32 %v8301_v32, 0.0  ;;  %v6780_v27 = vld [vmem:[%s11227_s5 + $0x60] sm:$0xff] }
 0x2fb   :  { %v8240_v45 = vadd.f32 %v5134_v48, %v10849_v35  ;;  %v8304_v46 = vadd.f32 %v5906_v44, %v10851_v36  ;;  %v6040_v52 = vmax.f32 %v8238_v38, 0.0  ;;  %v6042_v53 = vmax.f32 %v8302_v39, 0.0  ;;  %8184 = vmatpush3.bf16.msra.mxu0 %v8181_v19 }
 0x2fc   :  { %v6043_v50 = vmax.f32 %v8239_v42, 0.0  ;;  %v6045_v51 = vmax.f32 %v8303_v43, 0.0  ;;  %v8185_v32 = vpack.c.bf16 %v6781_v28, %v6780_v27 }
 0x2fd   :  { %v6044_v55 = vmax.f32 %v8240_v45, 0.0  ;;  %v6046_v56 = vmax.f32 %v8304_v46, 0.0 }
 0x2fe   :  { %v6127_v57 = vpack.c.bf16 %v6043_v50, %v6039_v47  ;;  %v6129_v58 = vpack.c.bf16 %v6045_v51, %v6041_v49  ;;  %v6782_v47 = vld [vmem:[%s11227_s5 + $0x70] sm:$0xff]  ;;  %v6783_v49 = vld [vmem:[%s11227_s5 + $0x78] sm:$0xff]  ;;  %8186 = vmatprep.subr.bf16.mxu0 %v8185_v32 }
 0x2ff   :  { %v6128_v59 = vpack.c.bf16 %v6044_v55, %v6040_v52  ;;  %v6130_v60 = vpack.c.bf16 %v6046_v56, %v6042_v53  ;;  %v5138_v61 = vpop.f32.mrb[44].mxu0  ;;  %v5910_v62 = vpop.f32.mrb[44].mxu1  ;;  %8188 = vmatpush3.bf16.msra.mxu0 %v8185_v32 }
 0x300   :  { %v8241_v63 = vadd.f32 %v5138_v61, %v10845_v34  ;;  %v8305_v0 = vadd.f32 %v5910_v62, %v10847_v20  ;;  %v5140_v1 = vpop.f32.mrb[45].mxu0  ;;  %v5912_v2 = vpop.f32.mrb[45].mxu1 }
 0x301   :  { %v8242_v3 = vadd.f32 %v5140_v1, %v10849_v35  ;;  %v8306_v4 = vadd.f32 %v5912_v2, %v10851_v36  ;;  %v5142_v5 = vpop.f32.mrb[46].mxu0  ;;  %v5914_v6 = vpop.f32.mrb[46].mxu1  ;;  %6526 = vmatprep.mubr.bf16.mxu0 %v6128_v59  ;;  %6687 = vmatprep.mubr.bf16.mxu1 %v6130_v60 }
 0x302   :  { %v8243_v7 = vadd.f32 %v5142_v5, %v10845_v34  ;;  %v8307_v8 = vadd.f32 %v5914_v6, %v10847_v20  ;;  %v5144_v9 = vpop.f32.mrb[47].mxu0  ;;  %v5916_v10 = vpop.f32.mrb[47].mxu1  ;;  %6527 = vmatmul.mubr.bf16.gmra.mrb[104].mxu0 %v6127_v57  ;;  %6688 = vmatmul.mubr.bf16.gmra.mrb[104].mxu1 %v6129_v58  ;;  %v6047_v13 = vmax.f32 %v8241_v63, 0.0  ;;  %v6049_v16 = vmax.f32 %v8305_v0, 0.0 }
 0x303   :  { %v8244_v14 = vadd.f32 %v5144_v9, %v10849_v35  ;;  %v8308_v15 = vadd.f32 %v5916_v10, %v10851_v36  ;;  %v6048_v21 = vmax.f32 %v8242_v3, 0.0  ;;  %v6050_v22 = vmax.f32 %v8306_v4, 0.0 }
 0x304   :  { %v6051_v17 = vmax.f32 %v8243_v7, 0.0  ;;  %v6053_v18 = vmax.f32 %v8307_v8, 0.0  ;;  %v8189_v57 = vpack.c.bf16 %v6783_v49, %v6782_v47 }
 0x305   :  { %v6052_v23 = vmax.f32 %v8244_v14, 0.0  ;;  %v6054_v24 = vmax.f32 %v8308_v15, 0.0 }
 0x306   :  { %v6131_v25 = vpack.c.bf16 %v6051_v17, %v6047_v13  ;;  %v6133_v26 = vpack.c.bf16 %v6053_v18, %v6049_v16  ;;  %8190 = vmatprep.subr.bf16.mxu0 %v8189_v57 }
 0x307   :  { %v6132_v29 = vpack.c.bf16 %v6052_v23, %v6048_v21  ;;  %v6134_v30 = vpack.c.bf16 %v6054_v24, %v6050_v22  ;;  %v5148_v31 = vpop.f32.mrb[48].mxu0  ;;  %v5920_v54 = vpop.f32.mrb[48].mxu1  ;;  %8192 = vmatpush3.bf16.msra.mxu0 %v8189_v57 }
 0x308   :  { %v8245_v33 = vadd.f32 %v5148_v31, %v10845_v34  ;;  %v8309_v37 = vadd.f32 %v5920_v54, %v10847_v20  ;;  %v5150_v38 = vpop.f32.mrb[49].mxu0  ;;  %v5922_v39 = vpop.f32.mrb[49].mxu1 }
 0x309   :  { %v8246_v40 = vadd.f32 %v5150_v38, %v10849_v35  ;;  %v8310_v41 = vadd.f32 %v5922_v39, %v10851_v36  ;;  %v5152_v42 = vpop.f32.mrb[50].mxu0  ;;  %v5924_v43 = vpop.f32.mrb[50].mxu1  ;;  %6534 = vmatprep.mubr.bf16.mxu0 %v6132_v29  ;;  %6695 = vmatprep.mubr.bf16.mxu1 %v6134_v30 }
 0x30a   :  { %v8247_v48 = vadd.f32 %v5152_v42, %v10845_v34  ;;  %v8311_v44 = vadd.f32 %v5924_v43, %v10847_v20  ;;  %v5154_v45 = vpop.f32.mrb[51].mxu0  ;;  %v5926_v46 = vpop.f32.mrb[51].mxu1  ;;  %6535 = vmatmul.mubr.bf16.gmra.mrb[108].mxu0 %v6131_v25  ;;  %6696 = vmatmul.mubr.bf16.gmra.mrb[108].mxu1 %v6133_v26  ;;  %v6055_v50 = vmax.f32 %v8245_v33, 0.0  ;;  %v6057_v53 = vmax.f32 %v8309_v37, 0.0 }
 0x30b   :  { %v8248_v51 = vadd.f32 %v5154_v45, %v10849_v35  ;;  %v8312_v52 = vadd.f32 %v5926_v46, %v10851_v36  ;;  %v6056_v58 = vmax.f32 %v8246_v40, 0.0  ;;  %v6058_v59 = vmax.f32 %v8310_v41, 0.0 }
 0x30c   :  { %v6059_v55 = vmax.f32 %v8247_v48, 0.0  ;;  %v6061_v56 = vmax.f32 %v8311_v44, 0.0 }
 0x30d   :  { %v6060_v60 = vmax.f32 %v8248_v51, 0.0  ;;  %v6062_v61 = vmax.f32 %v8312_v52, 0.0 }
 0x30e   :  { %v6135_v62 = vpack.c.bf16 %v6059_v55, %v6055_v50  ;;  %v6137_v63 = vpack.c.bf16 %v6061_v56, %v6057_v53 }
 0x30f   :  { %v6136_v0 = vpack.c.bf16 %v6060_v60, %v6056_v58  ;;  %v6138_v1 = vpack.c.bf16 %v6062_v61, %v6058_v59  ;;  %v5158_v2 = vpop.f32.mrb[52].mxu0  ;;  %v5930_v3 = vpop.f32.mrb[52].mxu1 }
 0x310   :  { %v8249_v4 = vadd.f32 %v5158_v2, %v10845_v34  ;;  %v8313_v5 = vadd.f32 %v5930_v3, %v10847_v20  ;;  %v5160_v6 = vpop.f32.mrb[53].mxu0  ;;  %v5932_v7 = vpop.f32.mrb[53].mxu1 }
 0x311   :  { %v8250_v8 = vadd.f32 %v5160_v6, %v10849_v35  ;;  %v8314_v9 = vadd.f32 %v5932_v7, %v10851_v36  ;;  %v5162_v10 = vpop.f32.mrb[54].mxu0  ;;  %v5934_v11 = vpop.f32.mrb[54].mxu1  ;;  %6542 = vmatprep.mubr.bf16.mxu0 %v6136_v0  ;;  %6703 = vmatprep.mubr.bf16.mxu1 %v6138_v1 }
 0x312   :  { %v8251_v12 = vadd.f32 %v5162_v10, %v10845_v34  ;;  %v8315_v13 = vadd.f32 %v5934_v11, %v10847_v20  ;;  %v5164_v14 = vpop.f32.mrb[55].mxu0  ;;  %v5936_v15 = vpop.f32.mrb[55].mxu1  ;;  %6543 = vmatmul.mubr.bf16.gmra.mrb[112].mxu0 %v6135_v62  ;;  %6704 = vmatmul.mubr.bf16.gmra.mrb[112].mxu1 %v6137_v63  ;;  %v6063_v18 = vmax.f32 %v8249_v4, 0.0  ;;  %v6065_v19 = vmax.f32 %v8313_v5, 0.0 }
 0x313   :  { %v8252_v16 = vadd.f32 %v5164_v14, %v10849_v35  ;;  %v8316_v17 = vadd.f32 %v5936_v15, %v10851_v36  ;;  %v6064_v23 = vmax.f32 %v8250_v8, 0.0  ;;  %v6066_v24 = vmax.f32 %v8314_v9, 0.0 }
 0x314   :  { %v6067_v21 = vmax.f32 %v8251_v12, 0.0  ;;  %v6069_v22 = vmax.f32 %v8315_v13, 0.0 }
 0x315   :  { %v6068_v25 = vmax.f32 %v8252_v16, 0.0  ;;  %v6070_v26 = vmax.f32 %v8316_v17, 0.0 }
 0x316   :  { %v6139_v27 = vpack.c.bf16 %v6067_v21, %v6063_v18  ;;  %v6141_v28 = vpack.c.bf16 %v6069_v22, %v6065_v19 }
 0x317   :  { %v6140_v29 = vpack.c.bf16 %v6068_v25, %v6064_v23  ;;  %v6142_v30 = vpack.c.bf16 %v6070_v26, %v6066_v24  ;;  %v5168_v31 = vpop.f32.mrb[56].mxu0  ;;  %v5940_v54 = vpop.f32.mrb[56].mxu1 }
 0x318   :  { %v8253_v32 = vadd.f32 %v5168_v31, %v10845_v34  ;;  %v8317_v33 = vadd.f32 %v5940_v54, %v10847_v20  ;;  %v5170_v37 = vpop.f32.mrb[57].mxu0  ;;  %v5942_v38 = vpop.f32.mrb[57].mxu1 }
 0x319   :  { %v8254_v39 = vadd.f32 %v5170_v37, %v10849_v35  ;;  %v8318_v40 = vadd.f32 %v5942_v38, %v10851_v36  ;;  %v5172_v41 = vpop.f32.mrb[58].mxu0  ;;  %v5944_v42 = vpop.f32.mrb[58].mxu1  ;;  %6550 = vmatprep.mubr.bf16.mxu0 %v6140_v29  ;;  %6711 = vmatprep.mubr.bf16.mxu1 %v6142_v30 }
 0x31a   :  { %v8255_v43 = vadd.f32 %v5172_v41, %v10845_v34  ;;  %v8319_v48 = vadd.f32 %v5944_v42, %v10847_v20  ;;  %v5174_v44 = vpop.f32.mrb[59].mxu0  ;;  %v5946_v45 = vpop.f32.mrb[59].mxu1  ;;  %6551 = vmatmul.mubr.bf16.gmra.mrb[116].mxu0 %v6139_v27  ;;  %6712 = vmatmul.mubr.bf16.gmra.mrb[116].mxu1 %v6141_v28  ;;  %v6071_v49 = vmax.f32 %v8253_v32, 0.0  ;;  %v6073_v50 = vmax.f32 %v8317_v33, 0.0 }
 0x31b   :  { %v8256_v46 = vadd.f32 %v5174_v44, %v10849_v35  ;;  %v8320_v47 = vadd.f32 %v5946_v45, %v10851_v36  ;;  %v6072_v53 = vmax.f32 %v8254_v39, 0.0  ;;  %v6074_v55 = vmax.f32 %v8318_v40, 0.0  ;;  %v7048_v39 = vld [vmem:[%s11229_s7] sm:$0xff]  ;;  %v7049_v40 = vld [vmem:[%s11229_s7 + $0x8] sm:$0xff] }
 0x31c   :  { %v6075_v51 = vmax.f32 %v8255_v43, 0.0  ;;  %v6077_v52 = vmax.f32 %v8319_v48, 0.0  ;;  %v8193_v41 = vpack.c.bf16 %v7049_v40, %v7048_v39 }
 0x31d   :  { %v6076_v56 = vmax.f32 %v8256_v46, 0.0  ;;  %v6078_v57 = vmax.f32 %v8320_v47, 0.0 }
 0x31e   :  { %v6143_v58 = vpack.c.bf16 %v6075_v51, %v6071_v49  ;;  %v6145_v59 = vpack.c.bf16 %v6077_v52, %v6073_v50  ;;  %8194 = vmatprep.subr.bf16.mxu1 %v8193_v41 }
 0x31f   :  { %v6144_v60 = vpack.c.bf16 %v6076_v56, %v6072_v53  ;;  %v6146_v61 = vpack.c.bf16 %v6078_v57, %v6074_v55  ;;  %v5178_v62 = vpop.f32.mrb[60].mxu0  ;;  %v5950_v63 = vpop.f32.mrb[60].mxu1  ;;  %8196 = vmatpush3.bf16.msra.mxu1 %v8193_v41 }
 0x320   :  { %v8257_v0 = vadd.f32 %v5178_v62, %v10845_v34  ;;  %v8321_v1 = vadd.f32 %v5950_v63, %v10847_v20  ;;  %v5180_v2 = vpop.f32.mrb[61].mxu0  ;;  %v5952_v3 = vpop.f32.mrb[61].mxu1 }
 0x321   :  { %v8258_v4 = vadd.f32 %v5180_v2, %v10849_v35  ;;  %v8322_v5 = vadd.f32 %v5952_v3, %v10851_v36  ;;  %v5182_v6 = vpop.f32.mrb[62].mxu0  ;;  %v5954_v7 = vpop.f32.mrb[62].mxu1  ;;  %6558 = vmatprep.mubr.bf16.mxu0 %v6144_v60  ;;  %6719 = vmatprep.mubr.bf16.mxu1 %v6146_v61 }
 0x322   :  { %v8259_v8 = vadd.f32 %v5182_v6, %v10845_v34  ;;  %v8323_v9 = vadd.f32 %v5954_v7, %v10847_v20  ;;  %v5184_v10 = vpop.f32.mrb[63].mxu0  ;;  %v5956_v11 = vpop.f32.mrb[63].mxu1  ;;  %6559 = vmatmul.mubr.bf16.gmra.mrb[120].mxu0 %v6143_v58  ;;  %6720 = vmatmul.mubr.bf16.gmra.mrb[120].mxu1 %v6145_v59  ;;  %v6079_v14 = vmax.f32 %v8257_v0, 0.0  ;;  %v6081_v15 = vmax.f32 %v8321_v1, 0.0 }
 0x323   :  { %v8260_v12 = vadd.f32 %v5184_v10, %v10849_v35  ;;  %v8324_v13 = vadd.f32 %v5956_v11, %v10851_v36  ;;  %v6080_v18 = vmax.f32 %v8258_v4, 0.0  ;;  %v6082_v19 = vmax.f32 %v8322_v5, 0.0  ;;  %v11032_v36 = vld [vmem:[%s11226_s4] ss:$0 sm:$0xff] }
 0x324   :  { %v6083_v16 = vmax.f32 %v8259_v8, 0.0  ;;  %v6085_v17 = vmax.f32 %v8323_v9, 0.0 }
 0x325   :  { %v6084_v21 = vmax.f32 %v8260_v12, 0.0  ;;  %v6086_v22 = vmax.f32 %v8324_v13, 0.0 }
 0x326   :  { %v6147_v23 = vpack.c.bf16 %v6083_v16, %v6079_v14  ;;  %v6149_v34 = vpack.c.bf16 %v6085_v17, %v6081_v15 }
 0x327   :  { %v6148_v24 = vpack.c.bf16 %v6084_v21, %v6080_v18  ;;  %v6150_v20 = vpack.c.bf16 %v6086_v22, %v6082_v19 }
 0x329   :  { %6566 = vmatprep.mubr.bf16.mxu0 %v6148_v24  ;;  %6727 = vmatprep.mubr.bf16.mxu1 %v6150_v20 }
 0x32a   :  { %6567 = vmatmul.mubr.bf16.gmra.mrb[124].mxu0 %v6147_v23  ;;  %6728 = vmatmul.mubr.bf16.gmra.mrb[124].mxu1 %v6149_v34 }
 0x385   :  { %v7739_v25 = vpop.f32.mrb[64].mxu0  ;;  %v7851_v35 = vpop.f32.mrb[64].mxu1 }
 0x386   :  { %v7740_v26 = vpop.f32.mrb[65].mxu0  ;;  %v7852_v27 = vpop.f32.mrb[65].mxu1 }
 0x387   :  { %v7741_v28 = vadd.f32 %v7740_v26, %v7739_v25  ;;  %v7853_v29 = vadd.f32 %v7852_v27, %v7851_v35  ;;  %v7742_v30 = vpop.f32.mrb[66].mxu0  ;;  %v7854_v31 = vpop.f32.mrb[66].mxu1 }
 0x388   :  { %v7743_v54 = vpop.f32.mrb[67].mxu0  ;;  %v7855_v32 = vpop.f32.mrb[67].mxu1 }
 0x389   :  { %v6449_v33 = vadd.f32 %v7741_v28, %v11032_v36  ;;  %v7744_v37 = vadd.f32 %v7743_v54, %v7742_v30  ;;  %v7856_v38 = vadd.f32 %v7855_v32, %v7854_v31 }
 0x38b   :  { %v6610_v42 = vadd.f32 %v7853_v29, %v6449_v33  ;;  %v6452_v43 = vadd.f32 %v7744_v37, %v11032_v36 }
 0x38d   :  { %v6736_v48 = vmax.f32 %v6610_v42, 0.0  ;;  %v6613_v44 = vadd.f32 %v7856_v38, %v6452_v43  ;;  %v7745_v45 = vpop.f32.mrb[68].mxu0  ;;  %v7857_v46 = vpop.f32.mrb[68].mxu1 }
 0x38e   :  { %v7746_v47 = vpop.f32.mrb[69].mxu0  ;;  %v7858_v49 = vpop.f32.mrb[69].mxu1 }
 0x38f   :  { %v6737_v50 = vmax.f32 %v6613_v44, 0.0  ;;  %v7747_v51 = vadd.f32 %v7746_v47, %v7745_v45  ;;  %v7859_v52 = vadd.f32 %v7858_v49, %v7857_v46  ;;  %v7748_v53 = vpop.f32.mrb[70].mxu0  ;;  %v7860_v55 = vpop.f32.mrb[70].mxu1  ;;  %8061 = vmatprep.mubr.f32.mxu0 %v6736_v48 }
 0x390   :  { %v7749_v56 = vpop.f32.mrb[71].mxu0  ;;  %v7861_v57 = vpop.f32.mrb[71].mxu1 }
 0x391   :  { %v6457_v58 = vadd.f32 %v7747_v51, %v11032_v36  ;;  %v7750_v59 = vadd.f32 %v7749_v56, %v7748_v53  ;;  %v7862_v60 = vadd.f32 %v7861_v57, %v7860_v55  ;;  %8062 = vmatmul.mubr.f32.vlgmr.msra.gmra.mrb[128].mxu0 %v6737_v50 }
 0x393   :  { %v6618_v61 = vadd.f32 %v7859_v52, %v6457_v58  ;;  %v6460_v62 = vadd.f32 %v7750_v59, %v11032_v36 }
 0x395   :  { %v6738_v63 = vmax.f32 %v6618_v61, 0.0  ;;  %v6621_v0 = vadd.f32 %v7862_v60, %v6460_v62  ;;  %v7751_v1 = vpop.f32.mrb[72].mxu0  ;;  %v7863_v2 = vpop.f32.mrb[72].mxu1 }
 0x396   :  { %v7752_v3 = vpop.f32.mrb[73].mxu0  ;;  %v7864_v4 = vpop.f32.mrb[73].mxu1 }
 0x397   :  { %v6739_v5 = vmax.f32 %v6621_v0, 0.0  ;;  %v7753_v6 = vadd.f32 %v7752_v3, %v7751_v1  ;;  %v7865_v7 = vadd.f32 %v7864_v4, %v7863_v2  ;;  %v7754_v8 = vpop.f32.mrb[74].mxu0  ;;  %v7866_v9 = vpop.f32.mrb[74].mxu1  ;;  %8064 = vmatprep.mubr.f32.mxu0 %v6738_v63 }
 0x398   :  { %v7755_v10 = vpop.f32.mrb[75].mxu0  ;;  %v7867_v11 = vpop.f32.mrb[75].mxu1 }
 0x399   :  { %v6465_v12 = vadd.f32 %v7753_v6, %v11032_v36  ;;  %v7756_v13 = vadd.f32 %v7755_v10, %v7754_v8  ;;  %v7868_v14 = vadd.f32 %v7867_v11, %v7866_v9  ;;  %8065 = vmatmul.mubr.f32.gmra.mrb[130].mxu0 %v6739_v5 }
 0x39b   :  { %v6626_v15 = vadd.f32 %v7865_v7, %v6465_v12  ;;  %v6468_v16 = vadd.f32 %v7756_v13, %v11032_v36 }
 0x39d   :  { %v6740_v17 = vmax.f32 %v6626_v15, 0.0  ;;  %v6629_v18 = vadd.f32 %v7868_v14, %v6468_v16  ;;  %v7757_v19 = vpop.f32.mrb[76].mxu0  ;;  %v7869_v21 = vpop.f32.mrb[76].mxu1 }
 0x39e   :  { %v7758_v22 = vpop.f32.mrb[77].mxu0  ;;  %v7870_v23 = vpop.f32.mrb[77].mxu1 }
 0x39f   :  { %v6741_v34 = vmax.f32 %v6629_v18, 0.0  ;;  %v7759_v24 = vadd.f32 %v7758_v22, %v7757_v19  ;;  %v7871_v20 = vadd.f32 %v7870_v23, %v7869_v21  ;;  %v7760_v25 = vpop.f32.mrb[78].mxu0  ;;  %v7872_v35 = vpop.f32.mrb[78].mxu1  ;;  %8067 = vmatprep.mubr.f32.mxu0 %v6740_v17 }
 0x3a0   :  { %v7761_v26 = vpop.f32.mrb[79].mxu0  ;;  %v7873_v27 = vpop.f32.mrb[79].mxu1 }
 0x3a1   :  { %v6473_v28 = vadd.f32 %v7759_v24, %v11032_v36  ;;  %v7762_v29 = vadd.f32 %v7761_v26, %v7760_v25  ;;  %v7874_v30 = vadd.f32 %v7873_v27, %v7872_v35  ;;  %8068 = vmatmul.mubr.f32.gmra.mrb[132].mxu0 %v6741_v34 }
 0x3a3   :  { %v6634_v31 = vadd.f32 %v7871_v20, %v6473_v28  ;;  %v6476_v54 = vadd.f32 %v7762_v29, %v11032_v36 }
 0x3a5   :  { %v6742_v32 = vmax.f32 %v6634_v31, 0.0  ;;  %v6637_v33 = vadd.f32 %v7874_v30, %v6476_v54  ;;  %v7763_v37 = vpop.f32.mrb[80].mxu0  ;;  %v7875_v38 = vpop.f32.mrb[80].mxu1 }
 0x3a6   :  { %v7764_v39 = vpop.f32.mrb[81].mxu0  ;;  %v7876_v40 = vpop.f32.mrb[81].mxu1 }
 0x3a7   :  { %v6743_v41 = vmax.f32 %v6637_v33, 0.0  ;;  %v7765_v42 = vadd.f32 %v7764_v39, %v7763_v37  ;;  %v7877_v43 = vadd.f32 %v7876_v40, %v7875_v38  ;;  %v7766_v48 = vpop.f32.mrb[82].mxu0  ;;  %v7878_v44 = vpop.f32.mrb[82].mxu1  ;;  %8070 = vmatprep.mubr.f32.mxu0 %v6742_v32 }
 0x3a8   :  { %v7767_v45 = vpop.f32.mrb[83].mxu0  ;;  %v7879_v46 = vpop.f32.mrb[83].mxu1 }
 0x3a9   :  { %v6481_v47 = vadd.f32 %v7765_v42, %v11032_v36  ;;  %v7768_v49 = vadd.f32 %v7767_v45, %v7766_v48  ;;  %v7880_v50 = vadd.f32 %v7879_v46, %v7878_v44  ;;  %8071 = vmatmul.mubr.f32.gmra.mrb[134].mxu0 %v6743_v41 }
 0x3ab   :  { %v6642_v51 = vadd.f32 %v7877_v43, %v6481_v47  ;;  %v6484_v52 = vadd.f32 %v7768_v49, %v11032_v36 }
 0x3ad   :  { %v6744_v53 = vmax.f32 %v6642_v51, 0.0  ;;  %v6645_v55 = vadd.f32 %v7880_v50, %v6484_v52  ;;  %v7769_v56 = vpop.f32.mrb[84].mxu0  ;;  %v7881_v57 = vpop.f32.mrb[84].mxu1 }
 0x3ae   :  { %v7770_v58 = vpop.f32.mrb[85].mxu0  ;;  %v7882_v59 = vpop.f32.mrb[85].mxu1 }
 0x3af   :  { %v6745_v60 = vmax.f32 %v6645_v55, 0.0  ;;  %v7771_v61 = vadd.f32 %v7770_v58, %v7769_v56  ;;  %v7883_v62 = vadd.f32 %v7882_v59, %v7881_v57  ;;  %v7772_v63 = vpop.f32.mrb[86].mxu0  ;;  %v7884_v0 = vpop.f32.mrb[86].mxu1  ;;  %8073 = vmatprep.mubr.f32.mxu0 %v6744_v53 }
 0x3b0   :  { %v7773_v1 = vpop.f32.mrb[87].mxu0  ;;  %v7885_v2 = vpop.f32.mrb[87].mxu1 }
 0x3b1   :  { %v6489_v3 = vadd.f32 %v7771_v61, %v11032_v36  ;;  %v7774_v4 = vadd.f32 %v7773_v1, %v7772_v63  ;;  %v7886_v5 = vadd.f32 %v7885_v2, %v7884_v0  ;;  %8074 = vmatmul.mubr.f32.gmra.mrb[136].mxu0 %v6745_v60 }
 0x3b3   :  { %v6650_v6 = vadd.f32 %v7883_v62, %v6489_v3  ;;  %v6492_v7 = vadd.f32 %v7774_v4, %v11032_v36 }
 0x3b5   :  { %v6746_v8 = vmax.f32 %v6650_v6, 0.0  ;;  %v6653_v9 = vadd.f32 %v7886_v5, %v6492_v7  ;;  %v7775_v10 = vpop.f32.mrb[88].mxu0  ;;  %v7887_v11 = vpop.f32.mrb[88].mxu1 }
 0x3b6   :  { %v7776_v12 = vpop.f32.mrb[89].mxu0  ;;  %v7888_v13 = vpop.f32.mrb[89].mxu1 }
 0x3b7   :  { %v6747_v14 = vmax.f32 %v6653_v9, 0.0  ;;  %v7777_v15 = vadd.f32 %v7776_v12, %v7775_v10  ;;  %v7889_v16 = vadd.f32 %v7888_v13, %v7887_v11  ;;  %v7778_v17 = vpop.f32.mrb[90].mxu0  ;;  %v7890_v18 = vpop.f32.mrb[90].mxu1  ;;  %8076 = vmatprep.mubr.f32.mxu0 %v6746_v8 }
 0x3b8   :  { %v7779_v19 = vpop.f32.mrb[91].mxu0  ;;  %v7891_v21 = vpop.f32.mrb[91].mxu1 }
 0x3b9   :  { %v6497_v22 = vadd.f32 %v7777_v15, %v11032_v36  ;;  %v7780_v23 = vadd.f32 %v7779_v19, %v7778_v17  ;;  %v7892_v34 = vadd.f32 %v7891_v21, %v7890_v18  ;;  %8077 = vmatmul.mubr.f32.gmra.mrb[138].mxu0 %v6747_v14 }
 0x3bb   :  { %v6658_v24 = vadd.f32 %v7889_v16, %v6497_v22  ;;  %v6500_v20 = vadd.f32 %v7780_v23, %v11032_v36 }
 0x3bd   :  { %v6748_v25 = vmax.f32 %v6658_v24, 0.0  ;;  %v6661_v35 = vadd.f32 %v7892_v34, %v6500_v20  ;;  %v7781_v26 = vpop.f32.mrb[92].mxu0  ;;  %v7893_v27 = vpop.f32.mrb[92].mxu1 }
 0x3be   :  { %v7782_v28 = vpop.f32.mrb[93].mxu0  ;;  %v7894_v29 = vpop.f32.mrb[93].mxu1 }
 0x3bf   :  { %v6749_v30 = vmax.f32 %v6661_v35, 0.0  ;;  %v7783_v31 = vadd.f32 %v7782_v28, %v7781_v26  ;;  %v7895_v54 = vadd.f32 %v7894_v29, %v7893_v27  ;;  %v7784_v32 = vpop.f32.mrb[94].mxu0  ;;  %v7896_v33 = vpop.f32.mrb[94].mxu1  ;;  %8079 = vmatprep.mubr.f32.mxu0 %v6748_v25 }
 0x3c0   :  { %v7785_v37 = vpop.f32.mrb[95].mxu0  ;;  %v7897_v38 = vpop.f32.mrb[95].mxu1 }
 0x3c1   :  { %v6505_v39 = vadd.f32 %v7783_v31, %v11032_v36  ;;  %v7786_v40 = vadd.f32 %v7785_v37, %v7784_v32  ;;  %v7898_v41 = vadd.f32 %v7897_v38, %v7896_v33  ;;  %8080 = vmatmul.mubr.f32.gmra.mrb[140].mxu0 %v6749_v30 }
 0x3c3   :  { %v6666_v42 = vadd.f32 %v7895_v54, %v6505_v39  ;;  %v6508_v43 = vadd.f32 %v7786_v40, %v11032_v36 }
 0x3c5   :  { %v6750_v48 = vmax.f32 %v6666_v42, 0.0  ;;  %v6669_v44 = vadd.f32 %v7898_v41, %v6508_v43  ;;  %v7787_v45 = vpop.f32.mrb[96].mxu0  ;;  %v7899_v46 = vpop.f32.mrb[96].mxu1 }
 0x3c6   :  { %v7788_v47 = vpop.f32.mrb[97].mxu0  ;;  %v7900_v49 = vpop.f32.mrb[97].mxu1 }
 0x3c7   :  { %v6751_v50 = vmax.f32 %v6669_v44, 0.0  ;;  %v7789_v51 = vadd.f32 %v7788_v47, %v7787_v45  ;;  %v7901_v52 = vadd.f32 %v7900_v49, %v7899_v46  ;;  %v7790_v53 = vpop.f32.mrb[98].mxu0  ;;  %v7902_v55 = vpop.f32.mrb[98].mxu1  ;;  %8082 = vmatprep.mubr.f32.mxu0 %v6750_v48 }
 0x3c8   :  { %v7791_v56 = vpop.f32.mrb[99].mxu0  ;;  %v7903_v57 = vpop.f32.mrb[99].mxu1 }
 0x3c9   :  { %v6513_v58 = vadd.f32 %v7789_v51, %v11032_v36  ;;  %v7792_v59 = vadd.f32 %v7791_v56, %v7790_v53  ;;  %v7904_v60 = vadd.f32 %v7903_v57, %v7902_v55  ;;  %8083 = vmatmul.mubr.f32.gmra.mrb[142].mxu0 %v6751_v50 }
 0x3cb   :  { %v6674_v61 = vadd.f32 %v7901_v52, %v6513_v58  ;;  %v6516_v62 = vadd.f32 %v7792_v59, %v11032_v36 }
 0x3cd   :  { %v6752_v63 = vmax.f32 %v6674_v61, 0.0  ;;  %v6677_v0 = vadd.f32 %v7904_v60, %v6516_v62  ;;  %v7793_v1 = vpop.f32.mrb[100].mxu0  ;;  %v7905_v2 = vpop.f32.mrb[100].mxu1 }
 0x3ce   :  { %v7794_v3 = vpop.f32.mrb[101].mxu0  ;;  %v7906_v4 = vpop.f32.mrb[101].mxu1 }
 0x3cf   :  { %v6753_v5 = vmax.f32 %v6677_v0, 0.0  ;;  %v7795_v6 = vadd.f32 %v7794_v3, %v7793_v1  ;;  %v7907_v7 = vadd.f32 %v7906_v4, %v7905_v2  ;;  %v7796_v8 = vpop.f32.mrb[102].mxu0  ;;  %v7908_v9 = vpop.f32.mrb[102].mxu1  ;;  %8085 = vmatprep.mubr.f32.mxu0 %v6752_v63 }
 0x3d0   :  { %v7797_v10 = vpop.f32.mrb[103].mxu0  ;;  %v7909_v11 = vpop.f32.mrb[103].mxu1 }
 0x3d1   :  { %v6521_v12 = vadd.f32 %v7795_v6, %v11032_v36  ;;  %v7798_v13 = vadd.f32 %v7797_v10, %v7796_v8  ;;  %v7910_v14 = vadd.f32 %v7909_v11, %v7908_v9  ;;  %8086 = vmatmul.mubr.f32.gmra.mrb[144].mxu0 %v6753_v5 }
 0x3d3   :  { %v6682_v15 = vadd.f32 %v7907_v7, %v6521_v12  ;;  %v6524_v16 = vadd.f32 %v7798_v13, %v11032_v36 }
 0x3d5   :  { %v6754_v17 = vmax.f32 %v6682_v15, 0.0  ;;  %v6685_v18 = vadd.f32 %v7910_v14, %v6524_v16  ;;  %v7799_v19 = vpop.f32.mrb[104].mxu0  ;;  %v7911_v21 = vpop.f32.mrb[104].mxu1 }
 0x3d6   :  { %v7800_v22 = vpop.f32.mrb[105].mxu0  ;;  %v7912_v23 = vpop.f32.mrb[105].mxu1 }
 0x3d7   :  { %v6755_v34 = vmax.f32 %v6685_v18, 0.0  ;;  %v7801_v24 = vadd.f32 %v7800_v22, %v7799_v19  ;;  %v7913_v20 = vadd.f32 %v7912_v23, %v7911_v21  ;;  %v7802_v25 = vpop.f32.mrb[106].mxu0  ;;  %v7914_v35 = vpop.f32.mrb[106].mxu1  ;;  %8088 = vmatprep.mubr.f32.mxu0 %v6754_v17 }
 0x3d8   :  { %v7803_v26 = vpop.f32.mrb[107].mxu0  ;;  %v7915_v27 = vpop.f32.mrb[107].mxu1 }
 0x3d9   :  { %v6529_v28 = vadd.f32 %v7801_v24, %v11032_v36  ;;  %v7804_v29 = vadd.f32 %v7803_v26, %v7802_v25  ;;  %v7916_v30 = vadd.f32 %v7915_v27, %v7914_v35  ;;  %8089 = vmatmul.mubr.f32.gmra.mrb[146].mxu0 %v6755_v34 }
 0x3db   :  { %v6690_v31 = vadd.f32 %v7913_v20, %v6529_v28  ;;  %v6532_v54 = vadd.f32 %v7804_v29, %v11032_v36 }
 0x3dd   :  { %v6756_v32 = vmax.f32 %v6690_v31, 0.0  ;;  %v6693_v33 = vadd.f32 %v7916_v30, %v6532_v54  ;;  %v7805_v37 = vpop.f32.mrb[108].mxu0  ;;  %v7917_v38 = vpop.f32.mrb[108].mxu1 }
 0x3de   :  { %v7806_v39 = vpop.f32.mrb[109].mxu0  ;;  %v7918_v40 = vpop.f32.mrb[109].mxu1 }
 0x3df   :  { %v6757_v41 = vmax.f32 %v6693_v33, 0.0  ;;  %v7807_v42 = vadd.f32 %v7806_v39, %v7805_v37  ;;  %v7919_v43 = vadd.f32 %v7918_v40, %v7917_v38  ;;  %v7808_v48 = vpop.f32.mrb[110].mxu0  ;;  %v7920_v44 = vpop.f32.mrb[110].mxu1  ;;  %8091 = vmatprep.mubr.f32.mxu0 %v6756_v32 }
 0x3e0   :  { %v7809_v45 = vpop.f32.mrb[111].mxu0  ;;  %v7921_v46 = vpop.f32.mrb[111].mxu1 }
 0x3e1   :  { %v6537_v47 = vadd.f32 %v7807_v42, %v11032_v36  ;;  %v7810_v49 = vadd.f32 %v7809_v45, %v7808_v48  ;;  %v7922_v50 = vadd.f32 %v7921_v46, %v7920_v44  ;;  %8092 = vmatmul.mubr.f32.gmra.mrb[148].mxu0 %v6757_v41 }
 0x3e3   :  { %v6698_v51 = vadd.f32 %v7919_v43, %v6537_v47  ;;  %v6540_v52 = vadd.f32 %v7810_v49, %v11032_v36 }
 0x3e5   :  { %v6758_v53 = vmax.f32 %v6698_v51, 0.0  ;;  %v6701_v55 = vadd.f32 %v7922_v50, %v6540_v52  ;;  %v7811_v56 = vpop.f32.mrb[112].mxu0  ;;  %v7923_v57 = vpop.f32.mrb[112].mxu1 }
 0x3e6   :  { %v7812_v58 = vpop.f32.mrb[113].mxu0  ;;  %v7924_v59 = vpop.f32.mrb[113].mxu1 }
 0x3e7   :  { %v6759_v60 = vmax.f32 %v6701_v55, 0.0  ;;  %v7813_v61 = vadd.f32 %v7812_v58, %v7811_v56  ;;  %v7925_v62 = vadd.f32 %v7924_v59, %v7923_v57  ;;  %v7814_v63 = vpop.f32.mrb[114].mxu0  ;;  %v7926_v0 = vpop.f32.mrb[114].mxu1  ;;  %8094 = vmatprep.mubr.f32.mxu0 %v6758_v53 }
 0x3e8   :  { %v7815_v1 = vpop.f32.mrb[115].mxu0  ;;  %v7927_v2 = vpop.f32.mrb[115].mxu1 }
 0x3e9   :  { %v6545_v3 = vadd.f32 %v7813_v61, %v11032_v36  ;;  %v7816_v4 = vadd.f32 %v7815_v1, %v7814_v63  ;;  %v7928_v5 = vadd.f32 %v7927_v2, %v7926_v0  ;;  %8095 = vmatmul.mubr.f32.gmra.mrb[150].mxu0 %v6759_v60  ;;  %v11075_v2 = vld [vmem:[%s11228_s6] ss:$0 sm:$0xff] }
 0x3eb   :  { %v6706_v6 = vadd.f32 %v7925_v62, %v6545_v3  ;;  %v6548_v7 = vadd.f32 %v7816_v4, %v11032_v36 }
 0x3ed   :  { %v6760_v8 = vmax.f32 %v6706_v6, 0.0  ;;  %v6709_v9 = vadd.f32 %v7928_v5, %v6548_v7  ;;  %v7817_v10 = vpop.f32.mrb[116].mxu0  ;;  %v7929_v11 = vpop.f32.mrb[116].mxu1 }
 0x3ee   :  { %v7818_v12 = vpop.f32.mrb[117].mxu0  ;;  %v7930_v13 = vpop.f32.mrb[117].mxu1 }
 0x3ef   :  { %v6761_v14 = vmax.f32 %v6709_v9, 0.0  ;;  %v7819_v15 = vadd.f32 %v7818_v12, %v7817_v10  ;;  %v7931_v16 = vadd.f32 %v7930_v13, %v7929_v11  ;;  %v7820_v17 = vpop.f32.mrb[118].mxu0  ;;  %v7932_v18 = vpop.f32.mrb[118].mxu1  ;;  %8097 = vmatprep.mubr.f32.mxu0 %v6760_v8 }
 0x3f0   :  { %v7821_v19 = vpop.f32.mrb[119].mxu0  ;;  %v7933_v21 = vpop.f32.mrb[119].mxu1 }
 0x3f1   :  { %v6553_v22 = vadd.f32 %v7819_v15, %v11032_v36  ;;  %v7822_v23 = vadd.f32 %v7821_v19, %v7820_v17  ;;  %v7934_v34 = vadd.f32 %v7933_v21, %v7932_v18  ;;  %8098 = vmatmul.mubr.f32.gmra.mrb[152].mxu0 %v6761_v14 }
 0x3f3   :  { %v6714_v24 = vadd.f32 %v7931_v16, %v6553_v22  ;;  %v6556_v20 = vadd.f32 %v7822_v23, %v11032_v36 }
 0x3f5   :  { %v6762_v25 = vmax.f32 %v6714_v24, 0.0  ;;  %v6717_v35 = vadd.f32 %v7934_v34, %v6556_v20  ;;  %v7823_v26 = vpop.f32.mrb[120].mxu0  ;;  %v7935_v27 = vpop.f32.mrb[120].mxu1 }
 0x3f6   :  { %v7824_v28 = vpop.f32.mrb[121].mxu0  ;;  %v7936_v29 = vpop.f32.mrb[121].mxu1 }
 0x3f7   :  { %v6763_v30 = vmax.f32 %v6717_v35, 0.0  ;;  %v7825_v31 = vadd.f32 %v7824_v28, %v7823_v26  ;;  %v7937_v54 = vadd.f32 %v7936_v29, %v7935_v27  ;;  %v7826_v32 = vpop.f32.mrb[122].mxu0  ;;  %v7938_v33 = vpop.f32.mrb[122].mxu1  ;;  %8100 = vmatprep.mubr.f32.mxu0 %v6762_v25 }
 0x3f8   :  { %v7827_v37 = vpop.f32.mrb[123].mxu0  ;;  %v7939_v38 = vpop.f32.mrb[123].mxu1 }
 0x3f9   :  { %v6561_v39 = vadd.f32 %v7825_v31, %v11032_v36  ;;  %v7828_v40 = vadd.f32 %v7827_v37, %v7826_v32  ;;  %v7940_v41 = vadd.f32 %v7939_v38, %v7938_v33  ;;  %8101 = vmatmul.mubr.f32.gmra.mrb[154].mxu0 %v6763_v30 }
 0x3fb   :  { %v6722_v42 = vadd.f32 %v7937_v54, %v6561_v39  ;;  %v6564_v43 = vadd.f32 %v7828_v40, %v11032_v36 }
 0x3fd   :  { %v6764_v48 = vmax.f32 %v6722_v42, 0.0  ;;  %v6725_v44 = vadd.f32 %v7940_v41, %v6564_v43  ;;  %v7829_v45 = vpop.f32.mrb[124].mxu0  ;;  %v7941_v46 = vpop.f32.mrb[124].mxu1 }
 0x3fe   :  { %v7830_v47 = vpop.f32.mrb[125].mxu0  ;;  %v7942_v49 = vpop.f32.mrb[125].mxu1 }
 0x3ff   :  { %v6765_v50 = vmax.f32 %v6725_v44, 0.0  ;;  %v7831_v51 = vadd.f32 %v7830_v47, %v7829_v45  ;;  %v7943_v52 = vadd.f32 %v7942_v49, %v7941_v46  ;;  %v7832_v53 = vpop.f32.mrb[126].mxu0  ;;  %v7944_v55 = vpop.f32.mrb[126].mxu1  ;;  %8103 = vmatprep.mubr.f32.mxu0 %v6764_v48 }
 0x400   :  { %v7833_v56 = vpop.f32.mrb[127].mxu0  ;;  %v7945_v57 = vpop.f32.mrb[127].mxu1 }
 0x401   :  { %v6569_v58 = vadd.f32 %v7831_v51, %v11032_v36  ;;  %v7834_v59 = vadd.f32 %v7833_v56, %v7832_v53  ;;  %v7946_v60 = vadd.f32 %v7945_v57, %v7944_v55  ;;  %8104 = vmatmul.mubr.f32.gmra.mrb[156].mxu0 %v6765_v50 }
 0x403   :  { %v6730_v61 = vadd.f32 %v7943_v52, %v6569_v58  ;;  %v6572_v62 = vadd.f32 %v7834_v59, %v11032_v36 }
 0x405   :  { %v6766_v63 = vmax.f32 %v6730_v61, 0.0  ;;  %v6733_v0 = vadd.f32 %v7946_v60, %v6572_v62 }
 0x407   :  { %v6767_v1 = vmax.f32 %v6733_v0, 0.0  ;;  %8106 = vmatprep.mubr.f32.mxu0 %v6766_v63 }
 0x409   :  { %8107 = vmatmul.mubr.f32.gmra.mrb[158].mxu0 %v6767_v1 }
 0x464   :  { %v8063_v3 = vpop.f32.mrb[128].mxu0 }
 0x465   :  { %v6863_v4 = vadd.f32 %v8063_v3, %v11075_v2  ;;  %v6857_v5 = vpop.f32.mrb[129].mxu0 }
 0x466   :  { %v6858_v6 = vadd.f32 %v11075_v2, %v6857_v5 }
 0x467   :  { %v7017_v8 = vmax.f32 %v6863_v4, 0.0 }
 0x468   :  { %v7016_v7 = vmax.f32 %v6858_v6, 0.0 }
 0x46a   :  { %8113 = vmatprep.mubr.msk.f32.mxu1 %vm4366_vm0, %v7016_v7 }
 0x46b   :  { %8114 = vmatmul.mubr.msk.f32.vlgmr.msra.gmra.mrb[128].mxu1 %vm4366_vm0, %v7017_v8 }
 0x46c   :  { %v8066_v36 = vpop.f32.mrb[130].mxu0 }
 0x46d   :  { %v6873_v9 = vadd.f32 %v8066_v36, %v11075_v2  ;;  %v6867_v10 = vpop.f32.mrb[131].mxu0 }
 0x46e   :  { %v6868_v11 = vadd.f32 %v11075_v2, %v6867_v10 }
 0x46f   :  { %v7019_v13 = vmax.f32 %v6873_v9, 0.0 }
 0x470   :  { %v7018_v12 = vmax.f32 %v6868_v11, 0.0 }
 0x472   :  { %8116 = vmatprep.mubr.msk.f32.mxu1 %vm4366_vm0, %v7018_v12 }
 0x473   :  { %8117 = vmatmul.mubr.msk.f32.gmra.mrb[130].mxu1 %vm4366_vm0, %v7019_v13 }
 0x474   :  { %v8069_v14 = vpop.f32.mrb[132].mxu0 }
 0x475   :  { %v6883_v15 = vadd.f32 %v8069_v14, %v11075_v2  ;;  %v6877_v16 = vpop.f32.mrb[133].mxu0 }
 0x476   :  { %v6878_v17 = vadd.f32 %v11075_v2, %v6877_v16 }
 0x477   :  { %v7021_v19 = vmax.f32 %v6883_v15, 0.0 }
 0x478   :  { %v7020_v18 = vmax.f32 %v6878_v17, 0.0 }
 0x47a   :  { %8119 = vmatprep.mubr.msk.f32.mxu1 %vm4366_vm0, %v7020_v18 }
 0x47b   :  { %8120 = vmatmul.mubr.msk.f32.gmra.mrb[132].mxu1 %vm4366_vm0, %v7021_v19 }
 0x47c   :  { %v8072_v21 = vpop.f32.mrb[134].mxu0 }
 0x47d   :  { %v6893_v22 = vadd.f32 %v8072_v21, %v11075_v2  ;;  %v6887_v23 = vpop.f32.mrb[135].mxu0 }
 0x47e   :  { %v6888_v34 = vadd.f32 %v11075_v2, %v6887_v23 }
 0x47f   :  { %v7023_v20 = vmax.f32 %v6893_v22, 0.0 }
 0x480   :  { %v7022_v24 = vmax.f32 %v6888_v34, 0.0 }
 0x482   :  { %8122 = vmatprep.mubr.msk.f32.mxu1 %vm4366_vm0, %v7022_v24 }
 0x483   :  { %8123 = vmatmul.mubr.msk.f32.gmra.mrb[134].mxu1 %vm4366_vm0, %v7023_v20 }
 0x484   :  { %v8075_v25 = vpop.f32.mrb[136].mxu0 }
 0x485   :  { %v6903_v35 = vadd.f32 %v8075_v25, %v11075_v2  ;;  %v6897_v26 = vpop.f32.mrb[137].mxu0 }
 0x486   :  { %v6898_v27 = vadd.f32 %v11075_v2, %v6897_v26 }
 0x487   :  { %v7025_v29 = vmax.f32 %v6903_v35, 0.0 }
 0x488   :  { %v7024_v28 = vmax.f32 %v6898_v27, 0.0 }
 0x48a   :  { %8125 = vmatprep.mubr.msk.f32.mxu1 %vm4366_vm0, %v7024_v28 }
 0x48b   :  { %8126 = vmatmul.mubr.msk.f32.gmra.mrb[136].mxu1 %vm4366_vm0, %v7025_v29 }
 0x48c   :  { %v8078_v30 = vpop.f32.mrb[138].mxu0 }
 0x48d   :  { %v6913_v31 = vadd.f32 %v8078_v30, %v11075_v2  ;;  %v6907_v54 = vpop.f32.mrb[139].mxu0 }
 0x48e   :  { %v6908_v32 = vadd.f32 %v11075_v2, %v6907_v54 }
 0x48f   :  { %v7027_v37 = vmax.f32 %v6913_v31, 0.0 }
 0x490   :  { %v7026_v33 = vmax.f32 %v6908_v32, 0.0  ;;  %v11144_v32 = vld [vmem:[%s11230_s8] ss:$0 sm:$0xff] }
 0x492   :  { %8128 = vmatprep.mubr.msk.f32.mxu1 %vm4366_vm0, %v7026_v33 }
 0x493   :  { %8129 = vmatmul.mubr.msk.f32.gmra.mrb[138].mxu1 %vm4366_vm0, %v7027_v37 }
 0x494   :  { %v8081_v38 = vpop.f32.mrb[140].mxu0 }
 0x495   :  { %v6923_v39 = vadd.f32 %v8081_v38, %v11075_v2  ;;  %v6917_v40 = vpop.f32.mrb[141].mxu0 }
 0x496   :  { %v6918_v41 = vadd.f32 %v11075_v2, %v6917_v40 }
 0x497   :  { %v7029_v43 = vmax.f32 %v6923_v39, 0.0 }
 0x498   :  { %v7028_v42 = vmax.f32 %v6918_v41, 0.0 }
 0x49a   :  { %8131 = vmatprep.mubr.msk.f32.mxu1 %vm4366_vm0, %v7028_v42 }
 0x49b   :  { %8132 = vmatmul.mubr.msk.f32.gmra.mrb[140].mxu1 %vm4366_vm0, %v7029_v43 }
 0x49c   :  { %v8084_v48 = vpop.f32.mrb[142].mxu0 }
 0x49d   :  { %v6933_v44 = vadd.f32 %v8084_v48, %v11075_v2  ;;  %v6927_v45 = vpop.f32.mrb[143].mxu0 }
 0x49e   :  { %v6928_v46 = vadd.f32 %v11075_v2, %v6927_v45 }
 0x49f   :  { %v7031_v49 = vmax.f32 %v6933_v44, 0.0 }
 0x4a0   :  { %v7030_v47 = vmax.f32 %v6928_v46, 0.0 }
 0x4a2   :  { %8134 = vmatprep.mubr.msk.f32.mxu1 %vm4366_vm0, %v7030_v47 }
 0x4a3   :  { %8135 = vmatmul.mubr.msk.f32.gmra.mrb[142].mxu1 %vm4366_vm0, %v7031_v49 }
 0x4a4   :  { %v8087_v50 = vpop.f32.mrb[144].mxu0 }
 0x4a5   :  { %v6943_v51 = vadd.f32 %v8087_v50, %v11075_v2  ;;  %v6937_v52 = vpop.f32.mrb[145].mxu0 }
 0x4a6   :  { %v6938_v53 = vadd.f32 %v11075_v2, %v6937_v52 }
 0x4a7   :  { %v7033_v56 = vmax.f32 %v6943_v51, 0.0 }
 0x4a8   :  { %v7032_v55 = vmax.f32 %v6938_v53, 0.0 }
 0x4aa   :  { %8137 = vmatprep.mubr.msk.f32.mxu1 %vm4366_vm0, %v7032_v55 }
 0x4ab   :  { %8138 = vmatmul.mubr.msk.f32.gmra.mrb[144].mxu1 %vm4366_vm0, %v7033_v56 }
 0x4ac   :  { %v8090_v57 = vpop.f32.mrb[146].mxu0 }
 0x4ad   :  { %v6953_v58 = vadd.f32 %v8090_v57, %v11075_v2  ;;  %v6947_v59 = vpop.f32.mrb[147].mxu0 }
 0x4ae   :  { %v6948_v60 = vadd.f32 %v11075_v2, %v6947_v59 }
 0x4af   :  { %v7035_v62 = vmax.f32 %v6953_v58, 0.0 }
 0x4b0   :  { %v7034_v61 = vmax.f32 %v6948_v60, 0.0 }
 0x4b2   :  { %8140 = vmatprep.mubr.msk.f32.mxu1 %vm4366_vm0, %v7034_v61 }
 0x4b3   :  { %8141 = vmatmul.mubr.msk.f32.gmra.mrb[146].mxu1 %vm4366_vm0, %v7035_v62 }
 0x4b4   :  { %v8093_v63 = vpop.f32.mrb[148].mxu0 }
 0x4b5   :  { %v6963_v0 = vadd.f32 %v8093_v63, %v11075_v2  ;;  %v6957_v1 = vpop.f32.mrb[149].mxu0 }
 0x4b6   :  { %v6958_v3 = vadd.f32 %v11075_v2, %v6957_v1 }
 0x4b7   :  { %v7037_v5 = vmax.f32 %v6963_v0, 0.0 }
 0x4b8   :  { %v7036_v4 = vmax.f32 %v6958_v3, 0.0 }
 0x4ba   :  { %8143 = vmatprep.mubr.msk.f32.mxu1 %vm4366_vm0, %v7036_v4 }
 0x4bb   :  { %8144 = vmatmul.mubr.msk.f32.gmra.mrb[148].mxu1 %vm4366_vm0, %v7037_v5 }
 0x4bc   :  { %v8096_v6 = vpop.f32.mrb[150].mxu0 }
 0x4bd   :  { %v6973_v7 = vadd.f32 %v8096_v6, %v11075_v2  ;;  %v6967_v8 = vpop.f32.mrb[151].mxu0 }
 0x4be   :  { %v6968_v36 = vadd.f32 %v11075_v2, %v6967_v8 }
 0x4bf   :  { %v7039_v10 = vmax.f32 %v6973_v7, 0.0 }
 0x4c0   :  { %v7038_v9 = vmax.f32 %v6968_v36, 0.0 }
 0x4c2   :  { %8146 = vmatprep.mubr.msk.f32.mxu1 %vm4366_vm0, %v7038_v9 }
 0x4c3   :  { %8147 = vmatmul.mubr.msk.f32.gmra.mrb[150].mxu1 %vm4366_vm0, %v7039_v10 }
 0x4c4   :  { %v8099_v11 = vpop.f32.mrb[152].mxu0 }
 0x4c5   :  { %v6983_v12 = vadd.f32 %v8099_v11, %v11075_v2  ;;  %v6977_v13 = vpop.f32.mrb[153].mxu0 }
 0x4c6   :  { %v6978_v14 = vadd.f32 %v11075_v2, %v6977_v13 }
 0x4c7   :  { %v7041_v16 = vmax.f32 %v6983_v12, 0.0 }
 0x4c8   :  { %v7040_v15 = vmax.f32 %v6978_v14, 0.0 }
 0x4ca   :  { %8149 = vmatprep.mubr.msk.f32.mxu1 %vm4366_vm0, %v7040_v15 }
 0x4cb   :  { %8150 = vmatmul.mubr.msk.f32.gmra.mrb[152].mxu1 %vm4366_vm0, %v7041_v16 }
 0x4cc   :  { %v8102_v17 = vpop.f32.mrb[154].mxu0 }
 0x4cd   :  { %v6993_v18 = vadd.f32 %v8102_v17, %v11075_v2  ;;  %v6987_v19 = vpop.f32.mrb[155].mxu0 }
 0x4ce   :  { %v6988_v21 = vadd.f32 %v11075_v2, %v6987_v19 }
 0x4cf   :  { %v7043_v23 = vmax.f32 %v6993_v18, 0.0 }
 0x4d0   :  { %v7042_v22 = vmax.f32 %v6988_v21, 0.0 }
 0x4d2   :  { %8152 = vmatprep.mubr.msk.f32.mxu1 %vm4366_vm0, %v7042_v22 }
 0x4d3   :  { %8153 = vmatmul.mubr.msk.f32.gmra.mrb[154].mxu1 %vm4366_vm0, %v7043_v23 }
 0x4d4   :  { %v8105_v34 = vpop.f32.mrb[156].mxu0 }
 0x4d5   :  { %v7003_v24 = vadd.f32 %v8105_v34, %v11075_v2  ;;  %v6997_v20 = vpop.f32.mrb[157].mxu0 }
 0x4d6   :  { %v6998_v25 = vadd.f32 %v11075_v2, %v6997_v20 }
 0x4d7   :  { %v7045_v26 = vmax.f32 %v7003_v24, 0.0 }
 0x4d8   :  { %v7044_v35 = vmax.f32 %v6998_v25, 0.0 }
 0x4da   :  { %8155 = vmatprep.mubr.msk.f32.mxu1 %vm4366_vm0, %v7044_v35 }
 0x4db   :  { %8156 = vmatmul.mubr.msk.f32.gmra.mrb[156].mxu1 %vm4366_vm0, %v7045_v26 }
 0x4dc   :  { %v8108_v27 = vpop.f32.mrb[158].mxu0 }
 0x4dd   :  { %v7013_v28 = vadd.f32 %v8108_v27, %v11075_v2  ;;  %v7007_v29 = vpop.f32.mrb[159].mxu0 }
 0x4de   :  { %v7008_v30 = vadd.f32 %v11075_v2, %v7007_v29 }
 0x4df   :  { %v7047_v54 = vmax.f32 %v7013_v28, 0.0 }
 0x4e0   :  { %v7046_v31 = vmax.f32 %v7008_v30, 0.0 }
 0x4e2   :  { %8158 = vmatprep.mubr.msk.f32.mxu1 %vm4366_vm0, %v7046_v31 }
 0x4e3   :  { %8159 = vmatmul.mubr.msk.f32.gmra.mrb[158].mxu1 %vm4366_vm0, %v7047_v54 }
 0x53e   :  { %v8115_v33 = vpop.f32.mrb[128].mxu1 }
 0x53f   :  { %v7225_v37 = vadd.f32 %v8115_v33, %v11144_v32  ;;  %v7219_v38 = vpop.f32.mrb[129].mxu1 }
 0x540   :  { %v7220_v39 = vadd.f32 %v11144_v32, %v7219_v38 }
 0x541   :  { %7380 = vst.msk [vmem:[#allocation5 + $0x8] sm:$0xff] %vm7378_vm1, %v7225_v37 }
 0x542   :  { %7379 = vst.msk [vmem:[#allocation5] sm:$0xff] %vm7378_vm1, %v7220_v39 }
 0x546   :  { %v8118_v2 = vpop.f32.mrb[130].mxu1 }
 0x547   :  { %v7235_v40 = vadd.f32 %v8118_v2, %v11144_v32  ;;  %v7229_v41 = vpop.f32.mrb[131].mxu1 }
 0x548   :  { %v7230_v42 = vadd.f32 %v11144_v32, %v7229_v41 }
 0x549   :  { %7382 = vst.msk [vmem:[#allocation5 + $0x18] sm:$0xff] %vm7378_vm1, %v7235_v40 }
 0x54a   :  { %7381 = vst.msk [vmem:[#allocation5 + $0x10] sm:$0xff] %vm7378_vm1, %v7230_v42 }
 0x54e   :  { %v8121_v43 = vpop.f32.mrb[132].mxu1 }
 0x54f   :  { %v7245_v48 = vadd.f32 %v8121_v43, %v11144_v32  ;;  %v7239_v44 = vpop.f32.mrb[133].mxu1 }
 0x550   :  { %v7240_v45 = vadd.f32 %v11144_v32, %v7239_v44 }
 0x551   :  { %7384 = vst.msk [vmem:[#allocation5 + $0x28] sm:$0xff] %vm7378_vm1, %v7245_v48 }
 0x552   :  { %7383 = vst.msk [vmem:[#allocation5 + $0x20] sm:$0xff] %vm7378_vm1, %v7240_v45 }
 0x556   :  { %v8124_v46 = vpop.f32.mrb[134].mxu1 }
 0x557   :  { %v7255_v47 = vadd.f32 %v8124_v46, %v11144_v32  ;;  %v7249_v49 = vpop.f32.mrb[135].mxu1 }
 0x558   :  { %v7250_v50 = vadd.f32 %v11144_v32, %v7249_v49 }
 0x559   :  { %7386 = vst.msk [vmem:[#allocation5 + $0x38] sm:$0xff] %vm7378_vm1, %v7255_v47 }
 0x55a   :  { %7385 = vst.msk [vmem:[#allocation5 + $0x30] sm:$0xff] %vm7378_vm1, %v7250_v50 }
 0x55e   :  { %v8127_v51 = vpop.f32.mrb[136].mxu1 }
 0x55f   :  { %v7265_v52 = vadd.f32 %v8127_v51, %v11144_v32  ;;  %v7259_v53 = vpop.f32.mrb[137].mxu1 }
 0x560   :  { %v7260_v55 = vadd.f32 %v11144_v32, %v7259_v53 }
 0x561   :  { %7388 = vst.msk [vmem:[#allocation5 + $0x48] sm:$0xff] %vm7378_vm1, %v7265_v52 }
 0x562   :  { %7387 = vst.msk [vmem:[#allocation5 + $0x40] sm:$0xff] %vm7378_vm1, %v7260_v55 }
 0x566   :  { %v8130_v56 = vpop.f32.mrb[138].mxu1 }
 0x567   :  { %v7275_v57 = vadd.f32 %v8130_v56, %v11144_v32  ;;  %v7269_v58 = vpop.f32.mrb[139].mxu1 }
 0x568   :  { %v7270_v59 = vadd.f32 %v11144_v32, %v7269_v58 }
 0x569   :  { %7390 = vst.msk [vmem:[#allocation5 + $0x58] sm:$0xff] %vm7378_vm1, %v7275_v57 }
 0x56a   :  { %7389 = vst.msk [vmem:[#allocation5 + $0x50] sm:$0xff] %vm7378_vm1, %v7270_v59 }
 0x56e   :  { %v8133_v60 = vpop.f32.mrb[140].mxu1 }
 0x56f   :  { %v7285_v61 = vadd.f32 %v8133_v60, %v11144_v32  ;;  %v7279_v62 = vpop.f32.mrb[141].mxu1 }
 0x570   :  { %v7280_v63 = vadd.f32 %v11144_v32, %v7279_v62 }
 0x571   :  { %7392 = vst.msk [vmem:[#allocation5 + $0x68] sm:$0xff] %vm7378_vm1, %v7285_v61 }
 0x572   :  { %7391 = vst.msk [vmem:[#allocation5 + $0x60] sm:$0xff] %vm7378_vm1, %v7280_v63 }
 0x576   :  { %v8136_v0 = vpop.f32.mrb[142].mxu1 }
 0x577   :  { %v7295_v1 = vadd.f32 %v8136_v0, %v11144_v32  ;;  %v7289_v3 = vpop.f32.mrb[143].mxu1 }
 0x578   :  { %v7290_v4 = vadd.f32 %v11144_v32, %v7289_v3 }
 0x579   :  { %7394 = vst.msk [vmem:[#allocation5 + $0x78] sm:$0xff] %vm7378_vm1, %v7295_v1 }
 0x57a   :  { %7393 = vst.msk [vmem:[#allocation5 + $0x70] sm:$0xff] %vm7378_vm1, %v7290_v4 }
 0x57e   :  { %v8139_v5 = vpop.f32.mrb[144].mxu1 }
 0x57f   :  { %v7305_v6 = vadd.f32 %v8139_v5, %v11144_v32  ;;  %v7299_v7 = vpop.f32.mrb[145].mxu1 }
 0x580   :  { %v7300_v8 = vadd.f32 %v11144_v32, %v7299_v7 }
 0x581   :  { %7396 = vst.msk [vmem:[#allocation5 + $0x88] sm:$0xff] %vm7378_vm1, %v7305_v6 }
 0x582   :  { %7395 = vst.msk [vmem:[#allocation5 + $0x80] sm:$0xff] %vm7378_vm1, %v7300_v8 }
 0x586   :  { %v8142_v36 = vpop.f32.mrb[146].mxu1 }
 0x587   :  { %v7315_v9 = vadd.f32 %v8142_v36, %v11144_v32  ;;  %v7309_v10 = vpop.f32.mrb[147].mxu1 }
 0x588   :  { %v7310_v11 = vadd.f32 %v11144_v32, %v7309_v10 }
 0x589   :  { %7398 = vst.msk [vmem:[#allocation5 + $0x98] sm:$0xff] %vm7378_vm1, %v7315_v9 }
 0x58a   :  { %7397 = vst.msk [vmem:[#allocation5 + $0x90] sm:$0xff] %vm7378_vm1, %v7310_v11 }
 0x58e   :  { %v8145_v12 = vpop.f32.mrb[148].mxu1 }
 0x58f   :  { %v7325_v13 = vadd.f32 %v8145_v12, %v11144_v32  ;;  %v7319_v14 = vpop.f32.mrb[149].mxu1 }
 0x590   :  { %v7320_v15 = vadd.f32 %v11144_v32, %v7319_v14 }
 0x591   :  { %7400 = vst.msk [vmem:[#allocation5 + $0xa8] sm:$0xff] %vm7378_vm1, %v7325_v13 }
 0x592   :  { %7399 = vst.msk [vmem:[#allocation5 + $0xa0] sm:$0xff] %vm7378_vm1, %v7320_v15 }
 0x596   :  { %v8148_v16 = vpop.f32.mrb[150].mxu1 }
 0x597   :  { %v7335_v17 = vadd.f32 %v8148_v16, %v11144_v32  ;;  %v7329_v18 = vpop.f32.mrb[151].mxu1 }
 0x598   :  { %v7330_v19 = vadd.f32 %v11144_v32, %v7329_v18 }
 0x599   :  { %7402 = vst.msk [vmem:[#allocation5 + $0xb8] sm:$0xff] %vm7378_vm1, %v7335_v17 }
 0x59a   :  { %7401 = vst.msk [vmem:[#allocation5 + $0xb0] sm:$0xff] %vm7378_vm1, %v7330_v19 }
 0x59e   :  { %v8151_v21 = vpop.f32.mrb[152].mxu1 }
 0x59f   :  { %v7345_v22 = vadd.f32 %v8151_v21, %v11144_v32  ;;  %v7339_v23 = vpop.f32.mrb[153].mxu1 }
 0x5a0   :  { %v7340_v34 = vadd.f32 %v11144_v32, %v7339_v23 }
 0x5a1   :  { %7404 = vst.msk [vmem:[#allocation5 + $0xc8] sm:$0xff] %vm7378_vm1, %v7345_v22 }
 0x5a2   :  { %7403 = vst.msk [vmem:[#allocation5 + $0xc0] sm:$0xff] %vm7378_vm1, %v7340_v34 }
 0x5a6   :  { %v8154_v24 = vpop.f32.mrb[154].mxu1 }
 0x5a7   :  { %v7355_v20 = vadd.f32 %v8154_v24, %v11144_v32  ;;  %v7349_v25 = vpop.f32.mrb[155].mxu1 }
 0x5a8   :  { %v7350_v35 = vadd.f32 %v11144_v32, %v7349_v25 }
 0x5a9   :  { %7406 = vst.msk [vmem:[#allocation5 + $0xd8] sm:$0xff] %vm7378_vm1, %v7355_v20 }
 0x5aa   :  { %7405 = vst.msk [vmem:[#allocation5 + $0xd0] sm:$0xff] %vm7378_vm1, %v7350_v35 }
 0x5ae   :  { %v8157_v26 = vpop.f32.mrb[156].mxu1 }
 0x5af   :  { %v7365_v27 = vadd.f32 %v8157_v26, %v11144_v32  ;;  %v7359_v28 = vpop.f32.mrb[157].mxu1 }
 0x5b0   :  { %v7360_v29 = vadd.f32 %v11144_v32, %v7359_v28 }
 0x5b1   :  { %7408 = vst.msk [vmem:[#allocation5 + $0xe8] sm:$0xff] %vm7378_vm1, %v7365_v27 }
 0x5b2   :  { %7407 = vst.msk [vmem:[#allocation5 + $0xe0] sm:$0xff] %vm7378_vm1, %v7360_v29 }
 0x5b6   :  { %v8160_v30 = vpop.f32.mrb[158].mxu1 }
 0x5b7   :  { %v7375_v31 = vadd.f32 %v8160_v30, %v11144_v32  ;;  %v7369_v54 = vpop.f32.mrb[159].mxu1 }
 0x5b8   :  { %v7370_v33 = vadd.f32 %v11144_v32, %v7369_v54 }
 0x5b9   :  { %7410 = vst.msk [vmem:[#allocation5 + $0xf8] sm:$0xff] %vm7378_vm1, %v7375_v31 }
 0x5ba   :  { %7409 = vst.msk [vmem:[#allocation5 + $0xf0] sm:$0xff] %vm7378_vm1, %v7370_v33 }
 0x5bb   :  { %7415 = vsyncadd [#allocation4], 4064  ;;  %s9480_s8 = smov [#allocation5]  }
 0x5bc   :  { %s7416_s14 = sshll.u32 %s9480_s8, 4  ;;  %s7417_s14 = int_to_ptr.vmem [resolvable:$true] %s7416_s14 }
 0x5bd   :  { %s9449_s15 = scalar_lea.vmem %s7417_s14, 32  ;;  %s9453_s16 = scalar_lea.vmem %s7417_s14, 4096 }
 0x5be   :  { %p9450_p8 = scmp.ne.s32.totalorder %s7417_s14, %s9449_s15  ;;  %p9454_p9 = scmp.lt.s32.totalorder %s7417_s14, %s7417_s14 }
 0x5bf   :  { %p9455_p10 = scmp.lt.s32.totalorder %s9453_s16, %s9449_s15 }
 0x5c1   :  { %p9456_p11 = por %p9455_p10, %p9454_p9 }
 0x5c3   :  { %p9457_p12 = pnand %p9456_p11, %p9450_p8 }
 0x5c5   :  { %9460 = shalt.err (!%p9457_p12)
}
 0x5c6   :  { %s9461_s18 = scalar_lea.hbm %s11231_s9, 32 }
 0x5c7   :  { %p9462_p13 = scmp.ne.s32.totalorder %s11231_s9, %s9461_s18  ;;  %p9465_p0 = scmp.lt.u32.totalorder %s9461_s18, %s11231_s9 }
 0x5c9   :  { %p9467_p1 = pnand %p9465_p0, %p9462_p13 }
 0x5cb   :  { %9470 = shalt.err (!%p9467_p1)
}
 0x5cc   :  { %s9481_s0 = smov 32   ;;  %s9482_s1 = smov 2  }
 0x5cd   :  { %7422 = dma.vmem_to_hbm [thread:$0]  %s7417_s14, 32, %s11231_s9, [#allocation4], %s9481_s0, %s9481_s0, %s9482_s1  }
 0x5ce   :  { %9473 = dma.done.wait [#allocation4], 4096  }
 0x5cf   :  { %9474 = vsyncadd [#allocation4], 4294963200 }
 0x5d0   :  { %7426 = vsyncpa [#allocation3], 1 }
 0x5d1   :  { %7427 = vsyncpa [#allocation4], 1 }

</bundles_post_ra>
